<compile_context>
chip_gen: v7x
topology: tpu7x:2x2x1
jax: 0.10.0
libtpu: 0.0.40
codegen_flags: <defaults>
</compile_context>

<pallas_src>
import numpy as np
import jax
import jax.numpy as jnp
from jax.experimental import pallas as pl
from jax.experimental.pallas import tpu as pltpu


# ----------------------------------------------------------------------------
# Kernel 1: fused CNN (4x Conv3x3 + folded BN + ReLU) + embedding + LSTM input
#           projection.
# ----------------------------------------------------------------------------
def _cnn_embed_kernel(p1_ref, w1_ref, s1_ref, b1_ref,
                      wst2_ref, s2_ref, b2_ref,
                      wst3_ref, s3_ref, b3_ref,
                      wst4_ref, s4_ref, b4_ref,
                      wlin_ref, rb_ref, wih_ref, bcat_ref,
                      o_ref, xpad_scr):
    hp2, wp2, lanes = xpad_scr.shape
    ho, wo = hp2 - 2, wp2 - 2
    hw = ho * wo
    C, HWp, E = wlin_ref.shape
    npg = lanes // C

    # Zero only the 1-pixel border (the interior is always overwritten before
    # it is read).  Unconditional so each TensorCore's private scratch is
    # initialised under the "parallel" grid split.
    xpad_scr[0:1, :, :] = jnp.zeros((1, wp2, lanes), xpad_scr.dtype)
    xpad_scr[ho + 1:ho + 2, :, :] = jnp.zeros((1, wp2, lanes), xpad_scr.dtype)
    xpad_scr[1:ho + 1, 0:1, :] = jnp.zeros((ho, 1, lanes), xpad_scr.dtype)
    xpad_scr[1:ho + 1, wo + 1:wo + 2, :] = jnp.zeros((ho, 1, lanes), xpad_scr.dtype)

    # Layer 1: stride-2 conv as a single (hw, 9*npg) x (9*npg, lanes) matmul on
    # wrapper-side im2col patches (bf16 operands, f32 accumulation).
    y = jnp.dot(p1_ref[0], w1_ref[...], preferred_element_type=jnp.float32)
    y = jnp.maximum(y * s1_ref[...] + b1_ref[...], 0.0)          # (hw, lanes) f32

    def conv_layer(y_in, wst_ref, s_ref, b_ref):
        # stride-1 / pad-1 3x3 conv: 9 shifted slices of the zero-bordered
        # scratch concatenated along lanes -> ONE wide-K MXU matmul.
        xpad_scr[1:1 + ho, 1:1 + wo, :] = y_in.reshape(ho, wo, lanes)
        xs = jnp.concatenate(
            [xpad_scr[di:di + ho, dj:dj + wo, :]
             .reshape(hw, lanes).astype(jnp.bfloat16)
             for di in range(3) for dj in range(3)],
            axis=-1)                                             # (hw, 9*lanes) bf16
        acc = jnp.dot(xs, wst_ref[...], preferred_element_type=jnp.float32)
        return jnp.maximum(acc * s_ref[...] + b_ref[...], 0.0)

    y = conv_layer(y, wst2_ref, s2_ref, b2_ref)
    y = conv_layer(y, wst3_ref, s3_ref, b3_ref)
    y = conv_layer(y, wst4_ref, s4_ref, b4_ref)                  # (hw, lanes) f32

    # Epilogue: one XLU transpose moves panels lanes -> sublanes, then the
    # TagPanelEmbeddings Linear + ReLU and the hoisted LSTM input projection.
    # Pad rows to HWp (multiple of 128) so the transpose is a fully tile-aligned
    # (HWp, 128) -> (128, HWp) transpose; wlin has matching zero rows.
    if HWp > hw:
        y = jnp.concatenate([y, jnp.zeros((HWp - hw, lanes), jnp.float32)],
                            axis=0)
    yT = y.T                                                     # (lanes, HWp), row = c*npg + p

    emb = jnp.zeros((npg, E), jnp.float32)
    for c in range(C):                                           # 8 small f32 dots, once per group
        emb = emb + jnp.dot(yT[c * npg:(c + 1) * npg, :], wlin_ref[c],
                            preferred_element_type=jnp.float32)
    emb = jnp.maximum(emb + rb_ref[0], 0.0)                      # Linear + ReLU (LayerNorm -> Identity)

    # LSTM input projection x @ [W_ii|W_if|W_io|W_ig] + (b_ih + b_hh); lane-dense 4E out.
    o_ref[0] = (jnp.dot(emb, wih_ref[...], preferred_element_type=jnp.float32)
                + bcat_ref[...])


def cnn_embed_project(panels, row_bias_panels, params):
    """panels: (NP, H, W) single-channel panels.  row_bias_panels: (NP, E)
    per-panel bias (tag part of the Linear folded in).  Returns the per-panel
    LSTM-gate pre-activations (NP_pad, 4E) in gate order (i|f|o|g)."""
    NP, H, W = panels.shape
    C = params["conv_scale"][0].shape[0]
    E = params["lin_b"].shape[0]
    Ho, Wo = H // 2, W // 2
    HW = Ho * Wo
    HWp = -(-HW // 128) * 128
    assert 128 % C == 0
    npg = 128 // C                       # panels per group -> lanes == 128 exactly
    lanes = npg * C

    n_groups = max(2, -(-NP // npg))     # >= 2 keeps both v7x TensorCores busy
    NP_pad = n_groups * npg
    if NP_pad != NP:
        panels = jnp.pad(panels, ((0, NP_pad - NP), (0, 0), (0, 0)))
        row_bias_panels = jnp.pad(row_bias_panels, ((0, NP_pad - NP), (0, 0)))

    # Layer-1 im2col (stride 2, pad 1); lane index = tap*npg + panel_in_group.
    xp = jnp.pad(panels, ((0, 0), (1, 1), (1, 1)))
    taps = [xp[:, di:di + 2 * Ho - 1:2, dj:dj + 2 * Wo - 1:2]
            for di in range(3) for dj in range(3)]
    p1 = jnp.stack(taps, axis=0)                                 # (9, NP_pad, Ho, Wo)
    p1 = p1.reshape(9, n_groups, npg, HW)
    p1 = p1.transpose(1, 3, 0, 2).reshape(n_groups, HW, 9 * npg)
    p1 = p1.astype(jnp.bfloat16)

    # Block-diagonal (per-panel) conv weights, channel-major lanes, bf16.
    eye = jnp.eye(npg, dtype=jnp.float32)
    w1 = params["conv_w"][0].reshape(9, C)                       # cin == 1
    w1bd = jnp.einsum("tj,pq->tpjq", w1, eye).reshape(9 * npg, lanes)
    w1bd = w1bd.astype(jnp.bfloat16)

    def stack_bd(w):                                             # (3,3,C,C) -> (9*lanes, lanes)
        wt = w.reshape(9, C, C)
        out = jnp.einsum("tij,pq->tipjq", wt, eye)
        return out.reshape(9 * lanes, lanes).astype(jnp.bfloat16)

    wst = [stack_bd(params["conv_w"][l]) for l in (1, 2, 3)]
    # lane = c*npg + p  -> per-channel scale/bias repeated npg times.
    scl = [jnp.repeat(params["conv_scale"][l], npg).reshape(1, lanes) for l in range(4)]
    bia = [jnp.repeat(params["conv_bias"][l], npg).reshape(1, lanes) for l in range(4)]

    # Embedding weights in PyTorch (C, Ho, Wo) flatten order, zero-padded rows
    # beyond HW to match the zero-padded transposed activations.
    wlin = params["lin_w"][:C * HW].reshape(C, HW, E)
    if HWp > HW:
        wlin = jnp.pad(wlin, ((0, 0), (0, HWp - HW), (0, 0)))
    rb = row_bias_panels.reshape(n_groups, npg, E)
    wih = params["w_ih_cat"]
    bcat = (params["b_ih"] + params["b_hh"]).reshape(1, 4 * E)

    out = pl.pallas_call(
        _cnn_embed_kernel,
        out_shape=jax.ShapeDtypeStruct((n_groups, npg, 4 * E), jnp.float32),
        grid_spec=pltpu.PrefetchScalarGridSpec(
            num_scalar_prefetch=0,
            grid=(n_groups,),
            in_specs=[
                pl.BlockSpec((1, HW, 9 * npg), lambda g: (g, 0, 0)),
                pl.BlockSpec((9 * npg, lanes), lambda g: (0, 0)),
                pl.BlockSpec((1, lanes), lambda g: (0, 0)),
                pl.BlockSpec((1, lanes), lambda g: (0, 0)),
                pl.BlockSpec((9 * lanes, lanes), lambda g: (0, 0)),
                pl.BlockSpec((1, lanes), lambda g: (0, 0)),
                pl.BlockSpec((1, lanes), lambda g: (0, 0)),
                pl.BlockSpec((9 * lanes, lanes), lambda g: (0, 0)),
                pl.BlockSpec((1, lanes), lambda g: (0, 0)),
                pl.BlockSpec((1, lanes), lambda g: (0, 0)),
                pl.BlockSpec((9 * lanes, lanes), lambda g: (0, 0)),
                pl.BlockSpec((1, lanes), lambda g: (0, 0)),
                pl.BlockSpec((1, lanes), lambda g: (0, 0)),
                pl.BlockSpec((C, HWp, E), lambda g: (0, 0, 0)),
                pl.BlockSpec((1, npg, E), lambda g: (g, 0, 0)),
                pl.BlockSpec((E, 4 * E), lambda g: (0, 0)),
                pl.BlockSpec((1, 4 * E), lambda g: (0, 0)),
            ],
            out_specs=pl.BlockSpec((1, npg, 4 * E), lambda g: (g, 0, 0)),
            scratch_shapes=[pltpu.VMEM((Ho + 2, Wo + 2, lanes), jnp.float32)],
        ),
        compiler_params=pltpu.CompilerParams(dimension_semantics=("parallel",)),
    )(p1, w1bd, scl[0], bia[0],
      wst[0], scl[1], bia[1],
      wst[1], scl[2], bia[2],
      wst[2], scl[3], bia[3],
      wlin, rb, wih, bcat)

    return out.reshape(NP_pad, 4 * E), NP_pad


# ----------------------------------------------------------------------------
# Kernel 2: LSTM recurrence with in-kernel sequence construction.
# ----------------------------------------------------------------------------
def _lstm_kernel(pre_ref, sel_ref, whh_ref, o_ref):
    L, BA, _ = sel_ref.shape
    E = whh_ref.shape[0]
    pre_all = pre_ref[...]                                       # (NP_pad, 4E) f32
    whh = whh_ref[...]                                           # (E, 4E) bf16, vreg-resident

    # Per-step inputs: one-hot selection matmul ("gather" on the MXU); kept off
    # the serial recurrence chain.
    xs = [jnp.dot(sel_ref[t], pre_all, preferred_element_type=jnp.float32)
          for t in range(L)]                                     # each (BA, 4E)

    h = jnp.zeros((BA, E), jnp.float32)
    c = jnp.zeros((BA, E), jnp.float32)
    for t in range(L):                                           # short (NC+1) unrolled loop
        g = xs[t] + jnp.dot(h.astype(jnp.bfloat16), whh,
                            preferred_element_type=jnp.float32)  # (BA, 4E) f32
        # gate order (i | f | o | g): one sigmoid dispatch + one tanh dispatch
        sig = jax.nn.sigmoid(g[:, :3 * E])
        i_g = sig[:, :E]
        f_g = sig[:, E:2 * E]
        o_g = sig[:, 2 * E:3 * E]
        g_g = jnp.tanh(g[:, 3 * E:])
        c = f_g * c + i_g * g_g
        h = o_g * jnp.tanh(c)
    o_ref[...] = h                                               # written once, at the end


def lstm_last_hidden(pre_all, sel, w_hh_cat_bf16):
    """pre_all: (NP_pad, 4E) per-panel gate pre-activations.
    sel: (L, BA_pad, NP_pad) one-hot sequence-selection tensor.
    Returns h_L of shape (BA_pad, E)."""
    NPp, E4 = pre_all.shape
    L, BA, _ = sel.shape
    E = w_hh_cat_bf16.shape[0]
    return pl.pallas_call(
        _lstm_kernel,
        out_shape=jax.ShapeDtypeStruct((BA, E), jnp.float32),
        grid_spec=pltpu.PrefetchScalarGridSpec(
            num_scalar_prefetch=0,
            grid=(1,),
            in_specs=[
                pl.BlockSpec((NPp, E4), lambda i: (0, 0)),
                pl.BlockSpec((L, BA, NPp), lambda i: (0, 0, 0)),
                pl.BlockSpec((E, E4), lambda i: (0, 0)),
            ],
            out_specs=pl.BlockSpec((BA, E), lambda i: (0, 0)),
        ),
        compiler_params=pltpu.CompilerParams(dimension_semantics=("arbitrary",)),
    )(pre_all, sel, w_hh_cat_bf16)


# ----------------------------------------------------------------------------
# Parameters (random init; BatchNorm folded in eval mode).
# Gate order for w_ih_cat / w_hh_cat / biases is (i | f | o | g); converting a
# PyTorch LSTM checkpoint (gate order i,f,g,o, weights (4E,E)) requires
# permuting the gate blocks and transposing.
# ----------------------------------------------------------------------------
def init_params(key, num_channels, embedding_size, image_size):
    C, E = num_channels, embedding_size
    conv_dim = C * (image_size // 2) ** 2
    D = conv_dim + 9
    keys = jax.random.split(key, 24)
    eps = 1e-5

    conv_w, conv_scale, conv_bias = [], [], []
    cin = 1
    for li in range(4):
        w = jax.random.normal(keys[li], (3, 3, cin, C), jnp.float32) * 0.1
        conv_b = jax.random.normal(keys[4 + li], (C,), jnp.float32) * 0.01
        gamma = 1.0 + 0.05 * jax.random.normal(keys[8 + li], (C,), jnp.float32)
        beta = 0.01 * jax.random.normal(keys[12 + li], (C,), jnp.float32)
        running_mean = jnp.zeros((C,), jnp.float32)
        running_var = jnp.ones((C,), jnp.float32)
        s = gamma / jnp.sqrt(running_var + eps)
        conv_w.append(w)
        conv_scale.append(s)
        conv_bias.append((conv_b - running_mean) * s + beta)
        cin = C

    lin_w = jax.random.normal(keys[16], (D, E), jnp.float32) / jnp.sqrt(float(D))
    lin_b = jax.random.normal(keys[17], (E,), jnp.float32) * 0.01
    w_ih_cat = jax.random.normal(keys[18], (E, 4 * E), jnp.float32) / jnp.sqrt(float(E))
    w_hh_cat = jax.random.normal(keys[19], (E, 4 * E), jnp.float32) / jnp.sqrt(float(E))
    b_ih = jax.random.normal(keys[20], (4 * E,), jnp.float32) * 0.01
    b_hh = jax.random.normal(keys[21], (4 * E,), jnp.float32) * 0.01

    return dict(conv_w=conv_w, conv_scale=conv_scale, conv_bias=conv_bias,
                lin_w=lin_w, lin_b=lin_b,
                w_ih_cat=w_ih_cat, w_hh_cat=w_hh_cat, b_ih=b_ih, b_hh=b_hh)


# ----------------------------------------------------------------------------
# Forward pass
# ----------------------------------------------------------------------------
def cnn_lstm_forward(context, answers, params):
    # context: (B, num_ctx, 1, H, W), answers: (B, num_ans, 1, H, W)
    B, NC = context.shape[0], context.shape[1]
    NA = answers.shape[1]
    P = NC + NA
    x = jnp.concatenate([context, answers], axis=1)              # (B, P, 1, H, W)
    H, W = x.shape[-2], x.shape[-1]
    panels = x.reshape(B * P, H, W)                              # Cin == 1

    C = params["conv_scale"][0].shape[0]
    E = params["lin_b"].shape[0]
    conv_dim = C * (H // 2) * (W // 2)

    # TagPanelEmbeddings: 9-dim one-hot positional tag (context panels at cols
    # 0..NC-1, answer panels at col 8), folded into the Linear as a per-panel
    # bias because cat([feat, tag]) @ W == feat @ W_feat + tag @ W_tag.
    # TODO(synk): assumes the reference TagPanelEmbeddings layout with NC <= 8.
    tags = jnp.zeros((P, 9), jnp.float32)
    tags = tags.at[:NC, :NC].set(jnp.eye(NC, dtype=jnp.float32))
    tags = tags.at[NC:, 8].set(1.0)
    row_bias = tags @ params["lin_w"][conv_dim:] + params["lin_b"]   # (P, E)
    row_bias = jnp.tile(row_bias, (B, 1))                            # (B*P, E)

    # --- Kernel 1: CNN + embedding + LSTM input projection ---
    pre_all, NP_pad = cnn_embed_project(panels, row_bias, params)    # (NP_pad, 4E)

    # --- Kernel 2: LSTM; sequences built in-kernel from a constant one-hot
    #     selection tensor (row j = b*NA + a sees [ctx_0..ctx_{NC-1}, ans_a]).
    BA = B * NA
    BA_pad = max(8, -(-BA // 8) * 8)
    L = NC + 1
    sel = np.zeros((L, BA_pad, NP_pad), np.float32)
    for b in range(B):
        for a in range(NA):
            j = b * NA + a
            for t in range(NC):
                sel[t, j, b * P + t] = 1.0
            sel[NC, j, b * P + NC + a] = 1.0
    sel = jnp.asarray(sel)

    h_last = lstm_last_hidden(pre_all, sel,
                              params["w_hh_cat"].astype(jnp.bfloat16))
    return h_last[:BA].reshape(B, NA, E)


# ----------------------------------------------------------------------------
if __name__ == "__main__":
    key = jax.random.PRNGKey(0)
    B, NC, NA, H = 2, 8, 2, 16        # 8 context + 2 answer panels of 16x16
    C, E = 8, 32                      # num_channels=8, embedding_size=32
    kc, ka, kp = jax.random.split(key, 3)
    context = jax.random.normal(kc, (B, NC, 1, H, H), jnp.float32)
    answers = jax.random.normal(ka, (B, NA, 1, H, H), jnp.float32)
    params = init_params(kp, C, E, H)

    fwd = jax.jit(cnn_lstm_forward)
    out = jax.block_until_ready(fwd(context, answers, params))
    assert out.shape == (B, NA, E), out.shape
    assert bool(jnp.all(jnp.isfinite(out)))
    print("KERNEL_OK")
</pallas_src>

<mosaic_0001>
module attributes {stable_mosaic.version = 11 : i64} {
  func.func @_cnn_embed_kernel(%arg0: i32, %arg1: memref<1x64x144xbf16, #tpu.memory_space<vmem>>, %arg2: memref<144x128xbf16, #tpu.memory_space<vmem>>, %arg3: memref<1x128xf32, #tpu.memory_space<vmem>>, %arg4: memref<1x128xf32, #tpu.memory_space<vmem>>, %arg5: memref<1152x128xbf16, #tpu.memory_space<vmem>>, %arg6: memref<1x128xf32, #tpu.memory_space<vmem>>, %arg7: memref<1x128xf32, #tpu.memory_space<vmem>>, %arg8: memref<1152x128xbf16, #tpu.memory_space<vmem>>, %arg9: memref<1x128xf32, #tpu.memory_space<vmem>>, %arg10: memref<1x128xf32, #tpu.memory_space<vmem>>, %arg11: memref<1152x128xbf16, #tpu.memory_space<vmem>>, %arg12: memref<1x128xf32, #tpu.memory_space<vmem>>, %arg13: memref<1x128xf32, #tpu.memory_space<vmem>>, %arg14: memref<8x128x32xf32, #tpu.memory_space<vmem>>, %arg15: memref<1x16x32xf32, #tpu.memory_space<vmem>>, %arg16: memref<32x128xf32, #tpu.memory_space<vmem>>, %arg17: memref<1x128xf32, #tpu.memory_space<vmem>>, %arg18: memref<1x16x128xf32, #tpu.memory_space<vmem>>, %arg19: memref<10x10x128xf32, #tpu.memory_space<vmem>>) attributes {dimension_semantics = [#tpu.dimension_semantics<parallel>], iteration_bounds = array<i64: 2>, scalar_prefetch = 0 : i64, scratch_operands = 1 : i64, tpu.core_type = #tpu.core_type<tc>, window_params = [{transform_indices = @transform_0, window_bounds = array<i64: 1, 64, 144>}, {pipeline_mode = #tpu.pipeline_mode<synchronous>, transform_indices = @transform_1, window_bounds = array<i64: 144, 128>}, {pipeline_mode = #tpu.pipeline_mode<synchronous>, transform_indices = @transform_2, window_bounds = array<i64: 1, 128>}, {pipeline_mode = #tpu.pipeline_mode<synchronous>, transform_indices = @transform_3, window_bounds = array<i64: 1, 128>}, {pipeline_mode = #tpu.pipeline_mode<synchronous>, transform_indices = @transform_4, window_bounds = array<i64: 1152, 128>}, {pipeline_mode = #tpu.pipeline_mode<synchronous>, transform_indices = @transform_5, window_bounds = array<i64: 1, 128>}, {pipeline_mode = #tpu.pipeline_mode<synchronous>, transform_indices = @transform_6, window_bounds = array<i64: 1, 128>}, {pipeline_mode = #tpu.pipeline_mode<synchronous>, transform_indices = @transform_7, window_bounds = array<i64: 1152, 128>}, {pipeline_mode = #tpu.pipeline_mode<synchronous>, transform_indices = @transform_8, window_bounds = array<i64: 1, 128>}, {pipeline_mode = #tpu.pipeline_mode<synchronous>, transform_indices = @transform_9, window_bounds = array<i64: 1, 128>}, {pipeline_mode = #tpu.pipeline_mode<synchronous>, transform_indices = @transform_10, window_bounds = array<i64: 1152, 128>}, {pipeline_mode = #tpu.pipeline_mode<synchronous>, transform_indices = @transform_11, window_bounds = array<i64: 1, 128>}, {pipeline_mode = #tpu.pipeline_mode<synchronous>, transform_indices = @transform_12, window_bounds = array<i64: 1, 128>}, {pipeline_mode = #tpu.pipeline_mode<synchronous>, transform_indices = @transform_13, window_bounds = array<i64: 8, 128, 32>}, {transform_indices = @transform_14, window_bounds = array<i64: 1, 16, 32>}, {pipeline_mode = #tpu.pipeline_mode<synchronous>, transform_indices = @transform_15, window_bounds = array<i64: 32, 128>}, {pipeline_mode = #tpu.pipeline_mode<synchronous>, transform_indices = @transform_16, window_bounds = array<i64: 1, 128>}, {transform_indices = @transform_17, window_bounds = array<i64: 1, 16, 128>}]} {
    %cst = arith.constant 0.000000e+00 : f32
    %0 = vector.broadcast %cst : f32 to vector<1x10x128xf32>
    %c0 = arith.constant 0 : index
    %c0_0 = arith.constant 0 : index
    %c0_1 = arith.constant 0 : index
    %1 = vector.load %arg19[%c0, %c0_0, %c0_1] : memref<10x10x128xf32, #tpu.memory_space<vmem>>, vector<1x10x128xf32>
    tpu.vector_store %arg19[%c0, %c0_0, %c0_1], %0 {strides = array<i32>} : memref<10x10x128xf32, #tpu.memory_space<vmem>>, vector<1x10x128xf32>,
    %cst_2 = arith.constant 0.000000e+00 : f32
    %2 = vector.broadcast %cst_2 : f32 to vector<1x10x128xf32>
    %c9 = arith.constant 9 : index
    %c0_3 = arith.constant 0 : index
    %c0_4 = arith.constant 0 : index
    %3 = vector.load %arg19[%c9, %c0_3, %c0_4] : memref<10x10x128xf32, #tpu.memory_space<vmem>>, vector<1x10x128xf32>
    tpu.vector_store %arg19[%c9, %c0_3, %c0_4], %2 {strides = array<i32>} : memref<10x10x128xf32, #tpu.memory_space<vmem>>, vector<1x10x128xf32>,
    %cst_5 = arith.constant 0.000000e+00 : f32
    %4 = vector.broadcast %cst_5 : f32 to vector<8x1x128xf32>
    %c1 = arith.constant 1 : index
    %c0_6 = arith.constant 0 : index
    %c0_7 = arith.constant 0 : index
    %5 = vector.load %arg19[%c1, %c0_6, %c0_7] : memref<10x10x128xf32, #tpu.memory_space<vmem>>, vector<8x1x128xf32>
    tpu.vector_store %arg19[%c1, %c0_6, %c0_7], %4 {strides = array<i32>} : memref<10x10x128xf32, #tpu.memory_space<vmem>>, vector<8x1x128xf32>,
    %cst_8 = arith.constant 0.000000e+00 : f32
    %6 = vector.broadcast %cst_8 : f32 to vector<8x1x128xf32>
    %c1_9 = arith.constant 1 : index
    %c9_10 = arith.constant 9 : index
    %c0_11 = arith.constant 0 : index
    %7 = vector.load %arg19[%c1_9, %c9_10, %c0_11] : memref<10x10x128xf32, #tpu.memory_space<vmem>>, vector<8x1x128xf32>
    tpu.vector_store %arg19[%c1_9, %c9_10, %c0_11], %6 {strides = array<i32>} : memref<10x10x128xf32, #tpu.memory_space<vmem>>, vector<8x1x128xf32>,
    %c0_12 = arith.constant 0 : index
    %c0_13 = arith.constant 0 : index
    %c0_14 = arith.constant 0 : index
    %8 = vector.load %arg1[%c0_12, %c0_13, %c0_14] : memref<1x64x144xbf16, #tpu.memory_space<vmem>>, vector<1x64x144xbf16>
    %9 = vector.shape_cast %8 : vector<1x64x144xbf16> to vector<64x144xbf16>
    %c0_15 = arith.constant 0 : index
    %c0_16 = arith.constant 0 : index
    %10 = vector.load %arg2[%c0_15, %c0_16] : memref<144x128xbf16, #tpu.memory_space<vmem>>, vector<144x128xbf16>
    %cst_17 = arith.constant dense<0.000000e+00> : vector<64x128xf32>
    %11 = tpu.matmul %9, %10, %cst_17 {dimension_numbers = #tpu.dot_dimension_numbers<[1], [0], [0], [1], [0, 0, 1, 1], [], []>} : vector<64x144xbf16>, vector<144x128xbf16>, vector<64x128xf32> -> vector<64x128xf32>
    %c0_18 = arith.constant 0 : index
    %c0_19 = arith.constant 0 : index
    %12 = vector.load %arg3[%c0_18, %c0_19] : memref<1x128xf32, #tpu.memory_space<vmem>>, vector<1x128xf32>
    %13 = vector.broadcast %12 : vector<1x128xf32> to vector<64x128xf32>
    %14 = arith.mulf %11, %13 : vector<64x128xf32>
    %c0_20 = arith.constant 0 : index
    %c0_21 = arith.constant 0 : index
    %15 = vector.load %arg4[%c0_20, %c0_21] : memref<1x128xf32, #tpu.memory_space<vmem>>, vector<1x128xf32>
    %16 = vector.broadcast %15 : vector<1x128xf32> to vector<64x128xf32>
    %17 = arith.addf %14, %16 : vector<64x128xf32>
    %cst_22 = arith.constant 0.000000e+00 : f32
    %18 = vector.broadcast %cst_22 : f32 to vector<64x128xf32>
    %19 = arith.maximumf %17, %18 : vector<64x128xf32>
    %20 = vector.shape_cast %19 : vector<64x128xf32> to vector<8x8x128xf32>
    %c1_23 = arith.constant 1 : index
    %c1_24 = arith.constant 1 : index
    %c0_25 = arith.constant 0 : index
    %21 = vector.load %arg19[%c1_23, %c1_24, %c0_25] : memref<10x10x128xf32, #tpu.memory_space<vmem>>, vector<8x8x128xf32>
    tpu.vector_store %arg19[%c1_23, %c1_24, %c0_25], %20 {strides = array<i32>} : memref<10x10x128xf32, #tpu.memory_space<vmem>>, vector<8x8x128xf32>,
    %c0_26 = arith.constant 0 : index
    %c0_27 = arith.constant 0 : index
    %c0_28 = arith.constant 0 : index
    %22 = vector.load %arg19[%c0_26, %c0_27, %c0_28] : memref<10x10x128xf32, #tpu.memory_space<vmem>>, vector<8x8x128xf32>
    %23 = vector.shape_cast %22 : vector<8x8x128xf32> to vector<64x128xf32>
    %24 = arith.truncf %23 : vector<64x128xf32> to vector<64x128xbf16>
    %c0_29 = arith.constant 0 : index
    %c1_30 = arith.constant 1 : index
    %c0_31 = arith.constant 0 : index
    %25 = vector.load %arg19[%c0_29, %c1_30, %c0_31] : memref<10x10x128xf32, #tpu.memory_space<vmem>>, vector<8x8x128xf32>
    %26 = vector.shape_cast %25 : vector<8x8x128xf32> to vector<64x128xf32>
    %27 = arith.truncf %26 : vector<64x128xf32> to vector<64x128xbf16>
    %c0_32 = arith.constant 0 : index
    %c2 = arith.constant 2 : index
    %c0_33 = arith.constant 0 : index
    %28 = vector.load %arg19[%c0_32, %c2, %c0_33] : memref<10x10x128xf32, #tpu.memory_space<vmem>>, vector<8x8x128xf32>
    %29 = vector.shape_cast %28 : vector<8x8x128xf32> to vector<64x128xf32>
    %30 = arith.truncf %29 : vector<64x128xf32> to vector<64x128xbf16>
    %c1_34 = arith.constant 1 : index
    %c0_35 = arith.constant 0 : index
    %c0_36 = arith.constant 0 : index
    %31 = vector.load %arg19[%c1_34, %c0_35, %c0_36] : memref<10x10x128xf32, #tpu.memory_space<vmem>>, vector<8x8x128xf32>
    %32 = vector.shape_cast %31 : vector<8x8x128xf32> to vector<64x128xf32>
    %33 = arith.truncf %32 : vector<64x128xf32> to vector<64x128xbf16>
    %c1_37 = arith.constant 1 : index
    %c1_38 = arith.constant 1 : index
    %c0_39 = arith.constant 0 : index
    %34 = vector.load %arg19[%c1_37, %c1_38, %c0_39] : memref<10x10x128xf32, #tpu.memory_space<vmem>>, vector<8x8x128xf32>
    %35 = vector.shape_cast %34 : vector<8x8x128xf32> to vector<64x128xf32>
    %36 = arith.truncf %35 : vector<64x128xf32> to vector<64x128xbf16>
    %c1_40 = arith.constant 1 : index
    %c2_41 = arith.constant 2 : index
    %c0_42 = arith.constant 0 : index
    %37 = vector.load %arg19[%c1_40, %c2_41, %c0_42] : memref<10x10x128xf32, #tpu.memory_space<vmem>>, vector<8x8x128xf32>
    %38 = vector.shape_cast %37 : vector<8x8x128xf32> to vector<64x128xf32>
    %39 = arith.truncf %38 : vector<64x128xf32> to vector<64x128xbf16>
    %c2_43 = arith.constant 2 : index
    %c0_44 = arith.constant 0 : index
    %c0_45 = arith.constant 0 : index
    %40 = vector.load %arg19[%c2_43, %c0_44, %c0_45] : memref<10x10x128xf32, #tpu.memory_space<vmem>>, vector<8x8x128xf32>
    %41 = vector.shape_cast %40 : vector<8x8x128xf32> to vector<64x128xf32>
    %42 = arith.truncf %41 : vector<64x128xf32> to vector<64x128xbf16>
    %c2_46 = arith.constant 2 : index
    %c1_47 = arith.constant 1 : index
    %c0_48 = arith.constant 0 : index
    %43 = vector.load %arg19[%c2_46, %c1_47, %c0_48] : memref<10x10x128xf32, #tpu.memory_space<vmem>>, vector<8x8x128xf32>
    %44 = vector.shape_cast %43 : vector<8x8x128xf32> to vector<64x128xf32>
    %45 = arith.truncf %44 : vector<64x128xf32> to vector<64x128xbf16>
    %c2_49 = arith.constant 2 : index
    %c2_50 = arith.constant 2 : index
    %c0_51 = arith.constant 0 : index
    %46 = vector.load %arg19[%c2_49, %c2_50, %c0_51] : memref<10x10x128xf32, #tpu.memory_space<vmem>>, vector<8x8x128xf32>
    %47 = vector.shape_cast %46 : vector<8x8x128xf32> to vector<64x128xf32>
    %48 = arith.truncf %47 : vector<64x128xf32> to vector<64x128xbf16>
    %49 = tpu.concatenate %24, %27, %30, %33, %36, %39, %42, %45, %48 in 1 : vector<64x128xbf16>, vector<64x128xbf16>, vector<64x128xbf16>, vector<64x128xbf16>, vector<64x128xbf16>, vector<64x128xbf16>, vector<64x128xbf16>, vector<64x128xbf16>, vector<64x128xbf16> -> vector<64x1152xbf16>
    %c0_52 = arith.constant 0 : index
    %c0_53 = arith.constant 0 : index
    %50 = vector.load %arg5[%c0_52, %c0_53] : memref<1152x128xbf16, #tpu.memory_space<vmem>>, vector<1152x128xbf16>
    %cst_54 = arith.constant dense<0.000000e+00> : vector<64x128xf32>
    %51 = tpu.matmul %49, %50, %cst_54 {dimension_numbers = #tpu.dot_dimension_numbers<[1], [0], [0], [1], [0, 0, 1, 1], [], []>} : vector<64x1152xbf16>, vector<1152x128xbf16>, vector<64x128xf32> -> vector<64x128xf32>
    %c0_55 = arith.constant 0 : index
    %c0_56 = arith.constant 0 : index
    %52 = vector.load %arg6[%c0_55, %c0_56] : memref<1x128xf32, #tpu.memory_space<vmem>>, vector<1x128xf32>
    %53 = vector.broadcast %52 : vector<1x128xf32> to vector<64x128xf32>
    %54 = arith.mulf %51, %53 : vector<64x128xf32>
    %c0_57 = arith.constant 0 : index
    %c0_58 = arith.constant 0 : index
    %55 = vector.load %arg7[%c0_57, %c0_58] : memref<1x128xf32, #tpu.memory_space<vmem>>, vector<1x128xf32>
    %56 = vector.broadcast %55 : vector<1x128xf32> to vector<64x128xf32>
    %57 = arith.addf %54, %56 : vector<64x128xf32>
    %cst_59 = arith.constant 0.000000e+00 : f32
    %58 = vector.broadcast %cst_59 : f32 to vector<64x128xf32>
    %59 = arith.maximumf %57, %58 : vector<64x128xf32>
    %60 = vector.shape_cast %59 : vector<64x128xf32> to vector<8x8x128xf32>
    %c1_60 = arith.constant 1 : index
    %c1_61 = arith.constant 1 : index
    %c0_62 = arith.constant 0 : index
    %61 = vector.load %arg19[%c1_60, %c1_61, %c0_62] : memref<10x10x128xf32, #tpu.memory_space<vmem>>, vector<8x8x128xf32>
    tpu.vector_store %arg19[%c1_60, %c1_61, %c0_62], %60 {strides = array<i32>} : memref<10x10x128xf32, #tpu.memory_space<vmem>>, vector<8x8x128xf32>,
    %c0_63 = arith.constant 0 : index
    %c0_64 = arith.constant 0 : index
    %c0_65 = arith.constant 0 : index
    %62 = vector.load %arg19[%c0_63, %c0_64, %c0_65] : memref<10x10x128xf32, #tpu.memory_space<vmem>>, vector<8x8x128xf32>
    %63 = vector.shape_cast %62 : vector<8x8x128xf32> to vector<64x128xf32>
    %64 = arith.truncf %63 : vector<64x128xf32> to vector<64x128xbf16>
    %c0_66 = arith.constant 0 : index
    %c1_67 = arith.constant 1 : index
    %c0_68 = arith.constant 0 : index
    %65 = vector.load %arg19[%c0_66, %c1_67, %c0_68] : memref<10x10x128xf32, #tpu.memory_space<vmem>>, vector<8x8x128xf32>
    %66 = vector.shape_cast %65 : vector<8x8x128xf32> to vector<64x128xf32>
    %67 = arith.truncf %66 : vector<64x128xf32> to vector<64x128xbf16>
    %c0_69 = arith.constant 0 : index
    %c2_70 = arith.constant 2 : index
    %c0_71 = arith.constant 0 : index
    %68 = vector.load %arg19[%c0_69, %c2_70, %c0_71] : memref<10x10x128xf32, #tpu.memory_space<vmem>>, vector<8x8x128xf32>
    %69 = vector.shape_cast %68 : vector<8x8x128xf32> to vector<64x128xf32>
    %70 = arith.truncf %69 : vector<64x128xf32> to vector<64x128xbf16>
    %c1_72 = arith.constant 1 : index
    %c0_73 = arith.constant 0 : index
    %c0_74 = arith.constant 0 : index
    %71 = vector.load %arg19[%c1_72, %c0_73, %c0_74] : memref<10x10x128xf32, #tpu.memory_space<vmem>>, vector<8x8x128xf32>
    %72 = vector.shape_cast %71 : vector<8x8x128xf32> to vector<64x128xf32>
    %73 = arith.truncf %72 : vector<64x128xf32> to vector<64x128xbf16>
    %c1_75 = arith.constant 1 : index
    %c1_76 = arith.constant 1 : index
    %c0_77 = arith.constant 0 : index
    %74 = vector.load %arg19[%c1_75, %c1_76, %c0_77] : memref<10x10x128xf32, #tpu.memory_space<vmem>>, vector<8x8x128xf32>
    %75 = vector.shape_cast %74 : vector<8x8x128xf32> to vector<64x128xf32>
    %76 = arith.truncf %75 : vector<64x128xf32> to vector<64x128xbf16>
    %c1_78 = arith.constant 1 : index
    %c2_79 = arith.constant 2 : index
    %c0_80 = arith.constant 0 : index
    %77 = vector.load %arg19[%c1_78, %c2_79, %c0_80] : memref<10x10x128xf32, #tpu.memory_space<vmem>>, vector<8x8x128xf32>
    %78 = vector.shape_cast %77 : vector<8x8x128xf32> to vector<64x128xf32>
    %79 = arith.truncf %78 : vector<64x128xf32> to vector<64x128xbf16>
    %c2_81 = arith.constant 2 : index
    %c0_82 = arith.constant 0 : index
    %c0_83 = arith.constant 0 : index
    %80 = vector.load %arg19[%c2_81, %c0_82, %c0_83] : memref<10x10x128xf32, #tpu.memory_space<vmem>>, vector<8x8x128xf32>
    %81 = vector.shape_cast %80 : vector<8x8x128xf32> to vector<64x128xf32>
    %82 = arith.truncf %81 : vector<64x128xf32> to vector<64x128xbf16>
    %c2_84 = arith.constant 2 : index
    %c1_85 = arith.constant 1 : index
    %c0_86 = arith.constant 0 : index
    %83 = vector.load %arg19[%c2_84, %c1_85, %c0_86] : memref<10x10x128xf32, #tpu.memory_space<vmem>>, vector<8x8x128xf32>
    %84 = vector.shape_cast %83 : vector<8x8x128xf32> to vector<64x128xf32>
    %85 = arith.truncf %84 : vector<64x128xf32> to vector<64x128xbf16>
    %c2_87 = arith.constant 2 : index
    %c2_88 = arith.constant 2 : index
    %c0_89 = arith.constant 0 : index
    %86 = vector.load %arg19[%c2_87, %c2_88, %c0_89] : memref<10x10x128xf32, #tpu.memory_space<vmem>>, vector<8x8x128xf32>
    %87 = vector.shape_cast %86 : vector<8x8x128xf32> to vector<64x128xf32>
    %88 = arith.truncf %87 : vector<64x128xf32> to vector<64x128xbf16>
    %89 = tpu.concatenate %64, %67, %70, %73, %76, %79, %82, %85, %88 in 1 : vector<64x128xbf16>, vector<64x128xbf16>, vector<64x128xbf16>, vector<64x128xbf16>, vector<64x128xbf16>, vector<64x128xbf16>, vector<64x128xbf16>, vector<64x128xbf16>, vector<64x128xbf16> -> vector<64x1152xbf16>
    %c0_90 = arith.constant 0 : index
    %c0_91 = arith.constant 0 : index
    %90 = vector.load %arg8[%c0_90, %c0_91] : memref<1152x128xbf16, #tpu.memory_space<vmem>>, vector<1152x128xbf16>
    %cst_92 = arith.constant dense<0.000000e+00> : vector<64x128xf32>
    %91 = tpu.matmul %89, %90, %cst_92 {dimension_numbers = #tpu.dot_dimension_numbers<[1], [0], [0], [1], [0, 0, 1, 1], [], []>} : vector<64x1152xbf16>, vector<1152x128xbf16>, vector<64x128xf32> -> vector<64x128xf32>
    %c0_93 = arith.constant 0 : index
    %c0_94 = arith.constant 0 : index
    %92 = vector.load %arg9[%c0_93, %c0_94] : memref<1x128xf32, #tpu.memory_space<vmem>>, vector<1x128xf32>
    %93 = vector.broadcast %92 : vector<1x128xf32> to vector<64x128xf32>
    %94 = arith.mulf %91, %93 : vector<64x128xf32>
    %c0_95 = arith.constant 0 : index
    %c0_96 = arith.constant 0 : index
    %95 = vector.load %arg10[%c0_95, %c0_96] : memref<1x128xf32, #tpu.memory_space<vmem>>, vector<1x128xf32>
    %96 = vector.broadcast %95 : vector<1x128xf32> to vector<64x128xf32>
    %97 = arith.addf %94, %96 : vector<64x128xf32>
    %cst_97 = arith.constant 0.000000e+00 : f32
    %98 = vector.broadcast %cst_97 : f32 to vector<64x128xf32>
    %99 = arith.maximumf %97, %98 : vector<64x128xf32>
    %100 = vector.shape_cast %99 : vector<64x128xf32> to vector<8x8x128xf32>
    %c1_98 = arith.constant 1 : index
    %c1_99 = arith.constant 1 : index
    %c0_100 = arith.constant 0 : index
    %101 = vector.load %arg19[%c1_98, %c1_99, %c0_100] : memref<10x10x128xf32, #tpu.memory_space<vmem>>, vector<8x8x128xf32>
    tpu.vector_store %arg19[%c1_98, %c1_99, %c0_100], %100 {strides = array<i32>} : memref<10x10x128xf32, #tpu.memory_space<vmem>>, vector<8x8x128xf32>,
    %c0_101 = arith.constant 0 : index
    %c0_102 = arith.constant 0 : index
    %c0_103 = arith.constant 0 : index
    %102 = vector.load %arg19[%c0_101, %c0_102, %c0_103] : memref<10x10x128xf32, #tpu.memory_space<vmem>>, vector<8x8x128xf32>
    %103 = vector.shape_cast %102 : vector<8x8x128xf32> to vector<64x128xf32>
    %104 = arith.truncf %103 : vector<64x128xf32> to vector<64x128xbf16>
    %c0_104 = arith.constant 0 : index
    %c1_105 = arith.constant 1 : index
    %c0_106 = arith.constant 0 : index
    %105 = vector.load %arg19[%c0_104, %c1_105, %c0_106] : memref<10x10x128xf32, #tpu.memory_space<vmem>>, vector<8x8x128xf32>
    %106 = vector.shape_cast %105 : vector<8x8x128xf32> to vector<64x128xf32>
    %107 = arith.truncf %106 : vector<64x128xf32> to vector<64x128xbf16>
    %c0_107 = arith.constant 0 : index
    %c2_108 = arith.constant 2 : index
    %c0_109 = arith.constant 0 : index
    %108 = vector.load %arg19[%c0_107, %c2_108, %c0_109] : memref<10x10x128xf32, #tpu.memory_space<vmem>>, vector<8x8x128xf32>
    %109 = vector.shape_cast %108 : vector<8x8x128xf32> to vector<64x128xf32>
    %110 = arith.truncf %109 : vector<64x128xf32> to vector<64x128xbf16>
    %c1_110 = arith.constant 1 : index
    %c0_111 = arith.constant 0 : index
    %c0_112 = arith.constant 0 : index
    %111 = vector.load %arg19[%c1_110, %c0_111, %c0_112] : memref<10x10x128xf32, #tpu.memory_space<vmem>>, vector<8x8x128xf32>
    %112 = vector.shape_cast %111 : vector<8x8x128xf32> to vector<64x128xf32>
    %113 = arith.truncf %112 : vector<64x128xf32> to vector<64x128xbf16>
    %c1_113 = arith.constant 1 : index
    %c1_114 = arith.constant 1 : index
    %c0_115 = arith.constant 0 : index
    %114 = vector.load %arg19[%c1_113, %c1_114, %c0_115] : memref<10x10x128xf32, #tpu.memory_space<vmem>>, vector<8x8x128xf32>
    %115 = vector.shape_cast %114 : vector<8x8x128xf32> to vector<64x128xf32>
    %116 = arith.truncf %115 : vector<64x128xf32> to vector<64x128xbf16>
    %c1_116 = arith.constant 1 : index
    %c2_117 = arith.constant 2 : index
    %c0_118 = arith.constant 0 : index
    %117 = vector.load %arg19[%c1_116, %c2_117, %c0_118] : memref<10x10x128xf32, #tpu.memory_space<vmem>>, vector<8x8x128xf32>
    %118 = vector.shape_cast %117 : vector<8x8x128xf32> to vector<64x128xf32>
    %119 = arith.truncf %118 : vector<64x128xf32> to vector<64x128xbf16>
    %c2_119 = arith.constant 2 : index
    %c0_120 = arith.constant 0 : index
    %c0_121 = arith.constant 0 : index
    %120 = vector.load %arg19[%c2_119, %c0_120, %c0_121] : memref<10x10x128xf32, #tpu.memory_space<vmem>>, vector<8x8x128xf32>
    %121 = vector.shape_cast %120 : vector<8x8x128xf32> to vector<64x128xf32>
    %122 = arith.truncf %121 : vector<64x128xf32> to vector<64x128xbf16>
    %c2_122 = arith.constant 2 : index
    %c1_123 = arith.constant 1 : index
    %c0_124 = arith.constant 0 : index
    %123 = vector.load %arg19[%c2_122, %c1_123, %c0_124] : memref<10x10x128xf32, #tpu.memory_space<vmem>>, vector<8x8x128xf32>
    %124 = vector.shape_cast %123 : vector<8x8x128xf32> to vector<64x128xf32>
    %125 = arith.truncf %124 : vector<64x128xf32> to vector<64x128xbf16>
    %c2_125 = arith.constant 2 : index
    %c2_126 = arith.constant 2 : index
    %c0_127 = arith.constant 0 : index
    %126 = vector.load %arg19[%c2_125, %c2_126, %c0_127] : memref<10x10x128xf32, #tpu.memory_space<vmem>>, vector<8x8x128xf32>
    %127 = vector.shape_cast %126 : vector<8x8x128xf32> to vector<64x128xf32>
    %128 = arith.truncf %127 : vector<64x128xf32> to vector<64x128xbf16>
    %129 = tpu.concatenate %104, %107, %110, %113, %116, %119, %122, %125, %128 in 1 : vector<64x128xbf16>, vector<64x128xbf16>, vector<64x128xbf16>, vector<64x128xbf16>, vector<64x128xbf16>, vector<64x128xbf16>, vector<64x128xbf16>, vector<64x128xbf16>, vector<64x128xbf16> -> vector<64x1152xbf16>
    %c0_128 = arith.constant 0 : index
    %c0_129 = arith.constant 0 : index
    %130 = vector.load %arg11[%c0_128, %c0_129] : memref<1152x128xbf16, #tpu.memory_space<vmem>>, vector<1152x128xbf16>
    %cst_130 = arith.constant dense<0.000000e+00> : vector<64x128xf32>
    %131 = tpu.matmul %129, %130, %cst_130 {dimension_numbers = #tpu.dot_dimension_numbers<[1], [0], [0], [1], [0, 0, 1, 1], [], []>} : vector<64x1152xbf16>, vector<1152x128xbf16>, vector<64x128xf32> -> vector<64x128xf32>
    %c0_131 = arith.constant 0 : index
    %c0_132 = arith.constant 0 : index
    %132 = vector.load %arg12[%c0_131, %c0_132] : memref<1x128xf32, #tpu.memory_space<vmem>>, vector<1x128xf32>
    %133 = vector.broadcast %132 : vector<1x128xf32> to vector<64x128xf32>
    %134 = arith.mulf %131, %133 : vector<64x128xf32>
    %c0_133 = arith.constant 0 : index
    %c0_134 = arith.constant 0 : index
    %135 = vector.load %arg13[%c0_133, %c0_134] : memref<1x128xf32, #tpu.memory_space<vmem>>, vector<1x128xf32>
    %136 = vector.broadcast %135 : vector<1x128xf32> to vector<64x128xf32>
    %137 = arith.addf %134, %136 : vector<64x128xf32>
    %cst_135 = arith.constant 0.000000e+00 : f32
    %138 = vector.broadcast %cst_135 : f32 to vector<64x128xf32>
    %139 = arith.maximumf %137, %138 : vector<64x128xf32>
    %cst_136 = arith.constant 0.000000e+00 : f32
    %140 = vector.broadcast %cst_136 : f32 to vector<64x128xf32>
    %141 = tpu.concatenate %139, %140 in 0 : vector<64x128xf32>, vector<64x128xf32> -> vector<128x128xf32>
    %142 = tpu.transpose %141, [1, 0] : vector<128x128xf32> -> vector<128x128xf32>
    %cst_137 = arith.constant 0.000000e+00 : f32
    %143 = vector.broadcast %cst_137 : f32 to vector<16x32xf32>
    %144 = vector.extract_strided_slice %142 {offsets = [0, 0], sizes = [16, 128], strides = [1, 1]} : vector<128x128xf32> to vector<16x128xf32>
    %c0_138 = arith.constant 0 : index
    %c0_139 = arith.constant 0 : index
    %c0_140 = arith.constant 0 : index
    %145 = vector.load %arg14[%c0_138, %c0_139, %c0_140] : memref<8x128x32xf32, #tpu.memory_space<vmem>>, vector<1x128x32xf32>
    %146 = vector.shape_cast %145 : vector<1x128x32xf32> to vector<128x32xf32>
    %cst_141 = arith.constant dense<0.000000e+00> : vector<16x32xf32>
    %147 = tpu.matmul %144, %146, %cst_141 {dimension_numbers = #tpu.dot_dimension_numbers<[1], [0], [0], [1], [0, 0, 1, 1], [], []>} : vector<16x128xf32>, vector<128x32xf32>, vector<16x32xf32> -> vector<16x32xf32>
    %148 = arith.addf %143, %147 : vector<16x32xf32>
    %149 = vector.extract_strided_slice %142 {offsets = [16, 0], sizes = [16, 128], strides = [1, 1]} : vector<128x128xf32> to vector<16x128xf32>
    %c1_142 = arith.constant 1 : index
    %c0_143 = arith.constant 0 : index
    %c0_144 = arith.constant 0 : index
    %150 = vector.load %arg14[%c1_142, %c0_143, %c0_144] : memref<8x128x32xf32, #tpu.memory_space<vmem>>, vector<1x128x32xf32>
    %151 = vector.shape_cast %150 : vector<1x128x32xf32> to vector<128x32xf32>
    %cst_145 = arith.constant dense<0.000000e+00> : vector<16x32xf32>
    %152 = tpu.matmul %149, %151, %cst_145 {dimension_numbers = #tpu.dot_dimension_numbers<[1], [0], [0], [1], [0, 0, 1, 1], [], []>} : vector<16x128xf32>, vector<128x32xf32>, vector<16x32xf32> -> vector<16x32xf32>
    %153 = arith.addf %148, %152 : vector<16x32xf32>
    %154 = vector.extract_strided_slice %142 {offsets = [32, 0], sizes = [16, 128], strides = [1, 1]} : vector<128x128xf32> to vector<16x128xf32>
    %c2_146 = arith.constant 2 : index
    %c0_147 = arith.constant 0 : index
    %c0_148 = arith.constant 0 : index
    %155 = vector.load %arg14[%c2_146, %c0_147, %c0_148] : memref<8x128x32xf32, #tpu.memory_space<vmem>>, vector<1x128x32xf32>
    %156 = vector.shape_cast %155 : vector<1x128x32xf32> to vector<128x32xf32>
    %cst_149 = arith.constant dense<0.000000e+00> : vector<16x32xf32>
    %157 = tpu.matmul %154, %156, %cst_149 {dimension_numbers = #tpu.dot_dimension_numbers<[1], [0], [0], [1], [0, 0, 1, 1], [], []>} : vector<16x128xf32>, vector<128x32xf32>, vector<16x32xf32> -> vector<16x32xf32>
    %158 = arith.addf %153, %157 : vector<16x32xf32>
    %159 = vector.extract_strided_slice %142 {offsets = [48, 0], sizes = [16, 128], strides = [1, 1]} : vector<128x128xf32> to vector<16x128xf32>
    %c3 = arith.constant 3 : index
    %c0_150 = arith.constant 0 : index
    %c0_151 = arith.constant 0 : index
    %160 = vector.load %arg14[%c3, %c0_150, %c0_151] : memref<8x128x32xf32, #tpu.memory_space<vmem>>, vector<1x128x32xf32>
    %161 = vector.shape_cast %160 : vector<1x128x32xf32> to vector<128x32xf32>
    %cst_152 = arith.constant dense<0.000000e+00> : vector<16x32xf32>
    %162 = tpu.matmul %159, %161, %cst_152 {dimension_numbers = #tpu.dot_dimension_numbers<[1], [0], [0], [1], [0, 0, 1, 1], [], []>} : vector<16x128xf32>, vector<128x32xf32>, vector<16x32xf32> -> vector<16x32xf32>
    %163 = arith.addf %158, %162 : vector<16x32xf32>
    %164 = vector.extract_strided_slice %142 {offsets = [64, 0], sizes = [16, 128], strides = [1, 1]} : vector<128x128xf32> to vector<16x128xf32>
    %c4 = arith.constant 4 : index
    %c0_153 = arith.constant 0 : index
    %c0_154 = arith.constant 0 : index
    %165 = vector.load %arg14[%c4, %c0_153, %c0_154] : memref<8x128x32xf32, #tpu.memory_space<vmem>>, vector<1x128x32xf32>
    %166 = vector.shape_cast %165 : vector<1x128x32xf32> to vector<128x32xf32>
    %cst_155 = arith.constant dense<0.000000e+00> : vector<16x32xf32>
    %167 = tpu.matmul %164, %166, %cst_155 {dimension_numbers = #tpu.dot_dimension_numbers<[1], [0], [0], [1], [0, 0, 1, 1], [], []>} : vector<16x128xf32>, vector<128x32xf32>, vector<16x32xf32> -> vector<16x32xf32>
    %168 = arith.addf %163, %167 : vector<16x32xf32>
    %169 = vector.extract_strided_slice %142 {offsets = [80, 0], sizes = [16, 128], strides = [1, 1]} : vector<128x128xf32> to vector<16x128xf32>
    %c5 = arith.constant 5 : index
    %c0_156 = arith.constant 0 : index
    %c0_157 = arith.constant 0 : index
    %170 = vector.load %arg14[%c5, %c0_156, %c0_157] : memref<8x128x32xf32, #tpu.memory_space<vmem>>, vector<1x128x32xf32>
    %171 = vector.shape_cast %170 : vector<1x128x32xf32> to vector<128x32xf32>
    %cst_158 = arith.constant dense<0.000000e+00> : vector<16x32xf32>
    %172 = tpu.matmul %169, %171, %cst_158 {dimension_numbers = #tpu.dot_dimension_numbers<[1], [0], [0], [1], [0, 0, 1, 1], [], []>} : vector<16x128xf32>, vector<128x32xf32>, vector<16x32xf32> -> vector<16x32xf32>
    %173 = arith.addf %168, %172 : vector<16x32xf32>
    %174 = vector.extract_strided_slice %142 {offsets = [96, 0], sizes = [16, 128], strides = [1, 1]} : vector<128x128xf32> to vector<16x128xf32>
    %c6 = arith.constant 6 : index
    %c0_159 = arith.constant 0 : index
    %c0_160 = arith.constant 0 : index
    %175 = vector.load %arg14[%c6, %c0_159, %c0_160] : memref<8x128x32xf32, #tpu.memory_space<vmem>>, vector<1x128x32xf32>
    %176 = vector.shape_cast %175 : vector<1x128x32xf32> to vector<128x32xf32>
    %cst_161 = arith.constant dense<0.000000e+00> : vector<16x32xf32>
    %177 = tpu.matmul %174, %176, %cst_161 {dimension_numbers = #tpu.dot_dimension_numbers<[1], [0], [0], [1], [0, 0, 1, 1], [], []>} : vector<16x128xf32>, vector<128x32xf32>, vector<16x32xf32> -> vector<16x32xf32>
    %178 = arith.addf %173, %177 : vector<16x32xf32>
    %179 = vector.extract_strided_slice %142 {offsets = [112, 0], sizes = [16, 128], strides = [1, 1]} : vector<128x128xf32> to vector<16x128xf32>
    %c7 = arith.constant 7 : index
    %c0_162 = arith.constant 0 : index
    %c0_163 = arith.constant 0 : index
    %180 = vector.load %arg14[%c7, %c0_162, %c0_163] : memref<8x128x32xf32, #tpu.memory_space<vmem>>, vector<1x128x32xf32>
    %181 = vector.shape_cast %180 : vector<1x128x32xf32> to vector<128x32xf32>
    %cst_164 = arith.constant dense<0.000000e+00> : vector<16x32xf32>
    %182 = tpu.matmul %179, %181, %cst_164 {dimension_numbers = #tpu.dot_dimension_numbers<[1], [0], [0], [1], [0, 0, 1, 1], [], []>} : vector<16x128xf32>, vector<128x32xf32>, vector<16x32xf32> -> vector<16x32xf32>
    %183 = arith.addf %178, %182 : vector<16x32xf32>
    %c0_165 = arith.constant 0 : index
    %c0_166 = arith.constant 0 : index
    %c0_167 = arith.constant 0 : index
    %184 = vector.load %arg15[%c0_165, %c0_166, %c0_167] : memref<1x16x32xf32, #tpu.memory_space<vmem>>, vector<1x16x32xf32>
    %185 = vector.shape_cast %184 : vector<1x16x32xf32> to vector<16x32xf32>
    %186 = arith.addf %183, %185 : vector<16x32xf32>
    %cst_168 = arith.constant 0.000000e+00 : f32
    %187 = vector.broadcast %cst_168 : f32 to vector<16x32xf32>
    %188 = arith.maximumf %186, %187 : vector<16x32xf32>
    %c0_169 = arith.constant 0 : index
    %c0_170 = arith.constant 0 : index
    %189 = vector.load %arg16[%c0_169, %c0_170] : memref<32x128xf32, #tpu.memory_space<vmem>>, vector<32x128xf32>
    %cst_171 = arith.constant dense<0.000000e+00> : vector<16x128xf32>
    %190 = tpu.matmul %188, %189, %cst_171 {dimension_numbers = #tpu.dot_dimension_numbers<[1], [0], [0], [1], [0, 0, 1, 1], [], []>} : vector<16x32xf32>, vector<32x128xf32>, vector<16x128xf32> -> vector<16x128xf32>
    %c0_172 = arith.constant 0 : index
    %c0_173 = arith.constant 0 : index
    %191 = vector.load %arg17[%c0_172, %c0_173] : memref<1x128xf32, #tpu.memory_space<vmem>>, vector<1x128xf32>
    %192 = vector.broadcast %191 : vector<1x128xf32> to vector<16x128xf32>
    %193 = arith.addf %190, %192 : vector<16x128xf32>
    %c0_174 = arith.constant 0 : index
    %c0_175 = arith.constant 0 : index
    %c0_176 = arith.constant 0 : index
    %194 = vector.load %arg18[%c0_174, %c0_175, %c0_176] : memref<1x16x128xf32, #tpu.memory_space<vmem>>, vector<1x16x128xf32>
    %195 = vector.shape_cast %194 : vector<1x16x128xf32> to vector<16x128xf32>
    %196 = vector.shape_cast %193 : vector<16x128xf32> to vector<1x16x128xf32>
    tpu.vector_store %arg18[%c0_174, %c0_175, %c0_176], %196 {strides = array<i32>} : memref<1x16x128xf32, #tpu.memory_space<vmem>>, vector<1x16x128xf32>,
    return
  }
  func.func @transform_0(%arg0: i32) -> (i32, i32, i32) {
    %c0_i32 = arith.constant 0 : i32
    %c0_i32_0 = arith.constant 0 : i32
    %c0_i32_1 = arith.constant 0 : i32
    return %arg0, %c0_i32, %c0_i32_0 : i32, i32, i32
  }
  func.func @transform_1(%arg0: i32) -> (i32, i32) {
    %c0_i32 = arith.constant 0 : i32
    %c0_i32_0 = arith.constant 0 : i32
    %c0_i32_1 = arith.constant 0 : i32
    return %c0_i32, %c0_i32_0 : i32, i32
  }
  func.func @transform_2(%arg0: i32) -> (i32, i32) {
    %c0_i32 = arith.constant 0 : i32
    %c0_i32_0 = arith.constant 0 : i32
    %c0_i32_1 = arith.constant 0 : i32
    return %c0_i32, %c0_i32_0 : i32, i32
  }
  func.func @transform_3(%arg0: i32) -> (i32, i32) {
    %c0_i32 = arith.constant 0 : i32
    %c0_i32_0 = arith.constant 0 : i32
    %c0_i32_1 = arith.constant 0 : i32
    return %c0_i32, %c0_i32_0 : i32, i32
  }
  func.func @transform_4(%arg0: i32) -> (i32, i32) {
    %c0_i32 = arith.constant 0 : i32
    %c0_i32_0 = arith.constant 0 : i32
    %c0_i32_1 = arith.constant 0 : i32
    return %c0_i32, %c0_i32_0 : i32, i32
  }
  func.func @transform_5(%arg0: i32) -> (i32, i32) {
    %c0_i32 = arith.constant 0 : i32
    %c0_i32_0 = arith.constant 0 : i32
    %c0_i32_1 = arith.constant 0 : i32
    return %c0_i32, %c0_i32_0 : i32, i32
  }
  func.func @transform_6(%arg0: i32) -> (i32, i32) {
    %c0_i32 = arith.constant 0 : i32
    %c0_i32_0 = arith.constant 0 : i32
    %c0_i32_1 = arith.constant 0 : i32
    return %c0_i32, %c0_i32_0 : i32, i32
  }
  func.func @transform_7(%arg0: i32) -> (i32, i32) {
    %c0_i32 = arith.constant 0 : i32
    %c0_i32_0 = arith.constant 0 : i32
    %c0_i32_1 = arith.constant 0 : i32
    return %c0_i32, %c0_i32_0 : i32, i32
  }
  func.func @transform_8(%arg0: i32) -> (i32, i32) {
    %c0_i32 = arith.constant 0 : i32
    %c0_i32_0 = arith.constant 0 : i32
    %c0_i32_1 = arith.constant 0 : i32
    return %c0_i32, %c0_i32_0 : i32, i32
  }
  func.func @transform_9(%arg0: i32) -> (i32, i32) {
    %c0_i32 = arith.constant 0 : i32
    %c0_i32_0 = arith.constant 0 : i32
    %c0_i32_1 = arith.constant 0 : i32
    return %c0_i32, %c0_i32_0 : i32, i32
  }
  func.func @transform_10(%arg0: i32) -> (i32, i32) {
    %c0_i32 = arith.constant 0 : i32
    %c0_i32_0 = arith.constant 0 : i32
    %c0_i32_1 = arith.constant 0 : i32
    return %c0_i32, %c0_i32_0 : i32, i32
  }
  func.func @transform_11(%arg0: i32) -> (i32, i32) {
    %c0_i32 = arith.constant 0 : i32
    %c0_i32_0 = arith.constant 0 : i32
    %c0_i32_1 = arith.constant 0 : i32
    return %c0_i32, %c0_i32_0 : i32, i32
  }
  func.func @transform_12(%arg0: i32) -> (i32, i32) {
    %c0_i32 = arith.constant 0 : i32
    %c0_i32_0 = arith.constant 0 : i32
    %c0_i32_1 = arith.constant 0 : i32
    return %c0_i32, %c0_i32_0 : i32, i32
  }
  func.func @transform_13(%arg0: i32) -> (i32, i32, i32) {
    %c0_i32 = arith.constant 0 : i32
    %c0_i32_0 = arith.constant 0 : i32
    %c0_i32_1 = arith.constant 0 : i32
    %c0_i32_2 = arith.constant 0 : i32
    return %c0_i32, %c0_i32_0, %c0_i32_1 : i32, i32, i32
  }
  func.func @transform_14(%arg0: i32) -> (i32, i32, i32) {
    %c0_i32 = arith.constant 0 : i32
    %c0_i32_0 = arith.constant 0 : i32
    %c0_i32_1 = arith.constant 0 : i32
    return %arg0, %c0_i32, %c0_i32_0 : i32, i32, i32
  }
  func.func @transform_15(%arg0: i32) -> (i32, i32) {
    %c0_i32 = arith.constant 0 : i32
    %c0_i32_0 = arith.constant 0 : i32
    %c0_i32_1 = arith.constant 0 : i32
    return %c0_i32, %c0_i32_0 : i32, i32
  }
  func.func @transform_16(%arg0: i32) -> (i32, i32) {
    %c0_i32 = arith.constant 0 : i32
    %c0_i32_0 = arith.constant 0 : i32
    %c0_i32_1 = arith.constant 0 : i32
    return %c0_i32, %c0_i32_0 : i32, i32
  }
  func.func @transform_17(%arg0: i32) -> (i32, i32, i32) {
    %c0_i32 = arith.constant 0 : i32
    %c0_i32_0 = arith.constant 0 : i32
    %c0_i32_1 = arith.constant 0 : i32
    return %arg0, %c0_i32, %c0_i32_0 : i32, i32, i32
  }
}

module attributes {stable_mosaic.version = 11 : i64} {
  func.func @_lstm_kernel(%arg0: i32, %arg1: memref<32x128xf32, #tpu.memory_space<vmem>>, %arg2: memref<9x8x32xf32, #tpu.memory_space<vmem>>, %arg3: memref<32x128xbf16, #tpu.memory_space<vmem>>, %arg4: memref<8x32xf32, #tpu.memory_space<vmem>>) attributes {dimension_semantics = [#tpu.dimension_semantics<arbitrary>], iteration_bounds = array<i64: 1>, scalar_prefetch = 0 : i64, scratch_operands = 0 : i64, tpu.core_type = #tpu.core_type<tc>, window_params = [{pipeline_mode = #tpu.pipeline_mode<synchronous>, transform_indices = @transform_0, window_bounds = array<i64: 32, 128>}, {pipeline_mode = #tpu.pipeline_mode<synchronous>, transform_indices = @transform_1, window_bounds = array<i64: 9, 8, 32>}, {pipeline_mode = #tpu.pipeline_mode<synchronous>, transform_indices = @transform_2, window_bounds = array<i64: 32, 128>}, {pipeline_mode = #tpu.pipeline_mode<synchronous>, transform_indices = @transform_3, window_bounds = array<i64: 8, 32>}]} {
    %c0 = arith.constant 0 : index
    %c0_0 = arith.constant 0 : index
    %0 = vector.load %arg1[%c0, %c0_0] : memref<32x128xf32, #tpu.memory_space<vmem>>, vector<32x128xf32>
    %c0_1 = arith.constant 0 : index
    %c0_2 = arith.constant 0 : index
    %1 = vector.load %arg3[%c0_1, %c0_2] : memref<32x128xbf16, #tpu.memory_space<vmem>>, vector<32x128xbf16>
    %c0_3 = arith.constant 0 : index
    %c0_4 = arith.constant 0 : index
    %c0_5 = arith.constant 0 : index
    %2 = vector.load %arg2[%c0_3, %c0_4, %c0_5] : memref<9x8x32xf32, #tpu.memory_space<vmem>>, vector<1x8x32xf32>
    %3 = vector.shape_cast %2 : vector<1x8x32xf32> to vector<8x32xf32>
    %cst = arith.constant dense<0.000000e+00> : vector<8x128xf32>
    %4 = tpu.matmul %3, %0, %cst {dimension_numbers = #tpu.dot_dimension_numbers<[1], [0], [0], [1], [0, 0, 1, 1], [], []>} : vector<8x32xf32>, vector<32x128xf32>, vector<8x128xf32> -> vector<8x128xf32>
    %c1 = arith.constant 1 : index
    %c0_6 = arith.constant 0 : index
    %c0_7 = arith.constant 0 : index
    %5 = vector.load %arg2[%c1, %c0_6, %c0_7] : memref<9x8x32xf32, #tpu.memory_space<vmem>>, vector<1x8x32xf32>
    %6 = vector.shape_cast %5 : vector<1x8x32xf32> to vector<8x32xf32>
    %cst_8 = arith.constant dense<0.000000e+00> : vector<8x128xf32>
    %7 = tpu.matmul %6, %0, %cst_8 {dimension_numbers = #tpu.dot_dimension_numbers<[1], [0], [0], [1], [0, 0, 1, 1], [], []>} : vector<8x32xf32>, vector<32x128xf32>, vector<8x128xf32> -> vector<8x128xf32>
    %c2 = arith.constant 2 : index
    %c0_9 = arith.constant 0 : index
    %c0_10 = arith.constant 0 : index
    %8 = vector.load %arg2[%c2, %c0_9, %c0_10] : memref<9x8x32xf32, #tpu.memory_space<vmem>>, vector<1x8x32xf32>
    %9 = vector.shape_cast %8 : vector<1x8x32xf32> to vector<8x32xf32>
    %cst_11 = arith.constant dense<0.000000e+00> : vector<8x128xf32>
    %10 = tpu.matmul %9, %0, %cst_11 {dimension_numbers = #tpu.dot_dimension_numbers<[1], [0], [0], [1], [0, 0, 1, 1], [], []>} : vector<8x32xf32>, vector<32x128xf32>, vector<8x128xf32> -> vector<8x128xf32>
    %c3 = arith.constant 3 : index
    %c0_12 = arith.constant 0 : index
    %c0_13 = arith.constant 0 : index
    %11 = vector.load %arg2[%c3, %c0_12, %c0_13] : memref<9x8x32xf32, #tpu.memory_space<vmem>>, vector<1x8x32xf32>
    %12 = vector.shape_cast %11 : vector<1x8x32xf32> to vector<8x32xf32>
    %cst_14 = arith.constant dense<0.000000e+00> : vector<8x128xf32>
    %13 = tpu.matmul %12, %0, %cst_14 {dimension_numbers = #tpu.dot_dimension_numbers<[1], [0], [0], [1], [0, 0, 1, 1], [], []>} : vector<8x32xf32>, vector<32x128xf32>, vector<8x128xf32> -> vector<8x128xf32>
    %c4 = arith.constant 4 : index
    %c0_15 = arith.constant 0 : index
    %c0_16 = arith.constant 0 : index
    %14 = vector.load %arg2[%c4, %c0_15, %c0_16] : memref<9x8x32xf32, #tpu.memory_space<vmem>>, vector<1x8x32xf32>
    %15 = vector.shape_cast %14 : vector<1x8x32xf32> to vector<8x32xf32>
    %cst_17 = arith.constant dense<0.000000e+00> : vector<8x128xf32>
    %16 = tpu.matmul %15, %0, %cst_17 {dimension_numbers = #tpu.dot_dimension_numbers<[1], [0], [0], [1], [0, 0, 1, 1], [], []>} : vector<8x32xf32>, vector<32x128xf32>, vector<8x128xf32> -> vector<8x128xf32>
    %c5 = arith.constant 5 : index
    %c0_18 = arith.constant 0 : index
    %c0_19 = arith.constant 0 : index
    %17 = vector.load %arg2[%c5, %c0_18, %c0_19] : memref<9x8x32xf32, #tpu.memory_space<vmem>>, vector<1x8x32xf32>
    %18 = vector.shape_cast %17 : vector<1x8x32xf32> to vector<8x32xf32>
    %cst_20 = arith.constant dense<0.000000e+00> : vector<8x128xf32>
    %19 = tpu.matmul %18, %0, %cst_20 {dimension_numbers = #tpu.dot_dimension_numbers<[1], [0], [0], [1], [0, 0, 1, 1], [], []>} : vector<8x32xf32>, vector<32x128xf32>, vector<8x128xf32> -> vector<8x128xf32>
    %c6 = arith.constant 6 : index
    %c0_21 = arith.constant 0 : index
    %c0_22 = arith.constant 0 : index
    %20 = vector.load %arg2[%c6, %c0_21, %c0_22] : memref<9x8x32xf32, #tpu.memory_space<vmem>>, vector<1x8x32xf32>
    %21 = vector.shape_cast %20 : vector<1x8x32xf32> to vector<8x32xf32>
    %cst_23 = arith.constant dense<0.000000e+00> : vector<8x128xf32>
    %22 = tpu.matmul %21, %0, %cst_23 {dimension_numbers = #tpu.dot_dimension_numbers<[1], [0], [0], [1], [0, 0, 1, 1], [], []>} : vector<8x32xf32>, vector<32x128xf32>, vector<8x128xf32> -> vector<8x128xf32>
    %c7 = arith.constant 7 : index
    %c0_24 = arith.constant 0 : index
    %c0_25 = arith.constant 0 : index
    %23 = vector.load %arg2[%c7, %c0_24, %c0_25] : memref<9x8x32xf32, #tpu.memory_space<vmem>>, vector<1x8x32xf32>
    %24 = vector.shape_cast %23 : vector<1x8x32xf32> to vector<8x32xf32>
    %cst_26 = arith.constant dense<0.000000e+00> : vector<8x128xf32>
    %25 = tpu.matmul %24, %0, %cst_26 {dimension_numbers = #tpu.dot_dimension_numbers<[1], [0], [0], [1], [0, 0, 1, 1], [], []>} : vector<8x32xf32>, vector<32x128xf32>, vector<8x128xf32> -> vector<8x128xf32>
    %c8 = arith.constant 8 : index
    %c0_27 = arith.constant 0 : index
    %c0_28 = arith.constant 0 : index
    %26 = vector.load %arg2[%c8, %c0_27, %c0_28] : memref<9x8x32xf32, #tpu.memory_space<vmem>>, vector<1x8x32xf32>
    %27 = vector.shape_cast %26 : vector<1x8x32xf32> to vector<8x32xf32>
    %cst_29 = arith.constant dense<0.000000e+00> : vector<8x128xf32>
    %28 = tpu.matmul %27, %0, %cst_29 {dimension_numbers = #tpu.dot_dimension_numbers<[1], [0], [0], [1], [0, 0, 1, 1], [], []>} : vector<8x32xf32>, vector<32x128xf32>, vector<8x128xf32> -> vector<8x128xf32>
    %cst_30 = arith.constant 0.000000e+00 : f32
    %29 = vector.broadcast %cst_30 : f32 to vector<8x32xf32>
    %cst_31 = arith.constant 0.000000e+00 : f32
    %30 = vector.broadcast %cst_31 : f32 to vector<8x32xf32>
    %31 = arith.truncf %29 : vector<8x32xf32> to vector<8x32xbf16>
    %cst_32 = arith.constant dense<0.000000e+00> : vector<8x128xf32>
    %32 = tpu.matmul %31, %1, %cst_32 {dimension_numbers = #tpu.dot_dimension_numbers<[1], [0], [0], [1], [0, 0, 1, 1], [], []>} : vector<8x32xbf16>, vector<32x128xbf16>, vector<8x128xf32> -> vector<8x128xf32>
    %33 = arith.addf %4, %32 : vector<8x128xf32>
    %34 = vector.extract_strided_slice %33 {offsets = [0, 0], sizes = [8, 96], strides = [1, 1]} : vector<8x128xf32> to vector<8x96xf32>
    %35 = arith.negf %34 : vector<8x96xf32>
    %36 = math.exp %35 : vector<8x96xf32>
    %cst_33 = arith.constant 1.000000e+00 : f32
    %37 = vector.broadcast %cst_33 : f32 to vector<8x96xf32>
    %38 = arith.addf %37, %36 : vector<8x96xf32>
    %39 = arith.divf %37, %38 : vector<8x96xf32>
    %40 = vector.extract_strided_slice %39 {offsets = [0, 0], sizes = [8, 32], strides = [1, 1]} : vector<8x96xf32> to vector<8x32xf32>
    %41 = vector.extract_strided_slice %39 {offsets = [0, 32], sizes = [8, 32], strides = [1, 1]} : vector<8x96xf32> to vector<8x32xf32>
    %42 = vector.extract_strided_slice %39 {offsets = [0, 64], sizes = [8, 32], strides = [1, 1]} : vector<8x96xf32> to vector<8x32xf32>
    %43 = vector.extract_strided_slice %33 {offsets = [0, 96], sizes = [8, 32], strides = [1, 1]} : vector<8x128xf32> to vector<8x32xf32>
    %44 = math.tanh %43 : vector<8x32xf32>
    %45 = arith.mulf %41, %30 : vector<8x32xf32>
    %46 = arith.mulf %40, %44 : vector<8x32xf32>
    %47 = arith.addf %45, %46 : vector<8x32xf32>
    %48 = math.tanh %47 : vector<8x32xf32>
    %49 = arith.mulf %42, %48 : vector<8x32xf32>
    %50 = arith.truncf %49 : vector<8x32xf32> to vector<8x32xbf16>
    %cst_34 = arith.constant dense<0.000000e+00> : vector<8x128xf32>
    %51 = tpu.matmul %50, %1, %cst_34 {dimension_numbers = #tpu.dot_dimension_numbers<[1], [0], [0], [1], [0, 0, 1, 1], [], []>} : vector<8x32xbf16>, vector<32x128xbf16>, vector<8x128xf32> -> vector<8x128xf32>
    %52 = arith.addf %7, %51 : vector<8x128xf32>
    %53 = vector.extract_strided_slice %52 {offsets = [0, 0], sizes = [8, 96], strides = [1, 1]} : vector<8x128xf32> to vector<8x96xf32>
    %54 = arith.negf %53 : vector<8x96xf32>
    %55 = math.exp %54 : vector<8x96xf32>
    %cst_35 = arith.constant 1.000000e+00 : f32
    %56 = vector.broadcast %cst_35 : f32 to vector<8x96xf32>
    %57 = arith.addf %56, %55 : vector<8x96xf32>
    %58 = arith.divf %56, %57 : vector<8x96xf32>
    %59 = vector.extract_strided_slice %58 {offsets = [0, 0], sizes = [8, 32], strides = [1, 1]} : vector<8x96xf32> to vector<8x32xf32>
    %60 = vector.extract_strided_slice %58 {offsets = [0, 32], sizes = [8, 32], strides = [1, 1]} : vector<8x96xf32> to vector<8x32xf32>
    %61 = vector.extract_strided_slice %58 {offsets = [0, 64], sizes = [8, 32], strides = [1, 1]} : vector<8x96xf32> to vector<8x32xf32>
    %62 = vector.extract_strided_slice %52 {offsets = [0, 96], sizes = [8, 32], strides = [1, 1]} : vector<8x128xf32> to vector<8x32xf32>
    %63 = math.tanh %62 : vector<8x32xf32>
    %64 = arith.mulf %60, %47 : vector<8x32xf32>
    %65 = arith.mulf %59, %63 : vector<8x32xf32>
    %66 = arith.addf %64, %65 : vector<8x32xf32>
    %67 = math.tanh %66 : vector<8x32xf32>
    %68 = arith.mulf %61, %67 : vector<8x32xf32>
    %69 = arith.truncf %68 : vector<8x32xf32> to vector<8x32xbf16>
    %cst_36 = arith.constant dense<0.000000e+00> : vector<8x128xf32>
    %70 = tpu.matmul %69, %1, %cst_36 {dimension_numbers = #tpu.dot_dimension_numbers<[1], [0], [0], [1], [0, 0, 1, 1], [], []>} : vector<8x32xbf16>, vector<32x128xbf16>, vector<8x128xf32> -> vector<8x128xf32>
    %71 = arith.addf %10, %70 : vector<8x128xf32>
    %72 = vector.extract_strided_slice %71 {offsets = [0, 0], sizes = [8, 96], strides = [1, 1]} : vector<8x128xf32> to vector<8x96xf32>
    %73 = arith.negf %72 : vector<8x96xf32>
    %74 = math.exp %73 : vector<8x96xf32>
    %cst_37 = arith.constant 1.000000e+00 : f32
    %75 = vector.broadcast %cst_37 : f32 to vector<8x96xf32>
    %76 = arith.addf %75, %74 : vector<8x96xf32>
    %77 = arith.divf %75, %76 : vector<8x96xf32>
    %78 = vector.extract_strided_slice %77 {offsets = [0, 0], sizes = [8, 32], strides = [1, 1]} : vector<8x96xf32> to vector<8x32xf32>
    %79 = vector.extract_strided_slice %77 {offsets = [0, 32], sizes = [8, 32], strides = [1, 1]} : vector<8x96xf32> to vector<8x32xf32>
    %80 = vector.extract_strided_slice %77 {offsets = [0, 64], sizes = [8, 32], strides = [1, 1]} : vector<8x96xf32> to vector<8x32xf32>
    %81 = vector.extract_strided_slice %71 {offsets = [0, 96], sizes = [8, 32], strides = [1, 1]} : vector<8x128xf32> to vector<8x32xf32>
    %82 = math.tanh %81 : vector<8x32xf32>
    %83 = arith.mulf %79, %66 : vector<8x32xf32>
    %84 = arith.mulf %78, %82 : vector<8x32xf32>
    %85 = arith.addf %83, %84 : vector<8x32xf32>
    %86 = math.tanh %85 : vector<8x32xf32>
    %87 = arith.mulf %80, %86 : vector<8x32xf32>
    %88 = arith.truncf %87 : vector<8x32xf32> to vector<8x32xbf16>
    %cst_38 = arith.constant dense<0.000000e+00> : vector<8x128xf32>
    %89 = tpu.matmul %88, %1, %cst_38 {dimension_numbers = #tpu.dot_dimension_numbers<[1], [0], [0], [1], [0, 0, 1, 1], [], []>} : vector<8x32xbf16>, vector<32x128xbf16>, vector<8x128xf32> -> vector<8x128xf32>
    %90 = arith.addf %13, %89 : vector<8x128xf32>
    %91 = vector.extract_strided_slice %90 {offsets = [0, 0], sizes = [8, 96], strides = [1, 1]} : vector<8x128xf32> to vector<8x96xf32>
    %92 = arith.negf %91 : vector<8x96xf32>
    %93 = math.exp %92 : vector<8x96xf32>
    %cst_39 = arith.constant 1.000000e+00 : f32
    %94 = vector.broadcast %cst_39 : f32 to vector<8x96xf32>
    %95 = arith.addf %94, %93 : vector<8x96xf32>
    %96 = arith.divf %94, %95 : vector<8x96xf32>
    %97 = vector.extract_strided_slice %96 {offsets = [0, 0], sizes = [8, 32], strides = [1, 1]} : vector<8x96xf32> to vector<8x32xf32>
    %98 = vector.extract_strided_slice %96 {offsets = [0, 32], sizes = [8, 32], strides = [1, 1]} : vector<8x96xf32> to vector<8x32xf32>
    %99 = vector.extract_strided_slice %96 {offsets = [0, 64], sizes = [8, 32], strides = [1, 1]} : vector<8x96xf32> to vector<8x32xf32>
    %100 = vector.extract_strided_slice %90 {offsets = [0, 96], sizes = [8, 32], strides = [1, 1]} : vector<8x128xf32> to vector<8x32xf32>
    %101 = math.tanh %100 : vector<8x32xf32>
    %102 = arith.mulf %98, %85 : vector<8x32xf32>
    %103 = arith.mulf %97, %101 : vector<8x32xf32>
    %104 = arith.addf %102, %103 : vector<8x32xf32>
    %105 = math.tanh %104 : vector<8x32xf32>
    %106 = arith.mulf %99, %105 : vector<8x32xf32>
    %107 = arith.truncf %106 : vector<8x32xf32> to vector<8x32xbf16>
    %cst_40 = arith.constant dense<0.000000e+00> : vector<8x128xf32>
    %108 = tpu.matmul %107, %1, %cst_40 {dimension_numbers = #tpu.dot_dimension_numbers<[1], [0], [0], [1], [0, 0, 1, 1], [], []>} : vector<8x32xbf16>, vector<32x128xbf16>, vector<8x128xf32> -> vector<8x128xf32>
    %109 = arith.addf %16, %108 : vector<8x128xf32>
    %110 = vector.extract_strided_slice %109 {offsets = [0, 0], sizes = [8, 96], strides = [1, 1]} : vector<8x128xf32> to vector<8x96xf32>
    %111 = arith.negf %110 : vector<8x96xf32>
    %112 = math.exp %111 : vector<8x96xf32>
    %cst_41 = arith.constant 1.000000e+00 : f32
    %113 = vector.broadcast %cst_41 : f32 to vector<8x96xf32>
    %114 = arith.addf %113, %112 : vector<8x96xf32>
    %115 = arith.divf %113, %114 : vector<8x96xf32>
    %116 = vector.extract_strided_slice %115 {offsets = [0, 0], sizes = [8, 32], strides = [1, 1]} : vector<8x96xf32> to vector<8x32xf32>
    %117 = vector.extract_strided_slice %115 {offsets = [0, 32], sizes = [8, 32], strides = [1, 1]} : vector<8x96xf32> to vector<8x32xf32>
    %118 = vector.extract_strided_slice %115 {offsets = [0, 64], sizes = [8, 32], strides = [1, 1]} : vector<8x96xf32> to vector<8x32xf32>
    %119 = vector.extract_strided_slice %109 {offsets = [0, 96], sizes = [8, 32], strides = [1, 1]} : vector<8x128xf32> to vector<8x32xf32>
    %120 = math.tanh %119 : vector<8x32xf32>
    %121 = arith.mulf %117, %104 : vector<8x32xf32>
    %122 = arith.mulf %116, %120 : vector<8x32xf32>
    %123 = arith.addf %121, %122 : vector<8x32xf32>
    %124 = math.tanh %123 : vector<8x32xf32>
    %125 = arith.mulf %118, %124 : vector<8x32xf32>
    %126 = arith.truncf %125 : vector<8x32xf32> to vector<8x32xbf16>
    %cst_42 = arith.constant dense<0.000000e+00> : vector<8x128xf32>
    %127 = tpu.matmul %126, %1, %cst_42 {dimension_numbers = #tpu.dot_dimension_numbers<[1], [0], [0], [1], [0, 0, 1, 1], [], []>} : vector<8x32xbf16>, vector<32x128xbf16>, vector<8x128xf32> -> vector<8x128xf32>
    %128 = arith.addf %19, %127 : vector<8x128xf32>
    %129 = vector.extract_strided_slice %128 {offsets = [0, 0], sizes = [8, 96], strides = [1, 1]} : vector<8x128xf32> to vector<8x96xf32>
    %130 = arith.negf %129 : vector<8x96xf32>
    %131 = math.exp %130 : vector<8x96xf32>
    %cst_43 = arith.constant 1.000000e+00 : f32
    %132 = vector.broadcast %cst_43 : f32 to vector<8x96xf32>
    %133 = arith.addf %132, %131 : vector<8x96xf32>
    %134 = arith.divf %132, %133 : vector<8x96xf32>
    %135 = vector.extract_strided_slice %134 {offsets = [0, 0], sizes = [8, 32], strides = [1, 1]} : vector<8x96xf32> to vector<8x32xf32>
    %136 = vector.extract_strided_slice %134 {offsets = [0, 32], sizes = [8, 32], strides = [1, 1]} : vector<8x96xf32> to vector<8x32xf32>
    %137 = vector.extract_strided_slice %134 {offsets = [0, 64], sizes = [8, 32], strides = [1, 1]} : vector<8x96xf32> to vector<8x32xf32>
    %138 = vector.extract_strided_slice %128 {offsets = [0, 96], sizes = [8, 32], strides = [1, 1]} : vector<8x128xf32> to vector<8x32xf32>
    %139 = math.tanh %138 : vector<8x32xf32>
    %140 = arith.mulf %136, %123 : vector<8x32xf32>
    %141 = arith.mulf %135, %139 : vector<8x32xf32>
    %142 = arith.addf %140, %141 : vector<8x32xf32>
    %143 = math.tanh %142 : vector<8x32xf32>
    %144 = arith.mulf %137, %143 : vector<8x32xf32>
    %145 = arith.truncf %144 : vector<8x32xf32> to vector<8x32xbf16>
    %cst_44 = arith.constant dense<0.000000e+00> : vector<8x128xf32>
    %146 = tpu.matmul %145, %1, %cst_44 {dimension_numbers = #tpu.dot_dimension_numbers<[1], [0], [0], [1], [0, 0, 1, 1], [], []>} : vector<8x32xbf16>, vector<32x128xbf16>, vector<8x128xf32> -> vector<8x128xf32>
    %147 = arith.addf %22, %146 : vector<8x128xf32>
    %148 = vector.extract_strided_slice %147 {offsets = [0, 0], sizes = [8, 96], strides = [1, 1]} : vector<8x128xf32> to vector<8x96xf32>
    %149 = arith.negf %148 : vector<8x96xf32>
    %150 = math.exp %149 : vector<8x96xf32>
    %cst_45 = arith.constant 1.000000e+00 : f32
    %151 = vector.broadcast %cst_45 : f32 to vector<8x96xf32>
    %152 = arith.addf %151, %150 : vector<8x96xf32>
    %153 = arith.divf %151, %152 : vector<8x96xf32>
    %154 = vector.extract_strided_slice %153 {offsets = [0, 0], sizes = [8, 32], strides = [1, 1]} : vector<8x96xf32> to vector<8x32xf32>
    %155 = vector.extract_strided_slice %153 {offsets = [0, 32], sizes = [8, 32], strides = [1, 1]} : vector<8x96xf32> to vector<8x32xf32>
    %156 = vector.extract_strided_slice %153 {offsets = [0, 64], sizes = [8, 32], strides = [1, 1]} : vector<8x96xf32> to vector<8x32xf32>
    %157 = vector.extract_strided_slice %147 {offsets = [0, 96], sizes = [8, 32], strides = [1, 1]} : vector<8x128xf32> to vector<8x32xf32>
    %158 = math.tanh %157 : vector<8x32xf32>
    %159 = arith.mulf %155, %142 : vector<8x32xf32>
    %160 = arith.mulf %154, %158 : vector<8x32xf32>
    %161 = arith.addf %159, %160 : vector<8x32xf32>
    %162 = math.tanh %161 : vector<8x32xf32>
    %163 = arith.mulf %156, %162 : vector<8x32xf32>
    %164 = arith.truncf %163 : vector<8x32xf32> to vector<8x32xbf16>
    %cst_46 = arith.constant dense<0.000000e+00> : vector<8x128xf32>
    %165 = tpu.matmul %164, %1, %cst_46 {dimension_numbers = #tpu.dot_dimension_numbers<[1], [0], [0], [1], [0, 0, 1, 1], [], []>} : vector<8x32xbf16>, vector<32x128xbf16>, vector<8x128xf32> -> vector<8x128xf32>
    %166 = arith.addf %25, %165 : vector<8x128xf32>
    %167 = vector.extract_strided_slice %166 {offsets = [0, 0], sizes = [8, 96], strides = [1, 1]} : vector<8x128xf32> to vector<8x96xf32>
    %168 = arith.negf %167 : vector<8x96xf32>
    %169 = math.exp %168 : vector<8x96xf32>
    %cst_47 = arith.constant 1.000000e+00 : f32
    %170 = vector.broadcast %cst_47 : f32 to vector<8x96xf32>
    %171 = arith.addf %170, %169 : vector<8x96xf32>
    %172 = arith.divf %170, %171 : vector<8x96xf32>
    %173 = vector.extract_strided_slice %172 {offsets = [0, 0], sizes = [8, 32], strides = [1, 1]} : vector<8x96xf32> to vector<8x32xf32>
    %174 = vector.extract_strided_slice %172 {offsets = [0, 32], sizes = [8, 32], strides = [1, 1]} : vector<8x96xf32> to vector<8x32xf32>
    %175 = vector.extract_strided_slice %172 {offsets = [0, 64], sizes = [8, 32], strides = [1, 1]} : vector<8x96xf32> to vector<8x32xf32>
    %176 = vector.extract_strided_slice %166 {offsets = [0, 96], sizes = [8, 32], strides = [1, 1]} : vector<8x128xf32> to vector<8x32xf32>
    %177 = math.tanh %176 : vector<8x32xf32>
    %178 = arith.mulf %174, %161 : vector<8x32xf32>
    %179 = arith.mulf %173, %177 : vector<8x32xf32>
    %180 = arith.addf %178, %179 : vector<8x32xf32>
    %181 = math.tanh %180 : vector<8x32xf32>
    %182 = arith.mulf %175, %181 : vector<8x32xf32>
    %183 = arith.truncf %182 : vector<8x32xf32> to vector<8x32xbf16>
    %cst_48 = arith.constant dense<0.000000e+00> : vector<8x128xf32>
    %184 = tpu.matmul %183, %1, %cst_48 {dimension_numbers = #tpu.dot_dimension_numbers<[1], [0], [0], [1], [0, 0, 1, 1], [], []>} : vector<8x32xbf16>, vector<32x128xbf16>, vector<8x128xf32> -> vector<8x128xf32>
    %185 = arith.addf %28, %184 : vector<8x128xf32>
    %186 = vector.extract_strided_slice %185 {offsets = [0, 0], sizes = [8, 96], strides = [1, 1]} : vector<8x128xf32> to vector<8x96xf32>
    %187 = arith.negf %186 : vector<8x96xf32>
    %188 = math.exp %187 : vector<8x96xf32>
    %cst_49 = arith.constant 1.000000e+00 : f32
    %189 = vector.broadcast %cst_49 : f32 to vector<8x96xf32>
    %190 = arith.addf %189, %188 : vector<8x96xf32>
    %191 = arith.divf %189, %190 : vector<8x96xf32>
    %192 = vector.extract_strided_slice %191 {offsets = [0, 0], sizes = [8, 32], strides = [1, 1]} : vector<8x96xf32> to vector<8x32xf32>
    %193 = vector.extract_strided_slice %191 {offsets = [0, 32], sizes = [8, 32], strides = [1, 1]} : vector<8x96xf32> to vector<8x32xf32>
    %194 = vector.extract_strided_slice %191 {offsets = [0, 64], sizes = [8, 32], strides = [1, 1]} : vector<8x96xf32> to vector<8x32xf32>
    %195 = vector.extract_strided_slice %185 {offsets = [0, 96], sizes = [8, 32], strides = [1, 1]} : vector<8x128xf32> to vector<8x32xf32>
    %196 = math.tanh %195 : vector<8x32xf32>
    %197 = arith.mulf %193, %180 : vector<8x32xf32>
    %198 = arith.mulf %192, %196 : vector<8x32xf32>
    %199 = arith.addf %197, %198 : vector<8x32xf32>
    %200 = math.tanh %199 : vector<8x32xf32>
    %201 = arith.mulf %194, %200 : vector<8x32xf32>
    %c0_50 = arith.constant 0 : index
    %c0_51 = arith.constant 0 : index
    %202 = vector.load %arg4[%c0_50, %c0_51] : memref<8x32xf32, #tpu.memory_space<vmem>>, vector<8x32xf32>
    tpu.vector_store %arg4[%c0_50, %c0_51], %201 {strides = array<i32>} : memref<8x32xf32, #tpu.memory_space<vmem>>, vector<8x32xf32>,
    return
  }
  func.func @transform_0(%arg0: i32) -> (i32, i32) {
    %c0_i32 = arith.constant 0 : i32
    %c0_i32_0 = arith.constant 0 : i32
    %c0_i32_1 = arith.constant 0 : i32
    return %c0_i32, %c0_i32_0 : i32, i32
  }
  func.func @transform_1(%arg0: i32) -> (i32, i32, i32) {
    %c0_i32 = arith.constant 0 : i32
    %c0_i32_0 = arith.constant 0 : i32
    %c0_i32_1 = arith.constant 0 : i32
    %c0_i32_2 = arith.constant 0 : i32
    return %c0_i32, %c0_i32_0, %c0_i32_1 : i32, i32, i32
  }
  func.func @transform_2(%arg0: i32) -> (i32, i32) {
    %c0_i32 = arith.constant 0 : i32
    %c0_i32_0 = arith.constant 0 : i32
    %c0_i32_1 = arith.constant 0 : i32
    return %c0_i32, %c0_i32_0 : i32, i32
  }
  func.func @transform_3(%arg0: i32) -> (i32, i32) {
    %c0_i32 = arith.constant 0 : i32
    %c0_i32_0 = arith.constant 0 : i32
    %c0_i32_1 = arith.constant 0 : i32
    return %c0_i32, %c0_i32_0 : i32, i32
  }
}

</mosaic_0001>

<bundles_post_ra>
// kernel: tile.9
= control target key start
LH: loop header
LB: loop body
LE: loop exit
PB: predicated region body
PF: predicated region fallthrough
CT: control target
= control target key end

     0   :  { %vm3_vm0 = vcmask 261120   ;;  %s60_s0 = inlined_call_operand.vmem [shape: f32[2,10,32], index: 0, kind: input, shape index: {}]   ;;  %s61_s1 = inlined_call_operand.vmem [shape: f32[20,32], index: 1, kind: output, shape index: {}]  }
   0x1   :  { %v2_v0 = vld [vmem:[%s60_s0] sm:$0xff]   ;;  %v20_v1 = vld [vmem:[%s60_s0 + $0x8] sm:$0x3]   ;;  %v22_v2 = vld [vmem:[%s60_s0 + $0x10] sm:$0xff]  }
   0x2   :  { %4 = vst.msk [vmem:[%s61_s1] sm:$0xff] %vm3_vm0, %v2_v0   ;;  %21 = vst.msk [vmem:[%s61_s1 + $0x8] sm:$0x3] %vm3_vm0, %v20_v1   ;;  %v24_v3 = vld [vmem:[%s60_s0 + $0x18] sm:$0x3]  }
   0x3   :  { %23 = vst.msk [vmem:[%s61_s1 + $0xa] sm:$0xff] %vm3_vm0, %v22_v2   ;;  %25 = vst.msk [vmem:[%s61_s1 + $0x12] sm:$0x3] %vm3_vm0, %v24_v3  }

// kernel: cnn_lstm_forward.3
= control target key start
LH: loop header
LB: loop body
LE: loop exit
PB: predicated region body
PF: predicated region fallthrough
CT: control target
= control target key end

     0   :  { %v1767_v0 = vmov 0.0   ;;  %v1768_v1 = vmov 0.0|0.0   ;;  %vm1769_vm0 = vmmov 0   ;;  %vm52_vm1 = vcmask 261120   ;;  %s1772_s27 = smov 64   ;;  %s2011_s2 = inlined_call_operand.vmem [shape: bf16[32,128], index: 2, kind: input, shape index: {}]   ;;  %s2012_s0 = inlined_call_operand.vmem [shape: f32[32,128], index: 0, kind: input, shape index: {}]   ;;  %s2013_s1 = inlined_call_operand.vmem [shape: f32[9,8,32], index: 1, kind: input, shape index: {}]   ;;  %s2014_s3 = inlined_call_operand.vmem [shape: f32[8,32], index: 3, kind: output, shape index: {}]  }
   0x1   :  { %1462 = vmatprep.subr.bf16.mxu0 %v1767_v0  ;;  %1633 = vmatprep.subr.bf16.mxu1 %v1768_v1  ;;  %v1798_v2 = vld [vmem:[%s2011_s2] sm:$0xff]   ;;  %v16_v4 = vld [vmem:[%s2012_s0 + $0x8] sm:$0xff]  ;;  %v17_v7 = vld [vmem:[%s2012_s0 + $0x10] sm:$0xff]  ;;  %v1770_v11 = vmov 0  }
   0x2   :  { %v15_v3 = vld [vmem:[%s2012_s0] sm:$0xff]  ;;  %1466 = vmatprep.mubr.msk.bf16.mxu0 %vm1769_vm0, %v1767_v0  ;;  %1478 = vmatprep.mubr.msk.f32.mxu1 %vm1769_vm0, %v1767_v0  ;;  %v1816_v6 = vld [vmem:[%s2011_s2 + $0x8] sm:$0xff]   ;;  %v18_v8 = vld [vmem:[%s2012_s0 + $0x18] sm:$0xff]  ;;  %s1771_s0 = smov 32  }
   0x3   :  { %1463 = vmatpush3.bf16.msra.mxu0 %v1798_v2  ;;  %v1811_v5 = vpack.c.bf16 %v16_v4, %v15_v3  ;;  %v1826_v9 = vpack.c.bf16 %v18_v8, %v17_v7  ;;  %v23_v10 = vld [vmem:[%s2013_s1] sm:$0xff]  ;;  %v1354_v29 = vld [vmem:[%s2013_s1 + $0x8] sm:$0xff]  ;;  %v1355_v52 = vld [vmem:[%s2013_s1 + $0x10] sm:$0xff] }
   0x4   :  { %1464 = vmatprep.subr.bf16.mxu0 %v1767_v0 }
   0x5   :  { %1635 = vmatpush3.bf16.msra.mxu1 %v1811_v5 }
   0x6   :  { %1636 = vmatprep.subr.bf16.mxu1 %v1768_v1 }
   0x7   :  { %1465 = vmatpush3.bf16.msra.mxu0 %v1816_v6 }
   0x8   :  { %1481 = vmatprep.subr.bf16.mxu0 %v1767_v0 }
   0x9   :  { %1638 = vmatpush3.bf16.msra.mxu1 %v1826_v9 }
   0xa   :  { %1467 = vmatmul.mubr.bf16.vlgmr.msra.gmra.mrb[0].mxu0 %v1770_v11  ;;  %1639 = vmatprep.subr.bf16.mxu1 %v1768_v1 }
   0xb   :  { %1482 = vmatpush3.bf16.msra.mxu0 %v1798_v2  ;;  %1485 = vmatprep.mubr.msk.bf16.mxu0 %vm1769_vm0, %v1767_v0 }
   0xc   :  { %1479 = vmatmul.mubr.msk.f32.vlgmr.msra.gmra.mrb[0].mxu1 %vm52_vm1, %v23_v10  ;;  %1483 = vmatprep.subr.bf16.mxu0 %v1767_v0 }
   0xd   :  { %1641 = vmatpush3.bf16.msra.mxu1 %v1811_v5  ;;  %1497 = vmatprep.mubr.msk.f32.mxu1 %vm1769_vm0, %v1767_v0 }
   0xe   :  { %1642 = vmatprep.subr.bf16.mxu1 %v1768_v1 }
   0xf   :  { %1484 = vmatpush3.bf16.msra.mxu0 %v1816_v6 }
  0x10   :  { %1500 = vmatprep.subr.bf16.mxu0 %v1767_v0 }
  0x11   :  { %1644 = vmatpush3.bf16.msra.mxu1 %v1826_v9 }
  0x12   :  { %1645 = vmatprep.subr.bf16.mxu1 %v1768_v1 }
  0x14   :  { %1498 = vmatmul.mubr.msk.f32.vlgmr.msra.gmra.mrb[2].mxu1 %vm52_vm1, %v1354_v29 }
  0x15   :  { %1647 = vmatpush3.bf16.msra.mxu1 %v1811_v5  ;;  %1516 = vmatprep.mubr.msk.f32.mxu1 %vm1769_vm0, %v1767_v0 }
  0x16   :  { %1648 = vmatprep.subr.bf16.mxu1 %v1768_v1 }
  0x19   :  { %1650 = vmatpush3.bf16.msra.mxu1 %v1826_v9 }
  0x1a   :  { %1651 = vmatprep.subr.bf16.mxu1 %v1768_v1 }
  0x1c   :  { %1517 = vmatmul.mubr.msk.f32.vlgmr.msra.gmra.mrb[4].mxu1 %vm52_vm1, %v1355_v52 }
  0x1d   :  { %1653 = vmatpush3.bf16.msra.mxu1 %v1811_v5  ;;  %1535 = vmatprep.mubr.msk.f32.mxu1 %vm1769_vm0, %v1767_v0 }
  0x1e   :  { %1654 = vmatprep.subr.bf16.mxu1 %v1768_v1 }
  0x21   :  { %1656 = vmatpush3.bf16.msra.mxu1 %v1826_v9 }
  0x22   :  { %1657 = vmatprep.subr.bf16.mxu1 %v1768_v1 }
  0xdd   :  { %v90_v12 = vpop.f32.mrb[0].mxu0 }
  0xde   :  { %v1468_v13 = vpop.f32.mrb[1].mxu0 }
  0xdf   :  { %v165_v14 = vpop.f32.mrb[0].mxu1  ;;  %v93_v15 = vpop.f32.mrb[2].mxu0 }
  0xe0   :  { %v166_v16 = vadd.f32 %v165_v14, %v90_v12  ;;  %v1480_v17 = vpop.f32.mrb[1].mxu1  ;;  %v1469_v18 = vpop.f32.mrb[3].mxu0 }
  0xe1   :  { %v1356_v17 = vld [vmem:[%s2013_s1 + $0x18] sm:$0xff] }
  0xe2   :  { %1695 = vtanh.f32 %v166_v16  ;;  %v1365_v20 = vmul.f32 -1.442695, %v166_v16  ;;  %1536 = vmatmul.mubr.msk.f32.vlgmr.msra.gmra.mrb[6].mxu1 %vm52_vm1, %v1356_v17 }
  0xe3   :  { %1659 = vmatpush3.bf16.msra.mxu1 %v1811_v5  ;;  %1554 = vmatprep.mubr.msk.f32.mxu1 %vm1769_vm0, %v1767_v0 }
  0xe4   :  { %1697 = vpow2.f32 %v1365_v20  ;;  %1660 = vmatprep.subr.bf16.mxu1 %v1768_v1 }
  0xe7   :  { %v309_v34 = vpop.f32.mrb[2].mxu1  ;;  %1662 = vmatpush3.bf16.msra.mxu1 %v1826_v9 }
  0xe8   :  { %v1499_v35 = vpop.f32.mrb[3].mxu1  ;;  %1663 = vmatprep.subr.bf16.mxu1 %v1768_v1 }
  0xec   :  { %v1696_v19 = vpop.eup %1695 }
  0xed   :  { %178 = vrot.lane.b32.xlu0 %v1696_v19, %s1771_s0 }
  0xee   :  { %v1698_v21 = vpop.eup %1697 }
  0xef   :  { %v172_v22 = vadd.f32 1.0, %v1698_v21  ;;  %v453_v57 = vpop.f32.mrb[4].mxu1 }
  0xf0   :  { %v1518_v58 = vpop.f32.mrb[5].mxu1 }
  0xf1   :  { %1699 = vrcp.f32 %v172_v22 }
  0xfb   :  { %v1700_v23 = vpop.eup %1699 }
  0xfc   :  { %v176_v26 = vmul.f32 0.0, %v1700_v23 }
 0x15f   :  { %v179_v24 = vpop.permute.xlu0 %178 }
 0x160   :  { %v181_v25 = vmul.f32 %v1700_v23, %v179_v24 }
 0x162   :  { %183 = vrot.lane.b32.xlu0 %v181_v25, %s1771_s0 }
 0x1b5   :  { %v597_v22 = vpop.f32.mrb[6].mxu1 }
 0x1d4   :  { %v184_v27 = vpop.permute.xlu0 %183 }
 0x1d5   :  { %v186_v28 = vadd.f32 %v184_v27, %v176_v26 }
 0x1d7   :  { %1701 = vtanh.f32 %v186_v28 }
 0x1e1   :  { %v1702_v30 = vpop.eup %1701 }
 0x1e2   :  { %189 = vrot.lane.b32.xlu1 %v1702_v30, %s1771_s0 }
 0x254   :  { %v190_v31 = vpop.permute.xlu1 %189 }
 0x255   :  { %v192_v32 = vmul.f32 %v1700_v23, %v190_v31  ;;  %v1537_v23 = vpop.f32.mrb[7].mxu1 }
 0x257   :  { %v193_v33 = vpack.c.bf16 %v192_v32, %v192_v32 }
 0x259   :  { %195 = vrot.lane.b32.xlu1 %v193_v33, %s1772_s27 }
 0x2cb   :  { %v196_v36 = vpop.permute.xlu1 %195 }
 0x2cc   :  { %1486 = vmatmul.mubr.msk.bf16.vlgmr.msra.gmra.mrb[4].mxu0 %vm52_vm1, %v196_v36 }
 0x2cd   :  { %1501 = vmatpush3.bf16.msra.mxu0 %v1798_v2  ;;  %1504 = vmatprep.mubr.msk.bf16.mxu0 %vm1769_vm0, %v1767_v0 }
 0x2ce   :  { %1502 = vmatprep.subr.bf16.mxu0 %v1767_v0 }
 0x2d1   :  { %1503 = vmatpush3.bf16.msra.mxu0 %v1816_v6 }
 0x2d2   :  { %1519 = vmatprep.subr.bf16.mxu0 %v1767_v0 }
 0x39f   :  { %v234_v37 = vpop.f32.mrb[4].mxu0 }
 0x3a0   :  { %v310_v38 = vadd.f32 %v309_v34, %v234_v37  ;;  %v1487_v39 = vpop.f32.mrb[5].mxu0 }
 0x3a1   :  { %v237_v40 = vpop.f32.mrb[6].mxu0 }
 0x3a2   :  { %1703 = vtanh.f32 %v310_v38  ;;  %v1488_v41 = vpop.f32.mrb[7].mxu0  ;;  %v1368_v43 = vmul.f32 -1.442695, %v310_v38  ;;  %v1357_v40 = vld [vmem:[%s2013_s1 + $0x20] sm:$0xff] }
 0x3a3   :  { %1555 = vmatmul.mubr.msk.f32.vlgmr.msra.gmra.mrb[8].mxu1 %vm52_vm1, %v1357_v40 }
 0x3a4   :  { %1705 = vpow2.f32 %v1368_v43  ;;  %1665 = vmatpush3.bf16.msra.mxu1 %v1811_v5  ;;  %1573 = vmatprep.mubr.msk.f32.mxu1 %vm1769_vm0, %v1767_v0 }
 0x3a5   :  { %1666 = vmatprep.subr.bf16.mxu1 %v1768_v1 }
 0x3a8   :  { %1668 = vmatpush3.bf16.msra.mxu1 %v1826_v9 }
 0x3a9   :  { %1669 = vmatprep.subr.bf16.mxu1 %v1768_v1 }
 0x3ac   :  { %v1704_v42 = vpop.eup %1703 }
 0x3ad   :  { %322 = vrot.lane.b32.xlu0 %v1704_v42, %s1771_s0 }
 0x3ae   :  { %v1706_v44 = vpop.eup %1705 }
 0x3af   :  { %v316_v45 = vadd.f32 1.0, %v1706_v44 }
 0x3b1   :  { %1707 = vrcp.f32 %v316_v45 }
 0x3bb   :  { %v1708_v46 = vpop.eup %1707 }
 0x3bc   :  { %v320_v49 = vmul.f32 %v1708_v46, %v186_v28 }
 0x41f   :  { %v323_v47 = vpop.permute.xlu0 %322 }
 0x420   :  { %v325_v48 = vmul.f32 %v1708_v46, %v323_v47 }
 0x422   :  { %327 = vrot.lane.b32.xlu1 %v325_v48, %s1771_s0 }
 0x476   :  { %v741_v45 = vpop.f32.mrb[8].mxu1 }
 0x494   :  { %v328_v50 = vpop.permute.xlu1 %327 }
 0x495   :  { %v330_v51 = vadd.f32 %v328_v50, %v320_v49 }
 0x497   :  { %1709 = vtanh.f32 %v330_v51 }
 0x4a1   :  { %v1710_v53 = vpop.eup %1709 }
 0x4a2   :  { %333 = vrot.lane.b32.xlu0 %v1710_v53, %s1771_s0 }
 0x514   :  { %v334_v54 = vpop.permute.xlu0 %333 }
 0x515   :  { %v336_v55 = vmul.f32 %v1708_v46, %v334_v54  ;;  %v1556_v46 = vpop.f32.mrb[9].mxu1 }
 0x517   :  { %v337_v56 = vpack.c.bf16 %v336_v55, %v336_v55 }
 0x519   :  { %339 = vrot.lane.b32.xlu1 %v337_v56, %s1772_s27 }
 0x58b   :  { %v340_v59 = vpop.permute.xlu1 %339 }
 0x58c   :  { %1505 = vmatmul.mubr.msk.bf16.vlgmr.msra.gmra.mrb[8].mxu0 %vm52_vm1, %v340_v59 }
 0x58d   :  { %1520 = vmatpush3.bf16.msra.mxu0 %v1798_v2  ;;  %1523 = vmatprep.mubr.msk.bf16.mxu0 %vm1769_vm0, %v1767_v0 }
 0x58e   :  { %1521 = vmatprep.subr.bf16.mxu0 %v1767_v0 }
 0x591   :  { %1522 = vmatpush3.bf16.msra.mxu0 %v1816_v6 }
 0x592   :  { %1538 = vmatprep.subr.bf16.mxu0 %v1767_v0 }
 0x65f   :  { %v378_v60 = vpop.f32.mrb[8].mxu0 }
 0x660   :  { %v454_v61 = vadd.f32 %v453_v57, %v378_v60  ;;  %v1506_v62 = vpop.f32.mrb[9].mxu0 }
 0x661   :  { %v381_v63 = vpop.f32.mrb[10].mxu0 }
 0x662   :  { %1711 = vtanh.f32 %v454_v61  ;;  %v1507_v3 = vpop.f32.mrb[11].mxu0  ;;  %v1371_v7 = vmul.f32 -1.442695, %v454_v61  ;;  %v1358_v63 = vld [vmem:[%s2013_s1 + $0x28] sm:$0xff] }
 0x663   :  { %1574 = vmatmul.mubr.msk.f32.vlgmr.msra.gmra.mrb[10].mxu1 %vm52_vm1, %v1358_v63 }
 0x664   :  { %1713 = vpow2.f32 %v1371_v7  ;;  %1671 = vmatpush3.bf16.msra.mxu1 %v1811_v5  ;;  %1592 = vmatprep.mubr.msk.f32.mxu1 %vm1769_vm0, %v1767_v0 }
 0x665   :  { %1672 = vmatprep.subr.bf16.mxu1 %v1768_v1 }
 0x668   :  { %1674 = vmatpush3.bf16.msra.mxu1 %v1826_v9 }
 0x669   :  { %1675 = vmatprep.subr.bf16.mxu1 %v1768_v1 }
 0x66c   :  { %v1712_v4 = vpop.eup %1711 }
 0x66d   :  { %466 = vrot.lane.b32.xlu0 %v1712_v4, %s1771_s0 }
 0x66e   :  { %v1714_v8 = vpop.eup %1713 }
 0x66f   :  { %v460_v10 = vadd.f32 1.0, %v1714_v8 }
 0x671   :  { %1715 = vrcp.f32 %v460_v10 }
 0x67b   :  { %v1716_v11 = vpop.eup %1715 }
 0x67c   :  { %v464_v14 = vmul.f32 %v1716_v11, %v330_v51 }
 0x6df   :  { %v467_v12 = vpop.permute.xlu0 %466 }
 0x6e0   :  { %v469_v13 = vmul.f32 %v1716_v11, %v467_v12 }
 0x6e2   :  { %471 = vrot.lane.b32.xlu1 %v469_v13, %s1771_s0 }
 0x736   :  { %v885_v10 = vpop.f32.mrb[10].mxu1 }
 0x754   :  { %v472_v15 = vpop.permute.xlu1 %471 }
 0x755   :  { %v474_v16 = vadd.f32 %v472_v15, %v464_v14 }
 0x757   :  { %1717 = vtanh.f32 %v474_v16 }
 0x761   :  { %v1718_v18 = vpop.eup %1717 }
 0x762   :  { %477 = vrot.lane.b32.xlu0 %v1718_v18, %s1771_s0 }
 0x7d4   :  { %v478_v19 = vpop.permute.xlu0 %477 }
 0x7d5   :  { %v480_v20 = vmul.f32 %v1716_v11, %v478_v19  ;;  %v1575_v11 = vpop.f32.mrb[11].mxu1 }
 0x7d7   :  { %v481_v21 = vpack.c.bf16 %v480_v20, %v480_v20 }
 0x7d9   :  { %483 = vrot.lane.b32.xlu1 %v481_v21, %s1772_s27 }
 0x84b   :  { %v484_v24 = vpop.permute.xlu1 %483 }
 0x84c   :  { %1524 = vmatmul.mubr.msk.bf16.vlgmr.msra.gmra.mrb[12].mxu0 %vm52_vm1, %v484_v24 }
 0x84d   :  { %1539 = vmatpush3.bf16.msra.mxu0 %v1798_v2  ;;  %1542 = vmatprep.mubr.msk.bf16.mxu0 %vm1769_vm0, %v1767_v0 }
 0x84e   :  { %1540 = vmatprep.subr.bf16.mxu0 %v1767_v0 }
 0x851   :  { %1541 = vmatpush3.bf16.msra.mxu0 %v1816_v6 }
 0x852   :  { %1557 = vmatprep.subr.bf16.mxu0 %v1767_v0 }
 0x91f   :  { %v522_v25 = vpop.f32.mrb[12].mxu0 }
 0x920   :  { %v598_v26 = vadd.f32 %v597_v22, %v522_v25  ;;  %v1525_v27 = vpop.f32.mrb[13].mxu0 }
 0x921   :  { %v525_v28 = vpop.f32.mrb[14].mxu0 }
 0x922   :  { %1719 = vtanh.f32 %v598_v26  ;;  %v1526_v29 = vpop.f32.mrb[15].mxu0  ;;  %v1374_v31 = vmul.f32 -1.442695, %v598_v26  ;;  %v1359_v28 = vld [vmem:[%s2013_s1 + $0x30] sm:$0xff] }
 0x923   :  { %1593 = vmatmul.mubr.msk.f32.vlgmr.msra.gmra.mrb[12].mxu1 %vm52_vm1, %v1359_v28 }
 0x924   :  { %1721 = vpow2.f32 %v1374_v31  ;;  %1677 = vmatpush3.bf16.msra.mxu1 %v1811_v5  ;;  %1611 = vmatprep.mubr.msk.f32.mxu1 %vm1769_vm0, %v1767_v0 }
 0x925   :  { %1678 = vmatprep.subr.bf16.mxu1 %v1768_v1 }
 0x928   :  { %1680 = vmatpush3.bf16.msra.mxu1 %v1826_v9 }
 0x929   :  { %1681 = vmatprep.subr.bf16.mxu1 %v1768_v1 }
 0x92c   :  { %v1720_v30 = vpop.eup %1719 }
 0x92d   :  { %610 = vrot.lane.b32.xlu0 %v1720_v30, %s1771_s0 }
 0x92e   :  { %v1722_v32 = vpop.eup %1721 }
 0x92f   :  { %v604_v33 = vadd.f32 1.0, %v1722_v32 }
 0x931   :  { %1723 = vrcp.f32 %v604_v33 }
 0x93b   :  { %v1724_v34 = vpop.eup %1723 }
 0x93c   :  { %v608_v37 = vmul.f32 %v1724_v34, %v474_v16 }
 0x99f   :  { %v611_v35 = vpop.permute.xlu0 %610 }
 0x9a0   :  { %v613_v36 = vmul.f32 %v1724_v34, %v611_v35 }
 0x9a2   :  { %615 = vrot.lane.b32.xlu1 %v613_v36, %s1771_s0 }
 0x9f6   :  { %v1029_v33 = vpop.f32.mrb[12].mxu1 }
 0xa14   :  { %v616_v38 = vpop.permute.xlu1 %615 }
 0xa15   :  { %v618_v39 = vadd.f32 %v616_v38, %v608_v37 }
 0xa17   :  { %1725 = vtanh.f32 %v618_v39 }
 0xa21   :  { %v1726_v41 = vpop.eup %1725 }
 0xa22   :  { %621 = vrot.lane.b32.xlu0 %v1726_v41, %s1771_s0 }
 0xa94   :  { %v622_v42 = vpop.permute.xlu0 %621 }
 0xa95   :  { %v624_v43 = vmul.f32 %v1724_v34, %v622_v42  ;;  %v1594_v34 = vpop.f32.mrb[13].mxu1 }
 0xa97   :  { %v625_v44 = vpack.c.bf16 %v624_v43, %v624_v43 }
 0xa99   :  { %627 = vrot.lane.b32.xlu1 %v625_v44, %s1772_s27 }
 0xb0b   :  { %v628_v47 = vpop.permute.xlu1 %627 }
 0xb0c   :  { %1543 = vmatmul.mubr.msk.bf16.vlgmr.msra.gmra.mrb[16].mxu0 %vm52_vm1, %v628_v47 }
 0xb0d   :  { %1558 = vmatpush3.bf16.msra.mxu0 %v1798_v2  ;;  %1561 = vmatprep.mubr.msk.bf16.mxu0 %vm1769_vm0, %v1767_v0 }
 0xb0e   :  { %1559 = vmatprep.subr.bf16.mxu0 %v1767_v0 }
 0xb11   :  { %1560 = vmatpush3.bf16.msra.mxu0 %v1816_v6 }
 0xb12   :  { %1576 = vmatprep.subr.bf16.mxu0 %v1767_v0 }
 0xbdf   :  { %v666_v48 = vpop.f32.mrb[16].mxu0 }
 0xbe0   :  { %v742_v49 = vadd.f32 %v741_v45, %v666_v48  ;;  %v1544_v50 = vpop.f32.mrb[17].mxu0 }
 0xbe1   :  { %v669_v51 = vpop.f32.mrb[18].mxu0 }
 0xbe2   :  { %1727 = vtanh.f32 %v742_v49  ;;  %v1545_v52 = vpop.f32.mrb[19].mxu0  ;;  %v1377_v54 = vmul.f32 -1.442695, %v742_v49  ;;  %v1360_v51 = vld [vmem:[%s2013_s1 + $0x38] sm:$0xff] }
 0xbe3   :  { %1612 = vmatmul.mubr.msk.f32.vlgmr.msra.gmra.mrb[14].mxu1 %vm52_vm1, %v1360_v51 }
 0xbe4   :  { %1729 = vpow2.f32 %v1377_v54  ;;  %1683 = vmatpush3.bf16.msra.mxu1 %v1811_v5  ;;  %1630 = vmatprep.mubr.msk.f32.mxu1 %vm1769_vm0, %v1767_v0 }
 0xbe5   :  { %1684 = vmatprep.subr.bf16.mxu1 %v1768_v1 }
 0xbe8   :  { %1686 = vmatpush3.bf16.msra.mxu1 %v1826_v9 }
 0xbec   :  { %v1728_v53 = vpop.eup %1727 }
 0xbed   :  { %754 = vrot.lane.b32.xlu0 %v1728_v53, %s1771_s0 }
 0xbee   :  { %v1730_v55 = vpop.eup %1729 }
 0xbef   :  { %v748_v56 = vadd.f32 1.0, %v1730_v55 }
 0xbf1   :  { %1731 = vrcp.f32 %v748_v56 }
 0xbfb   :  { %v1732_v57 = vpop.eup %1731 }
 0xbfc   :  { %v752_v60 = vmul.f32 %v1732_v57, %v618_v39 }
 0xc5f   :  { %v755_v58 = vpop.permute.xlu0 %754 }
 0xc60   :  { %v757_v59 = vmul.f32 %v1732_v57, %v755_v58 }
 0xc62   :  { %759 = vrot.lane.b32.xlu1 %v757_v59, %s1771_s0 }
 0xcb6   :  { %v1173_v56 = vpop.f32.mrb[14].mxu1 }
 0xcd4   :  { %v760_v61 = vpop.permute.xlu1 %759 }
 0xcd5   :  { %v762_v62 = vadd.f32 %v760_v61, %v752_v60 }
 0xcd7   :  { %1733 = vtanh.f32 %v762_v62 }
 0xce1   :  { %v1734_v3 = vpop.eup %1733 }
 0xce2   :  { %765 = vrot.lane.b32.xlu0 %v1734_v3, %s1771_s0 }
 0xd54   :  { %v766_v4 = vpop.permute.xlu0 %765 }
 0xd55   :  { %v768_v7 = vmul.f32 %v1732_v57, %v766_v4  ;;  %v1613_v57 = vpop.f32.mrb[15].mxu1 }
 0xd57   :  { %v769_v8 = vpack.c.bf16 %v768_v7, %v768_v7 }
 0xd59   :  { %771 = vrot.lane.b32.xlu1 %v769_v8, %s1772_s27 }
 0xdcb   :  { %v772_v12 = vpop.permute.xlu1 %771 }
 0xdcc   :  { %1562 = vmatmul.mubr.msk.bf16.vlgmr.msra.gmra.mrb[20].mxu0 %vm52_vm1, %v772_v12 }
 0xdcd   :  { %1577 = vmatpush3.bf16.msra.mxu0 %v1798_v2  ;;  %1580 = vmatprep.mubr.msk.bf16.mxu0 %vm1769_vm0, %v1767_v0 }
 0xdce   :  { %1578 = vmatprep.subr.bf16.mxu0 %v1767_v0 }
 0xdd1   :  { %1579 = vmatpush3.bf16.msra.mxu0 %v1816_v6 }
 0xdd2   :  { %1595 = vmatprep.subr.bf16.mxu0 %v1767_v0 }
 0xe9f   :  { %v810_v13 = vpop.f32.mrb[20].mxu0 }
 0xea0   :  { %v886_v14 = vadd.f32 %v885_v10, %v810_v13  ;;  %v1563_v15 = vpop.f32.mrb[21].mxu0  ;;  %v1361_v10 = vld [vmem:[%s2013_s1 + $0x40] sm:$0xff] }
 0xea1   :  { %v813_v16 = vpop.f32.mrb[22].mxu0  ;;  %1631 = vmatmul.mubr.msk.f32.vlgmr.msra.gmra.mrb[16].mxu1 %vm52_vm1, %v1361_v10 }
 0xea2   :  { %1735 = vtanh.f32 %v886_v14  ;;  %v1564_v17 = vpop.f32.mrb[23].mxu0  ;;  %v1380_v19 = vmul.f32 -1.442695, %v886_v14 }
 0xea4   :  { %1737 = vpow2.f32 %v1380_v19 }
 0xeac   :  { %v1736_v18 = vpop.eup %1735 }
 0xead   :  { %898 = vrot.lane.b32.xlu0 %v1736_v18, %s1771_s0 }
 0xeae   :  { %v1738_v20 = vpop.eup %1737 }
 0xeaf   :  { %v892_v21 = vadd.f32 1.0, %v1738_v20 }
 0xeb1   :  { %1739 = vrcp.f32 %v892_v21 }
 0xebb   :  { %v1740_v22 = vpop.eup %1739 }
 0xebc   :  { %v896_v25 = vmul.f32 %v1740_v22, %v762_v62 }
 0xf1f   :  { %v899_v23 = vpop.permute.xlu0 %898 }
 0xf20   :  { %v901_v24 = vmul.f32 %v1740_v22, %v899_v23 }
 0xf22   :  { %903 = vrot.lane.b32.xlu1 %v901_v24, %s1771_s0 }
 0xf74   :  { %v1317_v15 = vpop.f32.mrb[16].mxu1 }
 0xf75   :  { %v1632_v16 = vpop.f32.mrb[17].mxu1 }
 0xf94   :  { %v904_v26 = vpop.permute.xlu1 %903 }
 0xf95   :  { %v906_v27 = vadd.f32 %v904_v26, %v896_v25 }
 0xf97   :  { %1741 = vtanh.f32 %v906_v27 }
 0xfa1   :  { %v1742_v29 = vpop.eup %1741 }
 0xfa2   :  { %909 = vrot.lane.b32.xlu0 %v1742_v29, %s1771_s0 }
0x1014   :  { %v910_v30 = vpop.permute.xlu0 %909 }
0x1015   :  { %v912_v31 = vmul.f32 %v1740_v22, %v910_v30 }
0x1017   :  { %v913_v32 = vpack.c.bf16 %v912_v31, %v912_v31 }
0x1019   :  { %915 = vrot.lane.b32.xlu1 %v913_v32, %s1772_s27 }
0x108b   :  { %v916_v35 = vpop.permute.xlu1 %915 }
0x108c   :  { %1581 = vmatmul.mubr.msk.bf16.vlgmr.msra.gmra.mrb[24].mxu0 %vm52_vm1, %v916_v35 }
0x108d   :  { %1596 = vmatpush3.bf16.msra.mxu0 %v1798_v2  ;;  %1599 = vmatprep.mubr.msk.bf16.mxu0 %vm1769_vm0, %v1767_v0 }
0x108e   :  { %1597 = vmatprep.subr.bf16.mxu0 %v1767_v0 }
0x1091   :  { %1598 = vmatpush3.bf16.msra.mxu0 %v1816_v6 }
0x1092   :  { %1614 = vmatprep.subr.bf16.mxu0 %v1767_v0 }
0x115f   :  { %v954_v36 = vpop.f32.mrb[24].mxu0 }
0x1160   :  { %v1030_v37 = vadd.f32 %v1029_v33, %v954_v36  ;;  %v1582_v38 = vpop.f32.mrb[25].mxu0 }
0x1161   :  { %v957_v39 = vpop.f32.mrb[26].mxu0 }
0x1162   :  { %1743 = vtanh.f32 %v1030_v37  ;;  %v1583_v40 = vpop.f32.mrb[27].mxu0  ;;  %v1383_v42 = vmul.f32 -1.442695, %v1030_v37 }
0x1164   :  { %1745 = vpow2.f32 %v1383_v42 }
0x116c   :  { %v1744_v41 = vpop.eup %1743 }
0x116d   :  { %1042 = vrot.lane.b32.xlu0 %v1744_v41, %s1771_s0 }
0x116e   :  { %v1746_v43 = vpop.eup %1745 }
0x116f   :  { %v1036_v44 = vadd.f32 1.0, %v1746_v43 }
0x1171   :  { %1747 = vrcp.f32 %v1036_v44 }
0x117b   :  { %v1748_v45 = vpop.eup %1747 }
0x117c   :  { %v1040_v48 = vmul.f32 %v1748_v45, %v906_v27 }
0x11df   :  { %v1043_v46 = vpop.permute.xlu0 %1042 }
0x11e0   :  { %v1045_v47 = vmul.f32 %v1748_v45, %v1043_v46 }
0x11e2   :  { %1047 = vrot.lane.b32.xlu1 %v1045_v47, %s1771_s0 }
0x1254   :  { %v1048_v49 = vpop.permute.xlu1 %1047 }
0x1255   :  { %v1050_v50 = vadd.f32 %v1048_v49, %v1040_v48 }
0x1257   :  { %1749 = vtanh.f32 %v1050_v50 }
0x1261   :  { %v1750_v52 = vpop.eup %1749 }
0x1262   :  { %1053 = vrot.lane.b32.xlu0 %v1750_v52, %s1771_s0 }
0x12d4   :  { %v1054_v53 = vpop.permute.xlu0 %1053 }
0x12d5   :  { %v1056_v54 = vmul.f32 %v1748_v45, %v1054_v53 }
0x12d7   :  { %v1057_v55 = vpack.c.bf16 %v1056_v54, %v1056_v54 }
0x12d9   :  { %1059 = vrot.lane.b32.xlu1 %v1057_v55, %s1772_s27 }
0x134b   :  { %v1060_v58 = vpop.permute.xlu1 %1059 }
0x134c   :  { %1600 = vmatmul.mubr.msk.bf16.vlgmr.msra.gmra.mrb[28].mxu0 %vm52_vm1, %v1060_v58 }
0x134d   :  { %1615 = vmatpush3.bf16.msra.mxu0 %v1798_v2  ;;  %1618 = vmatprep.mubr.msk.bf16.mxu0 %vm1769_vm0, %v1767_v0 }
0x134e   :  { %1616 = vmatprep.subr.bf16.mxu0 %v1767_v0 }
0x1351   :  { %1617 = vmatpush3.bf16.msra.mxu0 %v1816_v6 }
0x141f   :  { %v1098_v1 = vpop.f32.mrb[28].mxu0 }
0x1420   :  { %v1174_v5 = vadd.f32 %v1173_v56, %v1098_v1  ;;  %v1601_v9 = vpop.f32.mrb[29].mxu0 }
0x1421   :  { %v1101_v59 = vpop.f32.mrb[30].mxu0 }
0x1422   :  { %1751 = vtanh.f32 %v1174_v5  ;;  %v1602_v60 = vpop.f32.mrb[31].mxu0  ;;  %v1386_v62 = vmul.f32 -1.442695, %v1174_v5 }
0x1424   :  { %1753 = vpow2.f32 %v1386_v62 }
0x142c   :  { %v1752_v61 = vpop.eup %1751 }
0x142d   :  { %1186 = vrot.lane.b32.xlu0 %v1752_v61, %s1771_s0 }
0x142e   :  { %v1754_v63 = vpop.eup %1753 }
0x142f   :  { %v1180_v2 = vadd.f32 1.0, %v1754_v63 }
0x1431   :  { %1755 = vrcp.f32 %v1180_v2 }
0x143b   :  { %v1756_v3 = vpop.eup %1755 }
0x143c   :  { %v1184_v0 = vmul.f32 %v1756_v3, %v1050_v50 }
0x149f   :  { %v1187_v4 = vpop.permute.xlu0 %1186 }
0x14a0   :  { %v1189_v7 = vmul.f32 %v1756_v3, %v1187_v4 }
0x14a2   :  { %1191 = vrot.lane.b32.xlu1 %v1189_v7, %s1771_s0 }
0x1514   :  { %v1192_v6 = vpop.permute.xlu1 %1191 }
0x1515   :  { %v1194_v8 = vadd.f32 %v1192_v6, %v1184_v0 }
0x1517   :  { %1757 = vtanh.f32 %v1194_v8 }
0x1521   :  { %v1758_v11 = vpop.eup %1757 }
0x1522   :  { %1197 = vrot.lane.b32.xlu0 %v1758_v11, %s1771_s0 }
0x1594   :  { %v1198_v12 = vpop.permute.xlu0 %1197 }
0x1595   :  { %v1200_v13 = vmul.f32 %v1756_v3, %v1198_v12 }
0x1597   :  { %v1201_v14 = vpack.c.bf16 %v1200_v13, %v1200_v13 }
0x1599   :  { %1203 = vrot.lane.b32.xlu1 %v1201_v14, %s1772_s27 }
0x160b   :  { %v1204_v17 = vpop.permute.xlu1 %1203 }
0x160c   :  { %1619 = vmatmul.mubr.msk.bf16.vlgmr.msra.gmra.mrb[32].mxu0 %vm52_vm1, %v1204_v17 }
0x16df   :  { %v1242_v18 = vpop.f32.mrb[32].mxu0 }
0x16e0   :  { %v1318_v19 = vadd.f32 %v1317_v15, %v1242_v18  ;;  %v1620_v20 = vpop.f32.mrb[33].mxu0 }
0x16e1   :  { %v1245_v21 = vpop.f32.mrb[34].mxu0 }
0x16e2   :  { %1759 = vtanh.f32 %v1318_v19  ;;  %v1621_v22 = vpop.f32.mrb[35].mxu0  ;;  %v1389_v24 = vmul.f32 -1.442695, %v1318_v19 }
0x16e4   :  { %1761 = vpow2.f32 %v1389_v24 }
0x16ec   :  { %v1760_v23 = vpop.eup %1759 }
0x16ed   :  { %1330 = vrot.lane.b32.xlu0 %v1760_v23, %s1771_s0 }
0x16ee   :  { %v1762_v25 = vpop.eup %1761 }
0x16ef   :  { %v1324_v26 = vadd.f32 1.0, %v1762_v25 }
0x16f1   :  { %1763 = vrcp.f32 %v1324_v26 }
0x16fb   :  { %v1764_v27 = vpop.eup %1763 }
0x16fc   :  { %v1328_v30 = vmul.f32 %v1764_v27, %v1194_v8 }
0x175f   :  { %v1331_v28 = vpop.permute.xlu0 %1330 }
0x1760   :  { %v1333_v29 = vmul.f32 %v1764_v27, %v1331_v28 }
0x1762   :  { %1335 = vrot.lane.b32.xlu1 %v1333_v29, %s1771_s0 }
0x17d4   :  { %v1336_v31 = vpop.permute.xlu1 %1335 }
0x17d5   :  { %v1338_v32 = vadd.f32 %v1336_v31, %v1328_v30 }
0x17d7   :  { %1765 = vtanh.f32 %v1338_v32 }
0x17e1   :  { %v1766_v33 = vpop.eup %1765 }
0x17e2   :  { %1341 = vrot.lane.b32.xlu0 %v1766_v33, %s1771_s0 }
0x1854   :  { %v1342_v34 = vpop.permute.xlu0 %1341 }
0x1855   :  { %v1344_v35 = vmul.f32 %v1764_v27, %v1342_v34 }
0x1857   :  { %1346 = vrot.lane.b32.xlu1 %v1344_v35, %s1772_s27 }
0x18c9   :  { %v1347_v36 = vpop.permute.xlu1 %1346 }
0x18ca   :  { %1349 = vst.msk [vmem:[%s2014_s3] sm:$0xff] %vm52_vm1, %v1347_v36 }

// kernel: cnn_lstm_forward.2
= control target key start
LH: loop header
LB: loop body
LE: loop exit
PB: predicated region body
PF: predicated region fallthrough
CT: control target
= control target key end

     0   :  { %s6969_s24 = smov 0   ;;  %s8475_s0 = inlined_call_operand.vmem [shape: bf16[2,64,144], index: 0, kind: input, shape index: {}]   ;;  %s8476_s1 = inlined_call_operand.vmem [shape: bf16[144,128], index: 1, kind: input, shape index: {}]   ;;  %s8477_s2 = inlined_call_operand.vmem [shape: f32[1,128], index: 2, kind: input, shape index: {}]   ;;  %s8478_s3 = inlined_call_operand.vmem [shape: f32[1,128], index: 3, kind: input, shape index: {}]   ;;  %s8479_s4 = inlined_call_operand.vmem [shape: bf16[1152,128], index: 4, kind: input, shape index: {}]   ;;  %s8480_s5 = inlined_call_operand.vmem [shape: f32[1,128], index: 5, kind: input, shape index: {}]   ;;  %s8481_s6 = inlined_call_operand.vmem [shape: f32[1,128], index: 6, kind: input, shape index: {}]   ;;  %s8482_s7 = inlined_call_operand.vmem [shape: bf16[1152,128], index: 7, kind: input, shape index: {}]   ;;  %s8483_s8 = inlined_call_operand.vmem [shape: f32[1,128], index: 8, kind: input, shape index: {}]   ;;  %s8484_s9 = inlined_call_operand.vmem [shape: f32[1,128], index: 9, kind: input, shape index: {}]   ;;  %s8485_s10 = inlined_call_operand.vmem [shape: bf16[1152,128], index: 10, kind: input, shape index: {}]   ;;  %s8486_s11 = inlined_call_operand.vmem [shape: f32[1,128], index: 11, kind: input, shape index: {}]   ;;  %s8487_s12 = inlined_call_operand.vmem [shape: f32[1,128], index: 12, kind: input, shape index: {}]   ;;  %s8488_s13 = inlined_call_operand.vmem [shape: f32[8,128,32], index: 13, kind: input, shape index: {}]   ;;  %s8489_s14 = inlined_call_operand.vmem [shape: f32[2,16,32], index: 14, kind: input, shape index: {}]   ;;  %s8490_s15 = inlined_call_operand.vmem [shape: f32[32,128], index: 15, kind: input, shape index: {}]   ;;  %s8491_s16 = inlined_call_operand.vmem [shape: f32[1,128], index: 16, kind: input, shape index: {}]   ;;  %s8492_s17 = inlined_call_operand.vmem [shape: f32[2,16,128], index: 17, kind: output, shape index: {}]  }
   0x1   :  { %8494 = sst [smem:[#allocation3_spill]] %s8475_s0 }
   0x2   :  { %8495 = sst [smem:[#allocation4_spill]] %s8476_s1 }
   0x3 LB: > { %s4937_s25 = sadd.s32 4294967295, %s6875_s24   ;;  %p4941_p0 = scmp.ge.s32.totalorder %s6875_s24, 1  ;;  %s6875_s24 = sphi %s6969_s24, %s27_s24  }
   0x4   : > { %p497_p1 = scmp.lt.s32.totalorder %s6875_s24, 3 }
   0x6   : > { %p498_p2 = pnand %p4941_p0, %p497_p1 }
   0x7   : > { %s8496_s28 = sld [smem:[#allocation4_spill]] (!%p498_p2)  ;;  %v6877_v1 = vmov (!%p498_p2), 0   ;;  %p554_p3 = scmp.lt.s32.totalorder (!%p498_p2), %s4937_s25, 1  ;;  %vm708_vm0 = vcmask (!%p498_p2), 130048   ;;  %v6651_v11 = vld [vmem:[%s8479_s4 + $0x40] sm:$0xff] (!%p498_p2)   ;;  %v6653_v15 = vld [vmem:[%s8479_s4 + $0x48] sm:$0xff] (!%p498_p2)  }
   0x8   : > { %501 = sbr.rel (%p498_p2) target bundleno = 1977 (0x7b9), region = 88  ;;  %721 = vmatprep.subr.bf16.mxu0 (!%p498_p2), %v6877_v1  ;;  %s8497_s21 = sld [smem:[#allocation3_spill]] (!%p498_p2)  ;;  %v6652_v14 = vld [vmem:[%s8479_s4] sm:$0xff] (!%p498_p2)   ;;  %v6654_v16 = vld [vmem:[%s8479_s4 + $0x8] sm:$0xff] (!%p498_p2)   ;;  %v6655_v17 = vld [vmem:[%s8479_s4 + $0x50] sm:$0xff] (!%p498_p2)   ;;  %v6878_v27 = vmov (!%p498_p2), 0.0  }
   0x9   : > { %v6656_v20 = vld [vmem:[%s8479_s4 + $0x10] sm:$0xff] (!%p498_p2)   ;;  %v6657_v21 = vld [vmem:[%s8479_s4 + $0x58] sm:$0xff] (!%p498_p2)   ;;  %v6659_v26 = vld [vmem:[%s8479_s4 + $0x60] sm:$0xff] (!%p498_p2)   ;;  %570 = vst [vmem:[#allocation2] sm:$0xff] (!%p498_p2), %v6878_v27  ;;  %vm4786_vm1 = vcmask (!%p498_p2), 261120  }
   0xa   : > { %v6658_v22 = vld [vmem:[%s8479_s4 + $0x18] sm:$0xff] (!%p498_p2)   ;;  %571 = vst [vmem:[#allocation2 + $0x8] sm:$0x3] (!%p498_p2), %v6878_v27  ;;  %573 = vst [vmem:[#allocation2 + $0x90] sm:$0xff] (!%p498_p2), %v6878_v27  ;;  %v6660_v28 = vld [vmem:[%s8479_s4 + $0x20] sm:$0xff] (!%p498_p2)  }
   0xb   : > { %574 = vst [vmem:[#allocation2 + $0x98] sm:$0x3] (!%p498_p2), %v6878_v27  ;;  %576 = vst [vmem:[#allocation2 + $0x10] sm:$0x1] (!%p498_p2), %v6878_v27  ;;  %v6661_v29 = vld [vmem:[%s8479_s4 + $0x68] sm:$0xff] (!%p498_p2)   ;;  %v6663_v31 = vld [vmem:[%s8479_s4 + $0x70] sm:$0xff] (!%p498_p2)  }
   0xc   : > { %577 = vst [vmem:[#allocation2 + $0x20] sm:$0x1] (!%p498_p2), %v6878_v27  ;;  %578 = vst [vmem:[#allocation2 + $0x30] sm:$0x1] (!%p498_p2), %v6878_v27  ;;  %v6662_v30 = vld [vmem:[%s8479_s4 + $0x28] sm:$0xff] (!%p498_p2)   ;;  %v6664_v32 = vld [vmem:[%s8479_s4 + $0x30] sm:$0xff] (!%p498_p2)  }
   0xd   : > { %v6630_v0 = vld [vmem:[%s8496_s28] sm:$0xff] (!%p498_p2)   ;;  %v6631_v2 = vld [vmem:[%s8496_s28 + $0x8] sm:$0xff] (!%p498_p2)   ;;  %v6632_v3 = vld [vmem:[%s8496_s28 + $0x10] sm:$0xff] (!%p498_p2)   ;;  %579 = vst [vmem:[#allocation2 + $0x40] sm:$0x1] (!%p498_p2), %v6878_v27 }
   0xe   : > { %722 = vmatpush1.bf16.msra.mxu0 (!%p498_p2), %v6630_v0  ;;  %v6633_v4 = vld [vmem:[%s8496_s28 + $0x18] sm:$0xff] (!%p498_p2)   ;;  %v6634_v6 = vld [vmem:[%s8496_s28 + $0x20] sm:$0xff] (!%p498_p2)   ;;  %v6635_v7 = vld [vmem:[%s8496_s28 + $0x28] sm:$0xff] (!%p498_p2)   ;;  %580 = vst [vmem:[#allocation2 + $0x50] sm:$0x1] (!%p498_p2), %v6878_v27 }
   0xf   : > { %723 = vmatprep.subr.bf16.mxu0 %v6877_v1  ;;  %s8499_s25 = smov (!%p554_p3, %s4937_s25), 1  ;;  %v6636_v8 = vld [vmem:[%s8496_s28 + $0x30] sm:$0xff]   ;;  %v6637_v9 = vld [vmem:[%s8496_s28 + $0x38] sm:$0xff]   ;;  %v6638_v10 = vld [vmem:[%s8496_s28 + $0x40] sm:$0xff]   ;;  %581 = vst [vmem:[#allocation2 + $0x60] sm:$0x1] %v6878_v27 }
  0x10   : > { %s5310_s30 = sshll.u32 %s8499_s25, 6  ;;  %582 = vst [vmem:[#allocation2 + $0x70] sm:$0x1] %v6878_v27  ;;  %583 = vst [vmem:[#allocation2 + $0x80] sm:$0x1] %v6878_v27  ;;  %v6665_v33 = vld [vmem:[%s8479_s4 + $0x78] sm:$0xff]  }
  0x11   : > { %s6992_s22 = scalar_lea.vmem %s8497_s21, %s5310_s30  ;;  %584 = vst [vmem:[#allocation2 + $0x19] sm:$0x1] %v6878_v27  ;;  %585 = vst [vmem:[#allocation2 + $0x29] sm:$0x1] %v6878_v27  ;;  %v6666_v34 = vld [vmem:[%s8479_s4 + $0x38] sm:$0xff]   ;;  %v6667_v35 = vld [vmem:[%s8479_s4 + $0xc0] sm:$0xff]  }
  0x12   : > { %724 = vmatpush1.bf16.msra.mxu0 %v6631_v2  ;;  %v6641_v5 = vld [vmem:[%s6992_s22 + $0x4] ss:$8 sps:$4 sm:$0xff]   ;;  %v6639_v12 = vld [vmem:[%s6992_s22] ss:$8 sps:$4 sm:$0xff]   ;;  %v6642_v13 = vld [vmem:[%s6992_s22 + $0x14] ss:$8 sps:$4 sm:$0xff]  }
  0x13   : > { %725 = vmatprep.subr.bf16.mxu0 %v6877_v1  ;;  %4965 = vmatprep.mubr.msk.bf16.mxu0 %vm708_vm0, %v6641_v5  ;;  %v6644_v18 = vld [vmem:[%s6992_s22 + $0x10] ss:$8 sps:$4 sm:$0xff]   ;;  %v6645_v19 = vld [vmem:[%s6992_s22 + $0x24] ss:$8 sps:$4 sm:$0xff]   ;;  %v6647_v23 = vld [vmem:[%s6992_s22 + $0x20] ss:$8 sps:$4 sm:$0xff]  }
  0x14   : > { %v6648_v24 = vld [vmem:[%s6992_s22 + $0x34] ss:$8 sps:$4 sm:$0xff]   ;;  %v6650_v25 = vld [vmem:[%s6992_s22 + $0x30] ss:$8 sps:$4 sm:$0xff]   ;;  %586 = vst [vmem:[#allocation2 + $0x39] sm:$0x1] %v6878_v27 }
  0x15   : > { %587 = vst [vmem:[#allocation2 + $0x49] sm:$0x1] %v6878_v27  ;;  %588 = vst [vmem:[#allocation2 + $0x59] sm:$0x1] %v6878_v27  ;;  %v7098_v36 = vld [vmem:[%s8477_s2] ss:$0 sm:$0xff] }
  0x16   : > { %726 = vmatpush1.bf16.msra.mxu0 %v6632_v3  ;;  %589 = vst [vmem:[#allocation2 + $0x69] sm:$0x1] %v6878_v27  ;;  %590 = vst [vmem:[#allocation2 + $0x79] sm:$0x1] %v6878_v27  ;;  %v7103_v38 = vld [vmem:[%s8478_s3] ss:$0 sm:$0xff] }
  0x17   : > { %727 = vmatprep.subr.bf16.mxu0 %v6877_v1  ;;  %591 = vst [vmem:[#allocation2 + $0x89] sm:$0x1] %v6878_v27  ;;  %v844_v45 = vld [vmem:[#allocation2 + $0x1] sm:$0xff]  ;;  %s5311_s18 = sshll.u32 %s8499_s25, 4 }
  0x18   : > { %v6668_v61 = vld [vmem:[%s8479_s4 + $0x80] sm:$0xff]   ;;  %v6669_v0 = vld [vmem:[%s8479_s4 + $0xc8] sm:$0xff]   ;;  %s563_s1 = scalar_lea.vmem %s8489_s14, %s5311_s18  ;;  %s568_s26 = scalar_lea.vmem %s8492_s17, %s5311_s18 }
  0x1a   : > { %728 = vmatpush1.bf16.msra.mxu0 %v6633_v4 }
  0x1b   : > { %729 = vmatprep.subr.bf16.mxu0 %v6877_v1 }
  0x1e   : > { %730 = vmatpush1.bf16.msra.mxu0 %v6634_v6 }
  0x1f   : > { %731 = vmatprep.subr.bf16.mxu0 %v6877_v1 }
  0x22   : > { %732 = vmatpush1.bf16.msra.mxu0 %v6635_v7  ;;  %v6670_v7 = vld [vmem:[%s8479_s4 + $0x88] sm:$0xff]  }
  0x23   : > { %733 = vmatprep.subr.bf16.mxu0 %v6877_v1 }
  0x26   : > { %734 = vmatpush1.bf16.msra.mxu0 %v6636_v8 }
  0x27   : > { %735 = vmatprep.subr.bf16.mxu0 %v6877_v1 }
  0x2a   : > { %736 = vmatpush1.bf16.msra.mxu0 %v6637_v9 }
  0x2b   : > { %737 = vmatprep.subr.bf16.mxu0 %v6877_v1 }
  0x2e   : > { %738 = vmatpush1.bf16.msra.mxu0 %v6638_v10 }
  0x2f   : > { %5313 = vmatprep.subr.bf16.mxu0 %v6651_v11  ;;  %v6671_v11 = vld [vmem:[%s8479_s4 + $0xd0] sm:$0xff]  }
  0x31   : > { %754 = vmatmul.mubr.bf16.vlgmr.msra.gmra.mrb[0].mxu0 %v6639_v12 }
  0x32   : > { %4966 = vmatprep.mubr.msk.bf16.mxu0 %vm708_vm0, %v6642_v13  ;;  %5314 = vmatpush3.bf16.msra.mxu0 %v6652_v14 }
  0x33   : > { %5315 = vmatprep.subr.bf16.mxu0 %v6653_v15 }
  0x36   : > { %5316 = vmatpush3.bf16.msra.mxu0 %v6654_v16  ;;  %v6672_v16 = vld [vmem:[%s8479_s4 + $0x90] sm:$0xff]  }
  0x37   : > { %5317 = vmatprep.subr.bf16.mxu0 %v6655_v17 }
  0x39   : > { %762 = vmatmul.mubr.bf16.gmra.mrb[4].mxu0 %v6644_v18 }
  0x3a   : > { %4967 = vmatprep.mubr.msk.bf16.mxu0 %vm708_vm0, %v6645_v19  ;;  %5318 = vmatpush3.bf16.msra.mxu0 %v6656_v20  ;;  %v6673_v19 = vld [vmem:[%s8479_s4 + $0xd8] sm:$0xff]  }
  0x3b   : > { %5319 = vmatprep.subr.bf16.mxu0 %v6657_v21 }
  0x3e   : > { %5320 = vmatpush3.bf16.msra.mxu0 %v6658_v22 }
  0x3f   : > { %5321 = vmatprep.subr.bf16.mxu0 %v6659_v26  ;;  %v6674_v26 = vld [vmem:[%s8479_s4 + $0x98] sm:$0xff]  }
  0x41   : > { %770 = vmatmul.mubr.bf16.gmra.mrb[8].mxu0 %v6647_v23 }
  0x42   : > { %4968 = vmatprep.mubr.msk.bf16.mxu0 %vm708_vm0, %v6648_v24  ;;  %5322 = vmatpush3.bf16.msra.mxu0 %v6660_v28 }
  0x43   : > { %5323 = vmatprep.subr.bf16.mxu0 %v6661_v29 }
  0x46   : > { %5324 = vmatpush3.bf16.msra.mxu0 %v6662_v30 }
  0x47   : > { %5325 = vmatprep.subr.bf16.mxu0 %v6663_v31  ;;  %v6675_v31 = vld [vmem:[%s8479_s4 + $0xe0] sm:$0xff]  }
  0x49   : > { %778 = vmatmul.mubr.bf16.gmra.mrb[12].mxu0 %v6650_v25 }
  0x4a   : > { %5326 = vmatpush3.bf16.msra.mxu0 %v6664_v32 }
  0x4b   : > { %5327 = vmatprep.subr.bf16.mxu0 %v6665_v33 }
  0x4e   : > { %5328 = vmatpush3.bf16.msra.mxu0 %v6666_v34 }
  0x4f   : > { %5353 = vmatprep.subr.bf16.mxu0 %v6667_v35 }
 0x104   : > { %v755_v37 = vpop.f32.mrb[0].mxu0 }
 0x105   : > { %v793_v39 = vmul.f32 %v7098_v36, %v755_v37  ;;  %v757_v40 = vpop.f32.mrb[1].mxu0  ;;  %v6676_v37 = vld [vmem:[%s8479_s4 + $0xa0] sm:$0xff]  }
 0x106   : > { %v758_v41 = vpop.f32.mrb[2].mxu0  ;;  %v6677_v40 = vld [vmem:[%s8479_s4 + $0xe8] sm:$0xff]  }
 0x107   : > { %v808_v42 = vadd.f32 %v7103_v38, %v793_v39  ;;  %v794_v43 = vmul.f32 %v7098_v36, %v758_v41  ;;  %v760_v44 = vpop.f32.mrb[3].mxu0 }
 0x109   : > { %v7108_v46 = vmax.f32 %v808_v42, 0.0  ;;  %v809_v47 = vadd.f32 %v7103_v38, %v794_v43  ;;  %v6678_v42 = vld [vmem:[%s8479_s4 + $0xa8] sm:$0xff]   ;;  %v6679_v43 = vld [vmem:[%s8479_s4 + $0xf0] sm:$0xff]  }
 0x10b   : > { %824 = vst [vmem:[#allocation2 + $0x11] sm:$0xff] %v7108_v46  ;;  %v7112_v48 = vmax.f32 %v809_v47, 0.0  ;;  %v852_v49 = vpack.c.bf16 %v7108_v46, %v844_v45  ;;  %v6680_v47 = vld [vmem:[%s8479_s4 + $0xb0] sm:$0xff]  }
 0x10c   : > { %v763_v50 = vpop.f32.mrb[4].mxu0 }
 0x10d   : > { %825 = vst [vmem:[#allocation2 + $0x21] sm:$0xff] %v7112_v48  ;;  %v795_v51 = vmul.f32 %v7098_v36, %v763_v50  ;;  %v765_v52 = vpop.f32.mrb[5].mxu0  ;;  %1549 = vmatprep.mubr.bf16.mxu0 %v852_v49  ;;  %v888_v53 = vpack.c.bf16 %v7112_v48, %v7108_v46  ;;  %v6681_v50 = vld [vmem:[%s8479_s4 + $0xf8] sm:$0xff]  }
 0x10e   : > { %v766_v54 = vpop.f32.mrb[6].mxu0  ;;  %v6682_v52 = vld [vmem:[%s8479_s4 + $0xb8] sm:$0xff]  }
 0x10f   : > { %v810_v55 = vadd.f32 %v7103_v38, %v795_v51  ;;  %v796_v56 = vmul.f32 %v7098_v36, %v766_v54  ;;  %v768_v57 = vpop.f32.mrb[7].mxu0  ;;  %v6683_v54 = vld [vmem:[%s8479_s4 + $0x140] sm:$0xff]   ;;  %v6705_v46 = vld [vmem:[%s8479_s4 + $0x1d8] sm:$0xff]  }
 0x110   : > { %v6684_v57 = vld [vmem:[%s8479_s4 + $0x100] sm:$0xff]  }
 0x111   : > { %v7121_v58 = vmax.f32 %v810_v55, 0.0  ;;  %v811_v59 = vadd.f32 %v7103_v38, %v796_v56  ;;  %v856_v55 = vld [vmem:[#allocation2 + $0x2] sm:$0xff] }
 0x112   : > { %v7124_v60 = vld [vmem:[#allocation2 + $0x10] sm:$0xff] }
 0x113   : > { %826 = vst [vmem:[#allocation2 + $0x31] sm:$0xff] %v7121_v58  ;;  %v7130_v62 = vmax.f32 %v811_v59, 0.0  ;;  %v840_v63 = vpack.c.bf16 %v7124_v60, %v6878_v27  ;;  %v7139_v1 = vpack.c.bf16 %v7121_v58, %v7112_v48  ;;  %v857_v56 = vld [vmem:[#allocation2 + $0x12] sm:$0xff] }
 0x114   : > { %v771_v2 = vpop.f32.mrb[8].mxu0  ;;  %v834_v14 = vld [vmem:[#allocation2 + $0x20] sm:$0xff]  ;;  %v864_v59 = vpack.c.bf16 %v857_v56, %v856_v55 }
 0x115   : > { %827 = vst [vmem:[#allocation2 + $0x41] sm:$0xff] %v7130_v62  ;;  %v797_v3 = vmul.f32 %v7098_v36, %v771_v2  ;;  %v773_v4 = vpop.f32.mrb[9].mxu0  ;;  %1550 = vmatmul.mubr.bf16.vlgmr.msra.gmra.mrb[16].mxu0 %v840_v63  ;;  %v889_v5 = vpack.c.bf16 %v7130_v62, %v7121_v58  ;;  %v876_v51 = vpack.c.bf16 %v834_v14, %v7124_v60  ;;  %v6685_v60 = vld [vmem:[%s8479_s4 + $0x148] sm:$0xff]  }
 0x116   : > { %v774_v6 = vpop.f32.mrb[10].mxu0  ;;  %5354 = vmatpush3.bf16.msra.mxu0 %v6668_v61  ;;  %1557 = vmatprep.mubr.bf16.mxu0 %v7139_v1  ;;  %v6686_v63 = vld [vmem:[%s8479_s4 + $0x108] sm:$0xff]   ;;  %v6688_v4 = vld [vmem:[%s8479_s4 + $0x110] sm:$0xff]  }
 0x117   : > { %v812_v8 = vadd.f32 %v7103_v38, %v797_v3  ;;  %v798_v9 = vmul.f32 %v7098_v36, %v774_v6  ;;  %v776_v10 = vpop.f32.mrb[11].mxu0  ;;  %5355 = vmatprep.subr.bf16.mxu0 %v6669_v0  ;;  %v6687_v0 = vld [vmem:[%s8479_s4 + $0x150] sm:$0xff]   ;;  %v858_v3 = vld [vmem:[#allocation2 + $0x22] sm:$0xff] }
 0x118   : > { %v6691_v10 = vld [vmem:[%s8479_s4 + $0x160] sm:$0xff]   ;;  %v6709_v58 = vld [vmem:[%s8479_s4 + $0x1e8] sm:$0xff]  }
 0x119   : > { %v7154_v12 = vmax.f32 %v812_v8, 0.0  ;;  %v813_v13 = vadd.f32 %v7103_v38, %v798_v9  ;;  %v6690_v9 = vld [vmem:[%s8479_s4 + $0x118] sm:$0xff]  }
 0x11a   : > { %5356 = vmatpush3.bf16.msra.mxu0 %v6670_v7  ;;  %v7157_v15 = vld [vmem:[#allocation2 + $0x30] sm:$0xff]  ;;  %v6689_v7 = vld [vmem:[%s8479_s4 + $0x158] sm:$0xff]  }
 0x11b   : > { %828 = vst [vmem:[#allocation2 + $0x51] sm:$0xff] %v7154_v12  ;;  %v7163_v17 = vmax.f32 %v813_v13, 0.0  ;;  %5357 = vmatprep.subr.bf16.mxu0 %v6671_v11  ;;  %v7166_v18 = vpack.c.bf16 %v7157_v15, %v834_v14  ;;  %v7173_v20 = vpack.c.bf16 %v7154_v12, %v7130_v62  ;;  %v859_v2 = vld [vmem:[#allocation2 + $0x32] sm:$0xff] }
 0x11c   : > { %v779_v21 = vpop.f32.mrb[12].mxu0  ;;  %v836_v34 = vld [vmem:[#allocation2 + $0x40] sm:$0xff]  ;;  %v7250_v6 = vpack.c.bf16 %v859_v2, %v858_v3 }
 0x11d   : > { %829 = vst [vmem:[#allocation2 + $0x61] sm:$0xff] %v7163_v17  ;;  %v799_v22 = vmul.f32 %v7098_v36, %v779_v21  ;;  %v781_v23 = vpop.f32.mrb[13].mxu0  ;;  %1558 = vmatmul.mubr.bf16.gmra.mrb[20].mxu0 %v7166_v18  ;;  %v890_v24 = vpack.c.bf16 %v7163_v17, %v7154_v12  ;;  %v877_v61 = vpack.c.bf16 %v836_v34, %v7157_v15  ;;  %v860_v14 = vld [vmem:[#allocation2 + $0x42] sm:$0xff]  ;;  %v6713_v12 = vld [vmem:[%s8479_s4 + $0x1f8] sm:$0xff]  }
 0x11e   : > { %v782_v25 = vpop.f32.mrb[14].mxu0  ;;  %5358 = vmatpush3.bf16.msra.mxu0 %v6672_v16  ;;  %1565 = vmatprep.mubr.bf16.mxu0 %v7173_v20  ;;  %v6692_v15 = vld [vmem:[%s8479_s4 + $0x120] sm:$0xff]   ;;  %v6695_v23 = vld [vmem:[%s8479_s4 + $0x170] sm:$0xff]  }
 0x11f   : > { %v814_v28 = vadd.f32 %v7103_v38, %v799_v22  ;;  %v800_v29 = vmul.f32 %v7098_v36, %v782_v25  ;;  %v784_v30 = vpop.f32.mrb[15].mxu0  ;;  %5359 = vmatprep.subr.bf16.mxu0 %v6673_v19  ;;  %v6693_v19 = vld [vmem:[%s8479_s4 + $0x168] sm:$0xff]  }
 0x120   : > { %v6694_v22 = vld [vmem:[%s8479_s4 + $0x128] sm:$0xff]   ;;  %v6697_v30 = vld [vmem:[%s8479_s4 + $0x178] sm:$0xff]  }
 0x121   : > { %v7189_v32 = vmax.f32 %v814_v28, 0.0  ;;  %v815_v33 = vadd.f32 %v7103_v38, %v800_v29  ;;  %v6696_v28 = vld [vmem:[%s8479_s4 + $0x130] sm:$0xff]  }
 0x122   : > { %5360 = vmatpush3.bf16.msra.mxu0 %v6674_v26  ;;  %v837_v35 = vld [vmem:[#allocation2 + $0x50] sm:$0xff] }
 0x123   : > { %830 = vst [vmem:[#allocation2 + $0x71] sm:$0xff] %v7189_v32  ;;  %v7196_v36 = vmax.f32 %v815_v33, 0.0  ;;  %5361 = vmatprep.subr.bf16.mxu0 %v6675_v31  ;;  %v7198_v39 = vpack.c.bf16 %v837_v35, %v836_v34  ;;  %v7205_v38 = vpack.c.bf16 %v7189_v32, %v7163_v17  ;;  %v861_v11 = vld [vmem:[#allocation2 + $0x52] sm:$0xff]  ;;  %v900_v31 = vpack.c.bf16 %v858_v3, %v857_v56  ;;  %v6699_v34 = vld [vmem:[%s8479_s4 + $0x1c0] sm:$0xff]   ;;  %v6731_v3 = vld [vmem:[%s8482_s7 + $0x88] sm:$0xff]  }
 0x124   : > { %v838_v44 = vld [vmem:[#allocation2 + $0x60] sm:$0xff]  ;;  %v7267_v16 = vpack.c.bf16 %v861_v11, %v860_v14  ;;  %v6698_v33 = vld [vmem:[%s8479_s4 + $0x138] sm:$0xff]  }
 0x125   : > { %831 = vst [vmem:[#allocation2 + $0x81] sm:$0xff] %v7196_v36  ;;  %1566 = vmatmul.mubr.bf16.gmra.mrb[24].mxu0 %v7198_v39  ;;  %v891_v41 = vpack.c.bf16 %v7196_v36, %v7189_v32  ;;  %v878_v8 = vpack.c.bf16 %v838_v44, %v837_v35  ;;  %v862_v26 = vld [vmem:[#allocation2 + $0x62] sm:$0xff]  ;;  %v6714_v17 = vld [vmem:[%s8479_s4 + $0x1b8] sm:$0xff]  }
 0x126   : > { %5362 = vmatpush3.bf16.msra.mxu0 %v6676_v37  ;;  %1573 = vmatprep.mubr.bf16.mxu0 %v7205_v38  ;;  %v6700_v35 = vld [vmem:[%s8479_s4 + $0x180] sm:$0xff]   ;;  %v6701_v37 = vld [vmem:[%s8479_s4 + $0x1c8] sm:$0xff]   ;;  %v902_v48 = vpack.c.bf16 %v862_v26, %v861_v11  ;;  %v6718_v32 = vld [vmem:[%s8479_s4 + $0x218] sm:$0xff]  }
 0x127   : > { %5363 = vmatprep.subr.bf16.mxu0 %v6677_v40  ;;  %v901_v40 = vpack.c.bf16 %v860_v14, %v859_v2  ;;  %v6722_v56 = vld [vmem:[%s8479_s4 + $0x238] sm:$0xff]   ;;  %v6730_v2 = vld [vmem:[%s8482_s7 + $0x50] sm:$0xff]  }
 0x12a   : > { %5364 = vmatpush3.bf16.msra.mxu0 %v6678_v42  ;;  %v839_v45 = vld [vmem:[#allocation2 + $0x70] sm:$0xff]  ;;  %v6702_v42 = vld [vmem:[%s8479_s4 + $0x188] sm:$0xff]  }
 0x12b   : > { %5365 = vmatprep.subr.bf16.mxu0 %v6679_v43  ;;  %v7221_v49 = vpack.c.bf16 %v839_v45, %v838_v44  ;;  %v863_v25 = vld [vmem:[#allocation2 + $0x72] sm:$0xff] }
 0x12c   : > { %v7262_v13 = vld [vmem:[#allocation2 + $0x80] sm:$0xff]  ;;  %v7283_v29 = vpack.c.bf16 %v863_v25, %v862_v26  ;;  %v6703_v43 = vld [vmem:[%s8479_s4 + $0x1d0] sm:$0xff]   ;;  %v6742_v26 = vld [vmem:[%s8482_s7 + $0x68] sm:$0xff]  }
 0x12d   : > { %1574 = vmatmul.mubr.bf16.gmra.mrb[28].mxu0 %v7221_v49  ;;  %v879_v21 = vpack.c.bf16 %v7262_v13, %v839_v45  ;;  %v6704_v44 = vld [vmem:[%s8479_s4 + $0x190] sm:$0xff]   ;;  %v6707_v45 = vld [vmem:[%s8479_s4 + $0x1e0] sm:$0xff]  }
 0x12e   : > { %5366 = vmatpush3.bf16.msra.mxu0 %v6680_v47  ;;  %1614 = vmatprep.mubr.bf16.mxu0 %v876_v51  ;;  %v899_v47 = vld [vmem:[#allocation2 + $0x82] sm:$0xff]  ;;  %v6711_v51 = vld [vmem:[%s8479_s4 + $0x1f0] sm:$0xff]  }
 0x12f   : > { %5367 = vmatprep.subr.bf16.mxu0 %v6681_v50  ;;  %v6708_v50 = vld [vmem:[%s8479_s4 + $0x1a0] sm:$0xff]   ;;  %v903_v62 = vpack.c.bf16 %v899_v47, %v863_v25 }
 0x130   : > { %v6741_v25 = vld [vmem:[%s8482_s7 + $0xe0] sm:$0xff]  }
 0x132   : > { %5368 = vmatpush3.bf16.msra.mxu0 %v6682_v52  ;;  %v6712_v52 = vld [vmem:[%s8479_s4 + $0x1b0] sm:$0xff]  }
 0x133   : > { %5393 = vmatprep.subr.bf16.mxu0 %v6683_v54  ;;  %v6716_v54 = vld [vmem:[%s8479_s4 + $0x208] sm:$0xff]  }
 0x135   : > { %1615 = vmatmul.mubr.bf16.vlgmr.msra.gmra.mrb[32].mxu0 %v864_v59  ;;  %v6725_v59 = vld [vmem:[%s8482_s7 + $0xc0] sm:$0xff]  }
 0x136   : > { %5394 = vmatpush3.bf16.msra.mxu0 %v6684_v57  ;;  %1622 = vmatprep.mubr.bf16.mxu0 %v877_v61  ;;  %v6724_v57 = vld [vmem:[%s8482_s7] sm:$0xff]  }
 0x137   : > { %5395 = vmatprep.subr.bf16.mxu0 %v6685_v60  ;;  %v6726_v60 = vld [vmem:[%s8482_s7 + $0x48] sm:$0xff]   ;;  %v6727_v61 = vld [vmem:[%s8482_s7 + $0x80] sm:$0xff]  }
 0x13a   : > { %5396 = vmatpush3.bf16.msra.mxu0 %v6686_v63  ;;  %v6728_v63 = vld [vmem:[%s8482_s7 + $0x8] sm:$0xff]  }
 0x13b   : > { %5397 = vmatprep.subr.bf16.mxu0 %v6687_v0  ;;  %v6729_v0 = vld [vmem:[%s8482_s7 + $0xc8] sm:$0xff]  }
 0x13d   : > { %1623 = vmatmul.mubr.bf16.gmra.mrb[36].mxu0 %v7250_v6 }
 0x13e   : > { %5398 = vmatpush3.bf16.msra.mxu0 %v6688_v4  ;;  %1630 = vmatprep.mubr.bf16.mxu0 %v878_v8  ;;  %v6732_v4 = vld [vmem:[%s8482_s7 + $0x10] sm:$0xff]  }
 0x13f   : > { %5399 = vmatprep.subr.bf16.mxu0 %v6689_v7  ;;  %v6734_v7 = vld [vmem:[%s8482_s7 + $0x58] sm:$0xff]   ;;  %v6735_v8 = vld [vmem:[%s8482_s7 + $0x90] sm:$0xff]  }
 0x142   : > { %5400 = vmatpush3.bf16.msra.mxu0 %v6690_v9  ;;  %v6736_v9 = vld [vmem:[%s8482_s7 + $0x18] sm:$0xff]  }
 0x143   : > { %5401 = vmatprep.subr.bf16.mxu0 %v6691_v10 }
 0x145   : > { %1631 = vmatmul.mubr.bf16.gmra.mrb[40].mxu0 %v7267_v16 }
 0x146   : > { %5402 = vmatpush3.bf16.msra.mxu0 %v6692_v15  ;;  %1638 = vmatprep.mubr.bf16.mxu0 %v879_v21 }
 0x147   : > { %5403 = vmatprep.subr.bf16.mxu0 %v6693_v19  ;;  %v6739_v19 = vld [vmem:[%s8482_s7 + $0x98] sm:$0xff]  }
 0x14a   : > { %5404 = vmatpush3.bf16.msra.mxu0 %v6694_v22  ;;  %v6740_v22 = vld [vmem:[%s8482_s7 + $0x20] sm:$0xff]  }
 0x14b   : > { %5405 = vmatprep.subr.bf16.mxu0 %v6695_v23 }
 0x14d   : > { %1639 = vmatmul.mubr.bf16.gmra.mrb[44].mxu0 %v7283_v29 }
 0x14e   : > { %5406 = vmatpush3.bf16.msra.mxu0 %v6696_v28  ;;  %1679 = vmatprep.mubr.bf16.mxu0 %v900_v31  ;;  %v6743_v28 = vld [vmem:[%s8482_s7 + $0xa0] sm:$0xff]  }
 0x14f   : > { %5407 = vmatprep.subr.bf16.mxu0 %v6697_v30 }
 0x152   : > { %5408 = vmatpush3.bf16.msra.mxu0 %v6698_v33  ;;  %v6745_v33 = vld [vmem:[%s8482_s7 + $0xe8] sm:$0xff]  }
 0x153   : > { %5433 = vmatprep.subr.bf16.mxu0 %v6699_v34 }
 0x155   : > { %1680 = vmatmul.mubr.bf16.vlgmr.msra.gmra.mrb[48].mxu0 %v888_v53  ;;  %v6706_v53 = vld [vmem:[%s8479_s4 + $0x198] sm:$0xff]  }
 0x156   : > { %5434 = vmatpush3.bf16.msra.mxu0 %v6700_v35  ;;  %1687 = vmatprep.mubr.bf16.mxu0 %v901_v40  ;;  %v6747_v40 = vld [vmem:[%s8482_s7 + $0xa8] sm:$0xff]  }
 0x157   : > { %5435 = vmatprep.subr.bf16.mxu0 %v6701_v37  ;;  %v6746_v37 = vld [vmem:[%s8482_s7 + $0x70] sm:$0xff]  }
 0x15a   : > { %5436 = vmatpush3.bf16.msra.mxu0 %v6702_v42 }
 0x15b   : > { %5437 = vmatprep.subr.bf16.mxu0 %v6703_v43  ;;  %v6748_v43 = vld [vmem:[%s8482_s7 + $0x30] sm:$0xff]  }
 0x15d   : > { %1688 = vmatmul.mubr.bf16.gmra.mrb[52].mxu0 %v889_v5  ;;  %v6710_v5 = vld [vmem:[%s8479_s4 + $0x1a8] sm:$0xff]  }
 0x15e   : > { %5438 = vmatpush3.bf16.msra.mxu0 %v6704_v44  ;;  %1695 = vmatprep.mubr.bf16.mxu0 %v902_v48  ;;  %v6750_v48 = vld [vmem:[%s8482_s7 + $0x78] sm:$0xff]  }
 0x15f   : > { %5439 = vmatprep.subr.bf16.mxu0 %v6705_v46  ;;  %v6749_v46 = vld [vmem:[%s8482_s7 + $0xf0] sm:$0xff]  }
 0x162   : > { %5440 = vmatpush3.bf16.msra.mxu0 %v6706_v53  ;;  %v6751_v53 = vld [vmem:[%s8482_s7 + $0xb0] sm:$0xff]  }
 0x163   : > { %5441 = vmatprep.subr.bf16.mxu0 %v6707_v45  ;;  %v6752_v45 = vld [vmem:[%s8482_s7 + $0x38] sm:$0xff]  }
 0x165   : > { %1696 = vmatmul.mubr.bf16.gmra.mrb[56].mxu0 %v890_v24  ;;  %v6715_v24 = vld [vmem:[%s8479_s4 + $0x200] sm:$0xff]  }
 0x166   : > { %5442 = vmatpush3.bf16.msra.mxu0 %v6708_v50  ;;  %1703 = vmatprep.mubr.bf16.mxu0 %v903_v62 }
 0x167   : > { %5443 = vmatprep.subr.bf16.mxu0 %v6709_v58  ;;  %v6753_v58 = vld [vmem:[%s8482_s7 + $0xf8] sm:$0xff]  }
 0x16a   : > { %5444 = vmatpush3.bf16.msra.mxu0 %v6710_v5 }
 0x16b   : > { %5445 = vmatprep.subr.bf16.mxu0 %v6711_v51  ;;  %v6754_v51 = vld [vmem:[%s8482_s7 + $0xb8] sm:$0xff]  }
 0x16d   : > { %1704 = vmatmul.mubr.bf16.gmra.mrb[60].mxu0 %v891_v41  ;;  %v6720_v41 = vld [vmem:[%s8479_s4 + $0x228] sm:$0xff]  }
 0x16e   : > { %5446 = vmatpush3.bf16.msra.mxu0 %v6712_v52  ;;  %1744 = vmatprep.mubr.bf16.mxu0 %v7139_v1  ;;  %v6717_v1 = vld [vmem:[%s8479_s4 + $0x210] sm:$0xff]   ;;  %v6755_v52 = vld [vmem:[%s8482_s7 + $0x140] sm:$0xff]  }
 0x16f   : > { %5447 = vmatprep.subr.bf16.mxu0 %v6713_v12 }
 0x172   : > { %5448 = vmatpush3.bf16.msra.mxu0 %v6714_v17 }
 0x173   : > { %5979 = vmatprep.subr.bf16.mxu0 %v6715_v24 }
 0x175   : > { %1745 = vmatmul.mubr.bf16.vlgmr.msra.gmra.mrb[64].mxu0 %v7166_v18  ;;  %v6719_v18 = vld [vmem:[%s8479_s4 + $0x220] sm:$0xff]  }
 0x176   : > { %5980 = vmatpush3.bf16.msra.mxu0 %v6715_v24  ;;  %1752 = vmatprep.mubr.bf16.mxu0 %v7173_v20  ;;  %v924_v20 = vld [vmem:[#allocation2 + $0x91] sm:$0xff]  ;;  %v6757_v24 = vld [vmem:[%s8482_s7 + $0x1c0] sm:$0xff]  }
 0x177   : > { %5981 = vmatprep.subr.bf16.mxu0 %v6716_v54  ;;  %v928_v55 = vpack.c.bf16 %v924_v20, %v7196_v36  ;;  %v936_v36 = vld [vmem:[#allocation2 + $0x92] sm:$0xff] }
 0x17a   : > { %5982 = vmatpush3.bf16.msra.mxu0 %v6716_v54 }
 0x17b   : > { %5983 = vmatprep.subr.bf16.mxu0 %v6717_v1 }
 0x17d   : > { %1753 = vmatmul.mubr.bf16.gmra.mrb[68].mxu0 %v7198_v39  ;;  %v6721_v39 = vld [vmem:[%s8479_s4 + $0x230] sm:$0xff]  }
 0x17e   : > { %5984 = vmatpush3.bf16.msra.mxu0 %v6717_v1  ;;  %1760 = vmatprep.mubr.bf16.mxu0 %v7205_v38  ;;  %v916_v38 = vpack.c.bf16 %v6878_v27, %v7262_v13  ;;  %v6723_v27 = vld [vmem:[%s8482_s7 + $0x40] sm:$0xff]   ;;  %v6737_v13 = vld [vmem:[%s8482_s7 + $0xd8] sm:$0xff]  }
 0x17f   : > { %5985 = vmatprep.subr.bf16.mxu0 %v6718_v32  ;;  %5485 = vmatprep.subr.bf16.mxu1 %v6723_v27 }
 0x180   : > { %5486 = vmatpush3.bf16.msra.mxu1 %v6724_v57 }
 0x181   : > { %5487 = vmatprep.subr.bf16.mxu1 %v6726_v60 }
 0x182   : > { %5986 = vmatpush3.bf16.msra.mxu0 %v6718_v32 }
 0x183   : > { %5987 = vmatprep.subr.bf16.mxu0 %v6719_v18 }
 0x184   : > { %5488 = vmatpush3.bf16.msra.mxu1 %v6728_v63 }
 0x185   : > { %1761 = vmatmul.mubr.bf16.gmra.mrb[72].mxu0 %v7221_v49  ;;  %v940_v49 = vpack.c.bf16 %v936_v36, %v899_v47  ;;  %5489 = vmatprep.subr.bf16.mxu1 %v6730_v2 }
 0x186   : > { %5988 = vmatpush3.bf16.msra.mxu0 %v6719_v18  ;;  %1768 = vmatprep.mubr.bf16.mxu0 %v928_v55 }
 0x187   : > { %5989 = vmatprep.subr.bf16.mxu0 %v6720_v41 }
 0x188   : > { %5490 = vmatpush3.bf16.msra.mxu1 %v6732_v4 }
 0x189   : > { %5491 = vmatprep.subr.bf16.mxu1 %v6734_v7 }
 0x18a   : > { %5990 = vmatpush3.bf16.msra.mxu0 %v6720_v41 }
 0x18b   : > { %5991 = vmatprep.subr.bf16.mxu0 %v6721_v39 }
 0x18c   : > { %5492 = vmatpush3.bf16.msra.mxu1 %v6736_v9 }
 0x18d   : > { %1769 = vmatmul.mubr.bf16.gmra.mrb[76].mxu0 %v916_v38 }
 0x18e   : > { %5992 = vmatpush3.bf16.msra.mxu0 %v6721_v39  ;;  %5995 = vmatprep.mubr.bf16.mxu0 %v7250_v6  ;;  %v6733_v6 = vld [vmem:[%s8482_s7 + $0xd0] sm:$0xff]  }
 0x18f   : > { %5993 = vmatprep.subr.bf16.mxu0 %v6722_v56 }
 0x192   : > { %5994 = vmatpush3.bf16.msra.mxu0 %v6722_v56 }
 0x193   : > { %5525 = vmatprep.subr.bf16.mxu0 %v6725_v59 }
 0x195   : > { %5996 = vmatmul.mubr.bf16.vlgmr.msra.gmra.mrb[80].mxu0 %v7267_v16  ;;  %v6738_v16 = vld [vmem:[%s8482_s7 + $0x60] sm:$0xff]  }
 0x196   : > { %5999 = vmatprep.mubr.bf16.mxu0 %v7283_v29  ;;  %5526 = vmatpush3.bf16.msra.mxu0 %v6727_v61  ;;  %v6744_v29 = vld [vmem:[%s8482_s7 + $0x28] sm:$0xff]  }
 0x197   : > { %5527 = vmatprep.subr.bf16.mxu0 %v6729_v0  ;;  %5493 = vmatprep.subr.bf16.mxu1 %v6738_v16 }
 0x198   : > { %5494 = vmatpush3.bf16.msra.mxu1 %v6740_v22 }
 0x199   : > { %5495 = vmatprep.subr.bf16.mxu1 %v6742_v26 }
 0x19a   : > { %5528 = vmatpush3.bf16.msra.mxu0 %v6731_v3 }
 0x19b   : > { %5529 = vmatprep.subr.bf16.mxu0 %v6733_v6 }
 0x19c   : > { %5496 = vmatpush3.bf16.msra.mxu1 %v6744_v29 }
 0x19d   : > { %6000 = vmatmul.mubr.bf16.gmra.mrb[84].mxu0 %v940_v49  ;;  %5497 = vmatprep.subr.bf16.mxu1 %v6746_v37 }
 0x19e   : > { %5530 = vmatpush3.bf16.msra.mxu0 %v6735_v8 }
 0x19f   : > { %5531 = vmatprep.subr.bf16.mxu0 %v6737_v13 }
 0x1a0   : > { %5498 = vmatpush3.bf16.msra.mxu1 %v6748_v43 }
 0x1a1   : > { %5499 = vmatprep.subr.bf16.mxu1 %v6750_v48 }
 0x1a2   : > { %5532 = vmatpush3.bf16.msra.mxu0 %v6739_v19 }
 0x1a3   : > { %5533 = vmatprep.subr.bf16.mxu0 %v6741_v25 }
 0x1a4   : > { %5500 = vmatpush3.bf16.msra.mxu1 %v6752_v45 }
 0x1a5   : > { %5565 = vmatprep.subr.bf16.mxu1 %v6755_v52 }
 0x1a6   : > { %5534 = vmatpush3.bf16.msra.mxu0 %v6743_v28 }
 0x1a7   : > { %5535 = vmatprep.subr.bf16.mxu0 %v6745_v33 }
 0x1aa   : > { %5536 = vmatpush3.bf16.msra.mxu0 %v6747_v40 }
 0x1ab   : > { %5537 = vmatprep.subr.bf16.mxu0 %v6749_v46 }
 0x1ae   : > { %5538 = vmatpush3.bf16.msra.mxu0 %v6751_v53 }
 0x1af   : > { %5539 = vmatprep.subr.bf16.mxu0 %v6753_v58 }
 0x1b2   : > { %5540 = vmatpush3.bf16.msra.mxu0 %v6754_v51 }
 0x1b3   : > { %5605 = vmatprep.subr.bf16.mxu0 %v6757_v24 }
 0x1e8   : > { %v5329_v10 = vpop.f32.mrb[16].mxu0 }
 0x1e9   : > { %v5330_v11 = vpop.f32.mrb[17].mxu0 }
 0x1ea   : > { %v7433_v14 = vadd.f32 %v5330_v11, %v5329_v10  ;;  %v5332_v15 = vpop.f32.mrb[18].mxu0 }
 0x1eb   : > { %v5333_v21 = vpop.f32.mrb[19].mxu0 }
 0x1ec   : > { %v5334_v23 = vadd.f32 %v5333_v21, %v5332_v15 }
 0x1f0   : > { %v5335_v30 = vpop.f32.mrb[20].mxu0 }
 0x1f1   : > { %v5336_v31 = vpop.f32.mrb[21].mxu0 }
 0x1f2   : > { %v5337_v34 = vadd.f32 %v5336_v31, %v5335_v30  ;;  %v5338_v35 = vpop.f32.mrb[22].mxu0 }
 0x1f3   : > { %v5339_v42 = vpop.f32.mrb[23].mxu0 }
 0x1f4   : > { %v5340_v44 = vadd.f32 %v5339_v42, %v5338_v35 }
 0x1f8   : > { %v5341_v47 = vpop.f32.mrb[24].mxu0 }
 0x1f9   : > { %v5342_v50 = vpop.f32.mrb[25].mxu0 }
 0x1fa   : > { %v5343_v62 = vadd.f32 %v5342_v50, %v5341_v47  ;;  %v5344_v5 = vpop.f32.mrb[26].mxu0 }
 0x1fb   : > { %v5345_v12 = vpop.f32.mrb[27].mxu0 }
 0x1fc   : > { %v5346_v17 = vadd.f32 %v5345_v12, %v5344_v5 }
 0x200   : > { %v5347_v54 = vpop.f32.mrb[28].mxu0 }
 0x201   : > { %v5348_v1 = vpop.f32.mrb[29].mxu0 }
 0x202   : > { %v5349_v32 = vadd.f32 %v5348_v1, %v5347_v54  ;;  %v5350_v18 = vpop.f32.mrb[30].mxu0 }
 0x203   : > { %v5351_v20 = vpop.f32.mrb[31].mxu0 }
 0x204   : > { %v5352_v41 = vadd.f32 %v5351_v20, %v5350_v18 }
 0x208   : > { %v5369_v55 = vpop.f32.mrb[32].mxu0 }
 0x209   : > { %v5370_v39 = vpop.f32.mrb[33].mxu0 }
 0x20a   : > { %v5371_v38 = vadd.f32 %v5370_v39, %v5369_v55  ;;  %v5372_v56 = vpop.f32.mrb[34].mxu0 }
 0x20b   : > { %v5373_v36 = vpop.f32.mrb[35].mxu0 }
 0x20c   : > { %v1617_v49 = vadd.f32 %v5371_v38, %v7433_v14  ;;  %v5374_v27 = vadd.f32 %v5373_v36, %v5372_v56 }
 0x20e   : > { %v1620_v57 = vadd.f32 %v5374_v27, %v5334_v23 }
 0x210   : > { %v5375_v59 = vpop.f32.mrb[36].mxu0 }
 0x211   : > { %v5376_v60 = vpop.f32.mrb[37].mxu0 }
 0x212   : > { %v5377_v61 = vadd.f32 %v5376_v60, %v5375_v59  ;;  %v5378_v63 = vpop.f32.mrb[38].mxu0 }
 0x213   : > { %v5379_v0 = vpop.f32.mrb[39].mxu0 }
 0x214   : > { %v1625_v2 = vadd.f32 %v5377_v61, %v5337_v34  ;;  %v5380_v3 = vadd.f32 %v5379_v0, %v5378_v63 }
 0x216   : > { %v1628_v4 = vadd.f32 %v5380_v3, %v5340_v44 }
 0x218   : > { %v5381_v6 = vpop.f32.mrb[40].mxu0 }
 0x219   : > { %v5382_v7 = vpop.f32.mrb[41].mxu0 }
 0x21a   : > { %v5383_v8 = vadd.f32 %v5382_v7, %v5381_v6  ;;  %v5384_v9 = vpop.f32.mrb[42].mxu0 }
 0x21b   : > { %v5385_v10 = vpop.f32.mrb[43].mxu0 }
 0x21c   : > { %v1633_v11 = vadd.f32 %v5383_v8, %v5343_v62  ;;  %v5386_v13 = vadd.f32 %v5385_v10, %v5384_v9 }
 0x21e   : > { %v1636_v15 = vadd.f32 %v5386_v13, %v5346_v17 }
 0x220   : > { %v5387_v16 = vpop.f32.mrb[44].mxu0 }
 0x221   : > { %v5388_v14 = vpop.f32.mrb[45].mxu0 }
 0x222   : > { %v5389_v19 = vadd.f32 %v5388_v14, %v5387_v16  ;;  %v5390_v21 = vpop.f32.mrb[46].mxu0 }
 0x223   : > { %v5391_v22 = vpop.f32.mrb[47].mxu0 }
 0x224   : > { %v1641_v23 = vadd.f32 %v5389_v19, %v5349_v32  ;;  %v5392_v25 = vadd.f32 %v5391_v22, %v5390_v21 }
 0x226   : > { %v1644_v26 = vadd.f32 %v5392_v25, %v5352_v41 }
 0x228   : > { %v5409_v28 = vpop.f32.mrb[48].mxu0 }
 0x229   : > { %v5410_v29 = vpop.f32.mrb[49].mxu0 }
 0x22a   : > { %v5411_v30 = vadd.f32 %v5410_v29, %v5409_v28  ;;  %v5412_v31 = vpop.f32.mrb[50].mxu0  ;;  %v5043_v29 = vld [vmem:[%s8480_s5] ss:$0 sm:$0xff] }
 0x22b   : > { %v5413_v33 = vpop.f32.mrb[51].mxu0 }
 0x22c   : > { %v1682_v34 = vadd.f32 %v5411_v30, %v1617_v49  ;;  %v5414_v35 = vadd.f32 %v5413_v33, %v5412_v31  ;;  %v5044_v33 = vld [vmem:[%s8481_s6] ss:$0 sm:$0xff] }
 0x22e   : > { %v1685_v37 = vadd.f32 %v5414_v35, %v1620_v57 }
 0x230   : > { %v5415_v40 = vpop.f32.mrb[52].mxu0 }
 0x231   : > { %v5416_v42 = vpop.f32.mrb[53].mxu0 }
 0x232   : > { %v5417_v43 = vadd.f32 %v5416_v42, %v5415_v40  ;;  %v5418_v44 = vpop.f32.mrb[54].mxu0 }
 0x233   : > { %v5419_v46 = vpop.f32.mrb[55].mxu0 }
 0x234   : > { %v1690_v48 = vadd.f32 %v5417_v43, %v1625_v2  ;;  %v5420_v53 = vadd.f32 %v5419_v46, %v5418_v44 }
 0x236   : > { %v1693_v45 = vadd.f32 %v5420_v53, %v1628_v4 }
 0x238   : > { %v5421_v47 = vpop.f32.mrb[56].mxu0 }
 0x239   : > { %v5422_v50 = vpop.f32.mrb[57].mxu0 }
 0x23a   : > { %v5423_v58 = vadd.f32 %v5422_v50, %v5421_v47  ;;  %v5424_v62 = vpop.f32.mrb[58].mxu0 }
 0x23b   : > { %v5425_v5 = vpop.f32.mrb[59].mxu0 }
 0x23c   : > { %v1698_v51 = vadd.f32 %v5423_v58, %v1633_v11  ;;  %v5426_v52 = vadd.f32 %v5425_v5, %v5424_v62  ;;  %v1900_v58 = vld [vmem:[#allocation2 + $0x1] sm:$0xff] }
 0x23e   : > { %v1701_v12 = vadd.f32 %v5426_v52, %v1636_v15 }
 0x240   : > { %v5427_v17 = vpop.f32.mrb[60].mxu0 }
 0x241   : > { %v5428_v24 = vpop.f32.mrb[61].mxu0 }
 0x242   : > { %v5429_v54 = vadd.f32 %v5428_v24, %v5427_v17  ;;  %v5430_v1 = vpop.f32.mrb[62].mxu0 }
 0x243   : > { %v5431_v32 = vpop.f32.mrb[63].mxu0 }
 0x244   : > { %v1706_v18 = vadd.f32 %v5429_v54, %v1641_v23  ;;  %v5432_v20 = vadd.f32 %v5431_v32, %v5430_v1 }
 0x246   : > { %v1709_v41 = vadd.f32 %v5432_v20, %v1644_v26 }
 0x248   : > { %v5449_v55 = vpop.f32.mrb[64].mxu0 }
 0x249   : > { %v5450_v39 = vpop.f32.mrb[65].mxu0 }
 0x24a   : > { %v5451_v38 = vadd.f32 %v5450_v39, %v5449_v55  ;;  %v5452_v56 = vpop.f32.mrb[66].mxu0 }
 0x24b   : > { %v5453_v36 = vpop.f32.mrb[67].mxu0 }
 0x24c   : > { %v5454_v49 = vadd.f32 %v5453_v36, %v5452_v56  ;;  %v1747_v27 = vadd.f32 %v5451_v38, %v1682_v34 }
 0x24e   : > { %v1750_v57 = vadd.f32 %v5454_v49, %v1685_v37 }
 0x250   : > { %v5455_v59 = vpop.f32.mrb[68].mxu0 }
 0x251   : > { %v5456_v60 = vpop.f32.mrb[69].mxu0 }
 0x252   : > { %v5457_v61 = vadd.f32 %v5456_v60, %v5455_v59  ;;  %v5458_v63 = vpop.f32.mrb[70].mxu0 }
 0x253   : > { %v5459_v0 = vpop.f32.mrb[71].mxu0 }
 0x254   : > { %v5460_v2 = vadd.f32 %v5459_v0, %v5458_v63  ;;  %v1755_v3 = vadd.f32 %v5457_v61, %v1690_v48 }
 0x256   : > { %v1758_v4 = vadd.f32 %v5460_v2, %v1693_v45 }
 0x258   : > { %v5461_v6 = vpop.f32.mrb[72].mxu0 }
 0x259   : > { %v5462_v7 = vpop.f32.mrb[73].mxu0 }
 0x25a   : > { %v5463_v8 = vadd.f32 %v5462_v7, %v5461_v6  ;;  %v5464_v9 = vpop.f32.mrb[74].mxu0  ;;  %v7533_v7 = vld [vmem:[#allocation2] sm:$0xff] }
 0x25b   : > { %v5465_v10 = vpop.f32.mrb[75].mxu0 }
 0x25c   : > { %v5466_v11 = vadd.f32 %v5465_v10, %v5464_v9  ;;  %v1763_v13 = vadd.f32 %v5463_v8, %v1698_v51  ;;  %v1912_v9 = vld [vmem:[#allocation2 + $0x2] sm:$0xff] }
 0x25e   : > { %v1766_v15 = vadd.f32 %v5466_v11, %v1701_v12  ;;  %v6758_v11 = vld [vmem:[%s8482_s7 + $0x148] sm:$0xff]  }
 0x260   : > { %v5467_v16 = vpop.f32.mrb[76].mxu0 }
 0x261   : > { %v5468_v14 = vpop.f32.mrb[77].mxu0 }
 0x262   : > { %v5469_v19 = vadd.f32 %v5468_v14, %v5467_v16  ;;  %v5470_v21 = vpop.f32.mrb[78].mxu0 }
 0x263   : > { %v5471_v22 = vpop.f32.mrb[79].mxu0 }
 0x264   : > { %v5472_v23 = vadd.f32 %v5471_v22, %v5470_v21  ;;  %v1771_v25 = vadd.f32 %v5469_v19, %v1706_v18  ;;  %v6759_v21 = vld [vmem:[%s8482_s7 + $0x180] sm:$0xff]  }
 0x266   : > { %v1774_v26 = vadd.f32 %v5472_v23, %v1709_v41 }
 0x268   : > { %v5997_v28 = vpop.f32.mrb[80].mxu0 }
 0x269   : > { %v1820_v30 = vadd.f32 %v5997_v28, %v1755_v3  ;;  %v1811_v31 = vpop.f32.mrb[81].mxu0  ;;  %v6761_v28 = vld [vmem:[%s8482_s7 + $0x1c8] sm:$0xff]  }
 0x26a   : > { %v1812_v34 = vadd.f32 %v1811_v31, %v1747_v27  ;;  %v5998_v35 = vpop.f32.mrb[82].mxu0  ;;  %v6762_v31 = vld [vmem:[%s8482_s7 + $0x150] sm:$0xff]  }
 0x26b   : > { %v1851_v37 = vmul.f32 %v5043_v29, %v1820_v30  ;;  %v1823_v40 = vadd.f32 %v5998_v35, %v1758_v4  ;;  %v1814_v42 = vpop.f32.mrb[83].mxu0  ;;  %v6756_v4 = vld [vmem:[%s8482_s7 + $0x100] sm:$0xff]  }
 0x26c   : > { %v1849_v43 = vmul.f32 %v5043_v29, %v1812_v34  ;;  %v1815_v44 = vadd.f32 %v1814_v42, %v1750_v57  ;;  %v6764_v34 = vld [vmem:[%s8482_s7 + $0x110] sm:$0xff]   ;;  %v6766_v42 = vld [vmem:[%s8482_s7 + $0x158] sm:$0xff]  }
 0x26d   : > { %v1866_v46 = vadd.f32 %v5044_v33, %v1851_v37  ;;  %v1852_v48 = vmul.f32 %v5043_v29, %v1823_v40  ;;  %v6765_v40 = vld [vmem:[%s8482_s7 + $0x1d0] sm:$0xff]  }
 0x26e   : > { %v1864_v53 = vadd.f32 %v5044_v33, %v1849_v43  ;;  %v1850_v45 = vmul.f32 %v5043_v29, %v1815_v44 }
 0x26f   : > { %v7499_v47 = vmax.f32 %v1866_v46, 0.0  ;;  %v1867_v50 = vadd.f32 %v5044_v33, %v1852_v48  ;;  %v6767_v46 = vld [vmem:[%s8482_s7 + $0x190] sm:$0xff]  }
 0x270   : > { %v7501_v62 = vmax.f32 %v1864_v53, 0.0  ;;  %v1865_v5 = vadd.f32 %v5044_v33, %v1850_v45  ;;  %v6001_v51 = vpop.f32.mrb[84].mxu0  ;;  %v6768_v45 = vld [vmem:[%s8482_s7 + $0x118] sm:$0xff]  }
 0x271   : > { %1882 = vst [vmem:[#allocation2 + $0x31] sm:$0xff] %v7499_v47  ;;  %v7504_v52 = vmax.f32 %v1867_v50, 0.0  ;;  %v1836_v12 = vadd.f32 %v6001_v51, %v1771_v25  ;;  %v1827_v17 = vpop.f32.mrb[85].mxu0  ;;  %v6769_v50 = vld [vmem:[%s8482_s7 + $0x1d8] sm:$0xff]  }
 0x272   : > { %1880 = vst [vmem:[#allocation2 + $0x11] sm:$0xff] %v7501_v62  ;;  %v7507_v24 = vmax.f32 %v1865_v5, 0.0  ;;  %v1828_v54 = vadd.f32 %v1827_v17, %v1763_v13  ;;  %v6002_v1 = vpop.f32.mrb[86].mxu0  ;;  %v1908_v32 = vpack.c.bf16 %v7501_v62, %v1900_v58  ;;  %v6770_v5 = vld [vmem:[%s8482_s7 + $0x160] sm:$0xff]   ;;  %v6771_v51 = vld [vmem:[%s8482_s7 + $0x198] sm:$0xff]  }
 0x273   : > { %1883 = vst [vmem:[#allocation2 + $0x41] sm:$0xff] %v7504_v52  ;;  %v1855_v18 = vmul.f32 %v5043_v29, %v1836_v12  ;;  %v1839_v20 = vadd.f32 %v6002_v1, %v1774_v26  ;;  %v1830_v41 = vpop.f32.mrb[87].mxu0  ;;  %v1945_v55 = vpack.c.bf16 %v7504_v52, %v7499_v47  ;;  %v6760_v26 = vld [vmem:[%s8482_s7 + $0x108] sm:$0xff]   ;;  %v6772_v12 = vld [vmem:[%s8482_s7 + $0x120] sm:$0xff]  }
 0x274   : > { %1881 = vst [vmem:[#allocation2 + $0x21] sm:$0xff] %v7507_v24  ;;  %v1853_v39 = vmul.f32 %v5043_v29, %v1828_v54  ;;  %v1831_v38 = vadd.f32 %v1830_v41, %v1766_v15  ;;  %2604 = vmatprep.mubr.bf16.mxu1 %v1908_v32  ;;  %v7516_v56 = vpack.c.bf16 %v7499_v47, %v7507_v24  ;;  %v6773_v1 = vld [vmem:[%s8482_s7 + $0x1e0] sm:$0xff]   ;;  %v6774_v32 = vld [vmem:[%s8482_s7 + $0x168] sm:$0xff]  }
 0x275   : > { %v1944_v36 = vpack.c.bf16 %v7507_v24, %v7501_v62  ;;  %v1870_v49 = vadd.f32 %v5044_v33, %v1855_v18  ;;  %v1856_v27 = vmul.f32 %v5043_v29, %v1839_v20  ;;  %v6775_v41 = vld [vmem:[%s8482_s7 + $0x1a0] sm:$0xff]  }
 0x276   : > { %v1868_v57 = vadd.f32 %v5044_v33, %v1853_v39  ;;  %v1854_v59 = vmul.f32 %v5043_v29, %v1831_v38  ;;  %v6791_v24 = vld [vmem:[%s8482_s7 + $0x220] sm:$0xff]  }
 0x277   : > { %v7520_v60 = vmax.f32 %v1870_v49, 0.0  ;;  %v1871_v61 = vadd.f32 %v5044_v33, %v1856_v27  ;;  %v6776_v49 = vld [vmem:[%s8482_s7 + $0x128] sm:$0xff]  }
 0x278   : > { %v7522_v63 = vmax.f32 %v1868_v57, 0.0  ;;  %v1869_v0 = vadd.f32 %v5044_v33, %v1854_v59  ;;  %v1926_v25 = vld [vmem:[#allocation2 + $0x30] sm:$0xff]  ;;  %v6763_v33 = vld [vmem:[%s8482_s7 + $0x188] sm:$0xff]  }
 0x279   : > { %1886 = vst [vmem:[#allocation2 + $0x71] sm:$0xff] %v7520_v60  ;;  %v7525_v2 = vmax.f32 %v1871_v61, 0.0  ;;  %v1889_v3 = vld [vmem:[#allocation2 + $0x10] sm:$0xff]  ;;  %v6777_v27 = vld [vmem:[%s8482_s7 + $0x1e8] sm:$0xff]  }
 0x27a   : > { %1884 = vst [vmem:[#allocation2 + $0x51] sm:$0xff] %v7522_v63  ;;  %v7531_v6 = vmax.f32 %v1869_v0, 0.0  ;;  %v1896_v8 = vpack.c.bf16 %v1889_v3, %v7533_v7  ;;  %v7536_v10 = vld [vmem:[#allocation2 + $0x12] sm:$0xff]  ;;  %v7543_v13 = vpack.c.bf16 %v7522_v63, %v7504_v52  ;;  %v1927_v16 = vld [vmem:[#allocation2 + $0x40] sm:$0xff]  ;;  %v6779_v61 = vld [vmem:[%s8482_s7 + $0x1a8] sm:$0xff]  }
 0x27b   : > { %1887 = vst [vmem:[#allocation2 + $0x81] sm:$0xff] %v7525_v2  ;;  %v1925_v15 = vld [vmem:[#allocation2 + $0x20] sm:$0xff]  ;;  %v1947_v14 = vpack.c.bf16 %v7525_v2, %v7520_v60  ;;  %v1920_v23 = vpack.c.bf16 %v7536_v10, %v1912_v9  ;;  %v1933_v30 = vpack.c.bf16 %v1927_v16, %v1926_v25  ;;  %v7586_v44 = vld [vmem:[#allocation2 + $0x32] sm:$0xff] }
 0x27c   : > { %1885 = vst [vmem:[#allocation2 + $0x61] sm:$0xff] %v7531_v6  ;;  %2605 = vmatmul.mubr.bf16.vlgmr.msra.gmra.mrb[0].mxu1 %v1896_v8  ;;  %v1932_v19 = vpack.c.bf16 %v1925_v15, %v1889_v3  ;;  %v7554_v22 = vpack.c.bf16 %v7520_v60, %v7531_v6  ;;  %v1946_v29 = vpack.c.bf16 %v7531_v6, %v7522_v63  ;;  %v7577_v37 = vld [vmem:[#allocation2 + $0x22] sm:$0xff]  ;;  %v6778_v59 = vld [vmem:[%s8482_s7 + $0x170] sm:$0xff]   ;;  %v6782_v9 = vld [vmem:[%s8482_s7 + $0x178] sm:$0xff]  }
 0x27d   : > { %5566 = vmatpush3.bf16.msra.mxu1 %v6756_v4  ;;  %2612 = vmatprep.mubr.bf16.mxu1 %v7516_v56  ;;  %v7575_v35 = vpack.c.bf16 %v1926_v25, %v1925_v15  ;;  %v7594_v48 = vpack.c.bf16 %v7586_v44, %v7577_v37  ;;  %v1916_v20 = vld [vmem:[#allocation2 + $0x42] sm:$0xff]  ;;  %v6780_v0 = vld [vmem:[%s8482_s7 + $0x130] sm:$0xff]   ;;  %v6786_v25 = vld [vmem:[%s8482_s7 + $0x1b8] sm:$0xff]  }
 0x27e   : > { %2669 = vmatprep.mubr.bf16.mxu0 %v1932_v19  ;;  %5567 = vmatprep.subr.bf16.mxu1 %v6758_v11  ;;  %v6781_v8 = vld [vmem:[%s8482_s7 + $0x1f0] sm:$0xff]   ;;  %v1956_v11 = vpack.c.bf16 %v7577_v37, %v7536_v10  ;;  %v6787_v10 = vld [vmem:[%s8482_s7 + $0x200] sm:$0xff]   ;;  %v6801_v37 = vld [vmem:[%s8485_s10 + $0xc8] sm:$0xff]  }
 0x27f   : > { %2670 = vmatmul.mubr.bf16.vlgmr.msra.gmra.mrb[88].mxu0 %v1920_v23  ;;  %v6785_v23 = vld [vmem:[%s8482_s7 + $0x1f8] sm:$0xff]   ;;  %v6795_v60 = vld [vmem:[%s8485_s10 + $0x40] sm:$0xff]  }
 0x280   : > { %2677 = vmatprep.mubr.bf16.mxu0 %v1933_v30  ;;  %5606 = vmatpush3.bf16.msra.mxu0 %v6759_v21  ;;  %v1930_v38 = vld [vmem:[#allocation2 + $0x70] sm:$0xff]  ;;  %v6784_v21 = vld [vmem:[%s8482_s7 + $0x138] sm:$0xff]  }
 0x281   : > { %5568 = vmatpush3.bf16.msra.mxu1 %v6760_v26  ;;  %5607 = vmatprep.subr.bf16.mxu0 %v6761_v28  ;;  %v1928_v53 = vld [vmem:[#allocation2 + $0x50] sm:$0xff]  ;;  %v6788_v26 = vld [vmem:[%s8482_s7 + $0x208] sm:$0xff]   ;;  %v1957_v28 = vpack.c.bf16 %v1916_v20, %v7586_v44  ;;  %v6790_v30 = vld [vmem:[%s8482_s7 + $0x218] sm:$0xff]  }
 0x282   : > { %5569 = vmatprep.subr.bf16.mxu1 %v6762_v31  ;;  %v7612_v17 = vpack.c.bf16 %v1928_v53, %v1927_v16  ;;  %v7614_v54 = vld [vmem:[#allocation2 + $0x52] sm:$0xff]  ;;  %v7622_v18 = vld [vmem:[#allocation2 + $0x80] sm:$0xff] }
 0x283   : > { %v1929_v43 = vld [vmem:[#allocation2 + $0x60] sm:$0xff]  ;;  %v7630_v39 = vpack.c.bf16 %v7614_v54, %v1916_v20  ;;  %v1935_v57 = vpack.c.bf16 %v7622_v18, %v1930_v38  ;;  %v1919_v15 = vld [vmem:[#allocation2 + $0x72] sm:$0xff]  ;;  %v1971_v63 = vpack.c.bf16 %v7533_v7, %v7622_v18  ;;  %v6819_v18 = vld [vmem:[%s8485_s10 + $0xa8] sm:$0xff]  }
 0x284   : > { %5608 = vmatpush3.bf16.msra.mxu0 %v6763_v33  ;;  %2613 = vmatmul.mubr.bf16.gmra.mrb[4].mxu1 %v7575_v35  ;;  %v1934_v58 = vpack.c.bf16 %v1929_v43, %v1928_v53  ;;  %v1899_v3 = vpack.c.bf16 %v1930_v38, %v1929_v43  ;;  %v1918_v4 = vld [vmem:[#allocation2 + $0x62] sm:$0xff]  ;;  %v6783_v16 = vld [vmem:[%s8482_s7 + $0x1b0] sm:$0xff]   ;;  %v6794_v31 = vld [vmem:[%s8482_s7 + $0x238] sm:$0xff]  }
 0x285   : > { %5570 = vmatpush3.bf16.msra.mxu1 %v6764_v34  ;;  %2620 = vmatprep.mubr.bf16.mxu1 %v7543_v13  ;;  %v1923_v19 = vpack.c.bf16 %v1919_v15, %v1918_v4  ;;  %v1958_v62 = vpack.c.bf16 %v1918_v4, %v7614_v54  ;;  %v1979_v52 = vld [vmem:[#allocation2 + $0x91] sm:$0xff]  ;;  %v6798_v33 = vld [vmem:[%s8485_s10 + $0x48] sm:$0xff]   ;;  %v6799_v34 = vld [vmem:[%s8485_s10 + $0x80] sm:$0xff]  }
 0x286   : > { %5609 = vmatprep.subr.bf16.mxu0 %v6765_v40  ;;  %5571 = vmatprep.subr.bf16.mxu1 %v6766_v42  ;;  %v1991_v6 = vld [vmem:[#allocation2 + $0x92] sm:$0xff]  ;;  %v6803_v42 = vld [vmem:[%s8485_s10 + $0x88] sm:$0xff]  }
 0x287   : > { %2678 = vmatmul.mubr.bf16.gmra.mrb[92].mxu0 %v7594_v48  ;;  %v6802_v40 = vld [vmem:[%s8485_s10 + $0x50] sm:$0xff]   ;;  %v6808_v53 = vld [vmem:[%s8485_s10 + $0x18] sm:$0xff]   ;;  %v6816_v54 = vld [vmem:[%s8485_s10 + $0x28] sm:$0xff]  }
 0x288   : > { %2685 = vmatprep.mubr.bf16.mxu0 %v1934_v58  ;;  %5610 = vmatpush3.bf16.msra.mxu0 %v6767_v46  ;;  %v6804_v43 = vld [vmem:[%s8485_s10 + $0x10] sm:$0xff]   ;;  %v6806_v46 = vld [vmem:[%s8485_s10 + $0x58] sm:$0xff]  }
 0x289   : > { %5572 = vmatpush3.bf16.msra.mxu1 %v6768_v45  ;;  %5611 = vmatprep.subr.bf16.mxu0 %v6769_v50  ;;  %v6805_v44 = vld [vmem:[%s8485_s10 + $0xd0] sm:$0xff]   ;;  %v6809_v45 = vld [vmem:[%s8485_s10 + $0xd8] sm:$0xff]   ;;  %v6810_v50 = vld [vmem:[%s8485_s10 + $0x60] sm:$0xff]  }
 0x28a   : > { %5573 = vmatprep.subr.bf16.mxu1 %v6770_v5  ;;  %v6811_v58 = vld [vmem:[%s8485_s10 + $0x98] sm:$0xff]   ;;  %v6812_v5 = vld [vmem:[%s8485_s10 + $0x20] sm:$0xff]   ;;  %v6820_v20 = vld [vmem:[%s8485_s10 + $0x30] sm:$0xff]  }
 0x28b   : > { %v6823_v38 = vld [vmem:[%s8485_s10 + $0xb0] sm:$0xff]  }
 0x28c   : > { %5612 = vmatpush3.bf16.msra.mxu0 %v6771_v51  ;;  %2621 = vmatmul.mubr.bf16.gmra.mrb[8].mxu1 %v7612_v17  ;;  %v6813_v51 = vld [vmem:[%s8485_s10 + $0xe0] sm:$0xff]  }
 0x28d   : > { %5574 = vmatpush3.bf16.msra.mxu1 %v6772_v12  ;;  %2628 = vmatprep.mubr.bf16.mxu1 %v7554_v22  ;;  %v6814_v12 = vld [vmem:[%s8485_s10 + $0x68] sm:$0xff]  }
 0x28e   : > { %5613 = vmatprep.subr.bf16.mxu0 %v6773_v1  ;;  %5575 = vmatprep.subr.bf16.mxu1 %v6774_v32  ;;  %v6817_v1 = vld [vmem:[%s8485_s10 + $0xe8] sm:$0xff]   ;;  %v6818_v32 = vld [vmem:[%s8485_s10 + $0x70] sm:$0xff]  }
 0x28f   : > { %2686 = vmatmul.mubr.bf16.gmra.mrb[96].mxu0 %v7630_v39 }
 0x290   : > { %2693 = vmatprep.mubr.bf16.mxu0 %v1935_v57  ;;  %5614 = vmatpush3.bf16.msra.mxu0 %v6775_v41  ;;  %v6821_v41 = vld [vmem:[%s8485_s10 + $0xf0] sm:$0xff]   ;;  %v6826_v57 = vld [vmem:[%s8485_s10 + $0xb8] sm:$0xff]  }
 0x291   : > { %5576 = vmatpush3.bf16.msra.mxu1 %v6776_v49  ;;  %5615 = vmatprep.subr.bf16.mxu0 %v6777_v27  ;;  %v6824_v49 = vld [vmem:[%s8485_s10 + $0x38] sm:$0xff]  }
 0x292   : > { %5577 = vmatprep.subr.bf16.mxu1 %v6778_v59  ;;  %v6825_v27 = vld [vmem:[%s8485_s10 + $0xf8] sm:$0xff]   ;;  %v6827_v59 = vld [vmem:[%s8485_s10 + $0x140] sm:$0xff]  }
 0x294   : > { %5616 = vmatpush3.bf16.msra.mxu0 %v6779_v61  ;;  %2629 = vmatmul.mubr.bf16.gmra.mrb[12].mxu1 %v1899_v3  ;;  %v6829_v61 = vld [vmem:[%s8485_s10 + $0x1c0] sm:$0xff]  }
 0x295   : > { %5578 = vmatpush3.bf16.msra.mxu1 %v6780_v0  ;;  %2734 = vmatprep.mubr.bf16.mxu1 %v1956_v11 }
 0x296   : > { %5617 = vmatprep.subr.bf16.mxu0 %v6781_v8  ;;  %5579 = vmatprep.subr.bf16.mxu1 %v6782_v9 }
 0x297   : > { %2694 = vmatmul.mubr.bf16.gmra.mrb[100].mxu0 %v1923_v19 }
 0x298   : > { %5618 = vmatpush3.bf16.msra.mxu0 %v6783_v16  ;;  %2799 = vmatprep.mubr.bf16.mxu0 %v7516_v56  ;;  %v6789_v56 = vld [vmem:[%s8482_s7 + $0x210] sm:$0xff]  }
 0x299   : > { %5580 = vmatpush3.bf16.msra.mxu1 %v6784_v21  ;;  %5619 = vmatprep.subr.bf16.mxu0 %v6785_v23 }
 0x29a   : > { %6003 = vmatprep.subr.bf16.mxu1 %v6787_v10 }
 0x29c   : > { %5620 = vmatpush3.bf16.msra.mxu0 %v6786_v25  ;;  %2735 = vmatmul.mubr.bf16.vlgmr.msra.gmra.mrb[16].mxu1 %v1944_v36  ;;  %v1955_v36 = vld [vmem:[#allocation2 + $0x82] sm:$0xff] }
 0x29d   : > { %6004 = vmatpush3.bf16.msra.mxu1 %v6787_v10  ;;  %2742 = vmatprep.mubr.bf16.mxu1 %v1957_v28  ;;  %v1959_v47 = vpack.c.bf16 %v1955_v36, %v1919_v15 }
 0x29e   : > { %6005 = vmatprep.subr.bf16.mxu1 %v6788_v26  ;;  %5657 = vmatprep.subr.bf16.mxu0 %v6795_v60 }
 0x29f   : > { %2800 = vmatmul.mubr.bf16.vlgmr.msra.gmra.mrb[104].mxu0 %v7575_v35  ;;  %v6800_v35 = vld [vmem:[%s8485_s10 + $0x8] sm:$0xff]  }
 0x2a0   : > { %2807 = vmatprep.mubr.bf16.mxu0 %v7543_v13  ;;  %v6792_v13 = vld [vmem:[%s8482_s7 + $0x228] sm:$0xff]  }
 0x2a1   : > { %6006 = vmatpush3.bf16.msra.mxu1 %v6788_v26 }
 0x2a2   : > { %6007 = vmatprep.subr.bf16.mxu1 %v6789_v56 }
 0x2a4   : > { %2743 = vmatmul.mubr.bf16.gmra.mrb[20].mxu1 %v1945_v55  ;;  %v1983_v55 = vpack.c.bf16 %v1979_v52, %v7525_v2  ;;  %v6796_v2 = vld [vmem:[%s8485_s10] sm:$0xff]  }
 0x2a5   : > { %6008 = vmatpush3.bf16.msra.mxu1 %v6789_v56  ;;  %2750 = vmatprep.mubr.bf16.mxu1 %v1958_v62 }
 0x2a6   : > { %6009 = vmatprep.subr.bf16.mxu1 %v6790_v30  ;;  %5658 = vmatpush3.bf16.msra.mxu0 %v6796_v2 }
 0x2a7   : > { %2808 = vmatmul.mubr.bf16.gmra.mrb[108].mxu0 %v7612_v17  ;;  %5659 = vmatprep.subr.bf16.mxu0 %v6798_v33  ;;  %v6815_v17 = vld [vmem:[%s8485_s10 + $0xa0] sm:$0xff]  }
 0x2a8   : > { %2815 = vmatprep.mubr.bf16.mxu0 %v7554_v22  ;;  %v6793_v22 = vld [vmem:[%s8482_s7 + $0x230] sm:$0xff]  }
 0x2a9   : > { %6010 = vmatpush3.bf16.msra.mxu1 %v6790_v30 }
 0x2aa   : > { %6011 = vmatprep.subr.bf16.mxu1 %v6791_v24  ;;  %5660 = vmatpush3.bf16.msra.mxu0 %v6800_v35 }
 0x2ab   : > { %5661 = vmatprep.subr.bf16.mxu0 %v6802_v40 }
 0x2ac   : > { %2751 = vmatmul.mubr.bf16.gmra.mrb[24].mxu1 %v1946_v29  ;;  %v1995_v29 = vpack.c.bf16 %v1991_v6, %v1955_v36 }
 0x2ad   : > { %6012 = vmatpush3.bf16.msra.mxu1 %v6791_v24  ;;  %2758 = vmatprep.mubr.bf16.mxu1 %v1959_v47 }
 0x2ae   : > { %6013 = vmatprep.subr.bf16.mxu1 %v6792_v13  ;;  %5662 = vmatpush3.bf16.msra.mxu0 %v6804_v43 }
 0x2af   : > { %2816 = vmatmul.mubr.bf16.gmra.mrb[112].mxu0 %v1899_v3  ;;  %5663 = vmatprep.subr.bf16.mxu0 %v6806_v46 }
 0x2b0   : > { %2823 = vmatprep.mubr.bf16.mxu0 %v1983_v55 }
 0x2b1   : > { %6014 = vmatpush3.bf16.msra.mxu1 %v6792_v13 }
 0x2b2   : > { %6015 = vmatprep.subr.bf16.mxu1 %v6793_v22  ;;  %5664 = vmatpush3.bf16.msra.mxu0 %v6808_v53 }
 0x2b3   : > { %5665 = vmatprep.subr.bf16.mxu0 %v6810_v50 }
 0x2b4   : > { %2759 = vmatmul.mubr.bf16.gmra.mrb[28].mxu1 %v1947_v14  ;;  %v6797_v14 = vld [vmem:[%s8485_s10 + $0xc0] sm:$0xff]  }
 0x2b5   : > { %6016 = vmatpush3.bf16.msra.mxu1 %v6793_v22  ;;  %6019 = vmatprep.mubr.bf16.mxu1 %v7594_v48  ;;  %v6807_v48 = vld [vmem:[%s8485_s10 + $0x90] sm:$0xff]  }
 0x2b6   : > { %6017 = vmatprep.subr.bf16.mxu1 %v6794_v31  ;;  %5666 = vmatpush3.bf16.msra.mxu0 %v6812_v5 }
 0x2b7   : > { %2824 = vmatmul.mubr.bf16.gmra.mrb[116].mxu0 %v1971_v63  ;;  %5667 = vmatprep.subr.bf16.mxu0 %v6814_v12 }
 0x2b9   : > { %6018 = vmatpush3.bf16.msra.mxu1 %v6794_v31 }
 0x2ba   : > { %5697 = vmatprep.subr.bf16.mxu1 %v6797_v14  ;;  %5668 = vmatpush3.bf16.msra.mxu0 %v6816_v54 }
 0x2bb   : > { %5669 = vmatprep.subr.bf16.mxu0 %v6818_v32 }
 0x2bc   : > { %6020 = vmatmul.mubr.bf16.vlgmr.msra.gmra.mrb[32].mxu1 %v7630_v39  ;;  %v6822_v39 = vld [vmem:[%s8485_s10 + $0x78] sm:$0xff]  }
 0x2bd   : > { %6023 = vmatprep.mubr.bf16.mxu1 %v1923_v19  ;;  %5698 = vmatpush3.bf16.msra.mxu1 %v6799_v34 }
 0x2be   : > { %5699 = vmatprep.subr.bf16.mxu1 %v6801_v37  ;;  %5670 = vmatpush3.bf16.msra.mxu0 %v6820_v20 }
 0x2bf   : > { %5671 = vmatprep.subr.bf16.mxu0 %v6822_v39 }
 0x2c1   : > { %5700 = vmatpush3.bf16.msra.mxu1 %v6803_v42 }
 0x2c2   : > { %5701 = vmatprep.subr.bf16.mxu1 %v6805_v44  ;;  %5672 = vmatpush3.bf16.msra.mxu0 %v6824_v49 }
 0x2c3   : > { %5737 = vmatprep.subr.bf16.mxu0 %v6827_v59 }
 0x2c4   : > { %6024 = vmatmul.mubr.bf16.gmra.mrb[36].mxu1 %v1995_v29 }
 0x2c5   : > { %5702 = vmatpush3.bf16.msra.mxu1 %v6807_v48 }
 0x2c6   : > { %5703 = vmatprep.subr.bf16.mxu1 %v6809_v45 }
 0x2c9   : > { %5704 = vmatpush3.bf16.msra.mxu1 %v6811_v58 }
 0x2ca   : > { %5705 = vmatprep.subr.bf16.mxu1 %v6813_v51 }
 0x2cd   : > { %5706 = vmatpush3.bf16.msra.mxu1 %v6815_v17 }
 0x2ce   : > { %5707 = vmatprep.subr.bf16.mxu1 %v6817_v1 }
 0x2d1   : > { %5708 = vmatpush3.bf16.msra.mxu1 %v6819_v18 }
 0x2d2   : > { %5709 = vmatprep.subr.bf16.mxu1 %v6821_v41 }
 0x2d5   : > { %5710 = vmatpush3.bf16.msra.mxu1 %v6823_v38 }
 0x2d6   : > { %5711 = vmatprep.subr.bf16.mxu1 %v6825_v27 }
 0x2d9   : > { %5712 = vmatpush3.bf16.msra.mxu1 %v6826_v57 }
 0x2da   : > { %5777 = vmatprep.subr.bf16.mxu1 %v6829_v61 }
 0x34f   : > { %v5501_v0 = vpop.f32.mrb[0].mxu1 }
 0x350   : > { %v5502_v3 = vpop.f32.mrb[1].mxu1 }
 0x351   : > { %v5503_v4 = vadd.f32 %v5502_v3, %v5501_v0  ;;  %v5504_v8 = vpop.f32.mrb[2].mxu1 }
 0x352   : > { %v5541_v9 = vpop.f32.mrb[88].mxu0  ;;  %v5505_v11 = vpop.f32.mrb[3].mxu1 }
 0x353   : > { %v5506_v15 = vadd.f32 %v5505_v11, %v5504_v8  ;;  %v5542_v16 = vpop.f32.mrb[89].mxu0 }
 0x354   : > { %v5543_v19 = vadd.f32 %v5542_v16, %v5541_v9  ;;  %v5544_v21 = vpop.f32.mrb[90].mxu0 }
 0x355   : > { %v5545_v23 = vpop.f32.mrb[91].mxu0 }
 0x356   : > { %v2672_v10 = vadd.f32 %v5543_v19, %v5503_v4  ;;  %v5546_v25 = vadd.f32 %v5545_v23, %v5544_v21 }
 0x357   : > { %v5507_v26 = vpop.f32.mrb[4].mxu1 }
 0x358   : > { %v2675_v28 = vadd.f32 %v5546_v25, %v5506_v15  ;;  %v5508_v56 = vpop.f32.mrb[5].mxu1 }
 0x359   : > { %v5509_v30 = vadd.f32 %v5508_v56, %v5507_v26  ;;  %v5510_v62 = vpop.f32.mrb[6].mxu1 }
 0x35a   : > { %v5547_v24 = vpop.f32.mrb[92].mxu0  ;;  %v5511_v36 = vpop.f32.mrb[7].mxu1 }
 0x35b   : > { %v5512_v13 = vadd.f32 %v5511_v36, %v5510_v62  ;;  %v5548_v47 = vpop.f32.mrb[93].mxu0 }
 0x35c   : > { %v5549_v52 = vadd.f32 %v5548_v47, %v5547_v24  ;;  %v5550_v55 = vpop.f32.mrb[94].mxu0 }
 0x35d   : > { %v5551_v22 = vpop.f32.mrb[95].mxu0 }
 0x35e   : > { %v2680_v31 = vadd.f32 %v5549_v52, %v5509_v30  ;;  %v5552_v63 = vadd.f32 %v5551_v22, %v5550_v55 }
 0x35f   : > { %v5513_v6 = vpop.f32.mrb[8].mxu1 }
 0x360   : > { %v2683_v29 = vadd.f32 %v5552_v63, %v5512_v13  ;;  %v5514_v60 = vpop.f32.mrb[9].mxu1 }
 0x361   : > { %v5515_v2 = vadd.f32 %v5514_v60, %v5513_v6  ;;  %v5516_v14 = vpop.f32.mrb[10].mxu1 }
 0x362   : > { %v5553_v33 = vpop.f32.mrb[96].mxu0  ;;  %v5517_v34 = vpop.f32.mrb[11].mxu1 }
 0x363   : > { %v5518_v35 = vadd.f32 %v5517_v34, %v5516_v14  ;;  %v5554_v37 = vpop.f32.mrb[97].mxu0 }
 0x364   : > { %v5555_v40 = vadd.f32 %v5554_v37, %v5553_v33  ;;  %v5556_v42 = vpop.f32.mrb[98].mxu0 }
 0x365   : > { %v5557_v43 = vpop.f32.mrb[99].mxu0 }
 0x366   : > { %v2688_v44 = vadd.f32 %v5555_v40, %v5515_v2  ;;  %v5558_v46 = vadd.f32 %v5557_v43, %v5556_v42 }
 0x367   : > { %v5519_v48 = vpop.f32.mrb[12].mxu1 }
 0x368   : > { %v2691_v53 = vadd.f32 %v5558_v46, %v5518_v35  ;;  %v5520_v45 = vpop.f32.mrb[13].mxu1 }
 0x369   : > { %v5521_v50 = vadd.f32 %v5520_v45, %v5519_v48  ;;  %v5522_v58 = vpop.f32.mrb[14].mxu1 }
 0x36a   : > { %v5559_v5 = vpop.f32.mrb[100].mxu0  ;;  %v5523_v51 = vpop.f32.mrb[15].mxu1 }
 0x36b   : > { %v5524_v12 = vadd.f32 %v5523_v51, %v5522_v58  ;;  %v5560_v17 = vpop.f32.mrb[101].mxu0 }
 0x36c   : > { %v5561_v54 = vadd.f32 %v5560_v17, %v5559_v5  ;;  %v5562_v1 = vpop.f32.mrb[102].mxu0 }
 0x36d   : > { %v5563_v32 = vpop.f32.mrb[103].mxu0 }
 0x36e   : > { %v2696_v18 = vadd.f32 %v5561_v54, %v5521_v50  ;;  %v5564_v20 = vadd.f32 %v5563_v32, %v5562_v1 }
 0x36f   : > { %v5581_v41 = vpop.f32.mrb[16].mxu1 }
 0x370   : > { %v2699_v39 = vadd.f32 %v5564_v20, %v5524_v12  ;;  %v5582_v38 = vpop.f32.mrb[17].mxu1 }
 0x371   : > { %v5583_v49 = vadd.f32 %v5582_v38, %v5581_v41  ;;  %v5584_v27 = vpop.f32.mrb[18].mxu1 }
 0x372   : > { %v5621_v57 = vpop.f32.mrb[104].mxu0  ;;  %v5585_v59 = vpop.f32.mrb[19].mxu1 }
 0x373   : > { %v2737_v61 = vadd.f32 %v5583_v49, %v2672_v10  ;;  %v5586_v0 = vadd.f32 %v5585_v59, %v5584_v27  ;;  %v5622_v3 = vpop.f32.mrb[105].mxu0  ;;  %v5117_v27 = vld [vmem:[%s8483_s8] ss:$0 sm:$0xff] }
 0x374   : > { %v5623_v4 = vadd.f32 %v5622_v3, %v5621_v57  ;;  %v5624_v8 = vpop.f32.mrb[106].mxu0 }
 0x375   : > { %v2740_v9 = vadd.f32 %v5586_v0, %v2675_v28  ;;  %v5625_v11 = vpop.f32.mrb[107].mxu0 }
 0x376   : > { %v5626_v15 = vadd.f32 %v5625_v11, %v5624_v8  ;;  %v2802_v16 = vadd.f32 %v5623_v4, %v2737_v61 }
 0x377   : > { %v5587_v19 = vpop.f32.mrb[20].mxu1 }
 0x378   : > { %v5588_v21 = vpop.f32.mrb[21].mxu1  ;;  %v2805_v23 = vadd.f32 %v5626_v15, %v2740_v9 }
 0x379   : > { %v5589_v25 = vadd.f32 %v5588_v21, %v5587_v19  ;;  %v5590_v26 = vpop.f32.mrb[22].mxu1 }
 0x37a   : > { %v5627_v56 = vpop.f32.mrb[108].mxu0  ;;  %v5591_v30 = vpop.f32.mrb[23].mxu1 }
 0x37b   : > { %v2745_v62 = vadd.f32 %v5589_v25, %v2680_v31  ;;  %v5592_v24 = vadd.f32 %v5591_v30, %v5590_v26  ;;  %v5628_v36 = vpop.f32.mrb[109].mxu0  ;;  %v2955_v30 = vld [vmem:[#allocation2 + $0x1] sm:$0xff] }
 0x37c   : > { %v5629_v13 = vadd.f32 %v5628_v36, %v5627_v56  ;;  %v5630_v10 = vpop.f32.mrb[110].mxu0 }
 0x37d   : > { %v2748_v47 = vadd.f32 %v5592_v24, %v2683_v29  ;;  %v5631_v52 = vpop.f32.mrb[111].mxu0 }
 0x37e   : > { %v5632_v55 = vadd.f32 %v5631_v52, %v5630_v10  ;;  %v2810_v22 = vadd.f32 %v5629_v13, %v2745_v62 }
 0x37f   : > { %v5593_v28 = vpop.f32.mrb[24].mxu1 }
 0x380   : > { %v5594_v63 = vpop.f32.mrb[25].mxu1  ;;  %v2813_v6 = vadd.f32 %v5632_v55, %v2748_v47 }
 0x381   : > { %v5595_v60 = vadd.f32 %v5594_v63, %v5593_v28  ;;  %v5596_v2 = vpop.f32.mrb[26].mxu1 }
 0x382   : > { %v5633_v14 = vpop.f32.mrb[112].mxu0  ;;  %v5597_v33 = vpop.f32.mrb[27].mxu1 }
 0x383   : > { %v2753_v34 = vadd.f32 %v5595_v60, %v2688_v44  ;;  %v5598_v35 = vadd.f32 %v5597_v33, %v5596_v2  ;;  %v5634_v37 = vpop.f32.mrb[113].mxu0 }
 0x384   : > { %v5635_v40 = vadd.f32 %v5634_v37, %v5633_v14  ;;  %v5636_v31 = vpop.f32.mrb[114].mxu0 }
 0x385   : > { %v2756_v42 = vadd.f32 %v5598_v35, %v2691_v53  ;;  %v5637_v43 = vpop.f32.mrb[115].mxu0 }
 0x386   : > { %v5638_v46 = vadd.f32 %v5637_v43, %v5636_v31  ;;  %v2818_v48 = vadd.f32 %v5635_v40, %v2753_v34 }
 0x387   : > { %v5599_v29 = vpop.f32.mrb[28].mxu1 }
 0x388   : > { %v5600_v45 = vpop.f32.mrb[29].mxu1  ;;  %v2821_v50 = vadd.f32 %v5638_v46, %v2756_v42 }
 0x389   : > { %v5601_v58 = vadd.f32 %v5600_v45, %v5599_v29  ;;  %v5602_v5 = vpop.f32.mrb[30].mxu1  ;;  %v6828_v45 = vld [vmem:[%s8485_s10 + $0x100] sm:$0xff]  }
 0x38a   : > { %v5639_v51 = vpop.f32.mrb[116].mxu0  ;;  %v5603_v12 = vpop.f32.mrb[31].mxu1 }
 0x38b   : > { %v2761_v17 = vadd.f32 %v5601_v58, %v2696_v18  ;;  %v5604_v54 = vadd.f32 %v5603_v12, %v5602_v5  ;;  %v5640_v1 = vpop.f32.mrb[117].mxu0  ;;  %v5118_v18 = vld [vmem:[%s8484_s9] ss:$0 sm:$0xff]  ;;  %v2967_v5 = vld [vmem:[#allocation2 + $0x2] sm:$0xff] }
 0x38c   : > { %v5641_v32 = vadd.f32 %v5640_v1, %v5639_v51  ;;  %v5642_v44 = vpop.f32.mrb[118].mxu0  ;;  %v6830_v12 = vld [vmem:[%s8485_s10 + $0x148] sm:$0xff]  }
 0x38d   : > { %v2764_v20 = vadd.f32 %v5604_v54, %v2699_v39  ;;  %v5643_v41 = vpop.f32.mrb[119].mxu0 }
 0x38e   : > { %v5644_v38 = vadd.f32 %v5643_v41, %v5642_v44  ;;  %v2826_v49 = vadd.f32 %v5641_v32, %v2761_v17  ;;  %v6831_v44 = vld [vmem:[%s8485_s10 + $0x180] sm:$0xff]  }
 0x38f   : > { %v6021_v53 = vpop.f32.mrb[32].mxu1 }
 0x390   : > { %v2875_v57 = vadd.f32 %v6021_v53, %v2810_v22  ;;  %v2866_v59 = vpop.f32.mrb[33].mxu1  ;;  %v2829_v61 = vadd.f32 %v5644_v38, %v2764_v20  ;;  %v6833_v53 = vld [vmem:[%s8485_s10 + $0x1c8] sm:$0xff]  }
 0x391   : > { %v2867_v0 = vadd.f32 %v2866_v59, %v2802_v16  ;;  %v6022_v3 = vpop.f32.mrb[34].mxu1  ;;  %v6834_v59 = vld [vmem:[%s8485_s10 + $0x150] sm:$0xff]  }
 0x392   : > { %v2906_v4 = vmul.f32 %v5117_v27, %v2875_v57  ;;  %v2878_v8 = vadd.f32 %v6022_v3, %v2813_v6  ;;  %v2869_v39 = vpop.f32.mrb[35].mxu1 }
 0x393   : > { %v2904_v9 = vmul.f32 %v5117_v27, %v2867_v0  ;;  %v2870_v11 = vadd.f32 %v2869_v39, %v2805_v23 }
 0x394   : > { %v2921_v15 = vadd.f32 %v5118_v18, %v2906_v4  ;;  %v2907_v19 = vmul.f32 %v5117_v27, %v2878_v8  ;;  %v6837_v4 = vld [vmem:[%s8485_s10 + $0x1d0] sm:$0xff]   ;;  %v6838_v8 = vld [vmem:[%s8485_s10 + $0x158] sm:$0xff]  }
 0x395   : > { %v2919_v21 = vadd.f32 %v5118_v18, %v2904_v9  ;;  %v2905_v25 = vmul.f32 %v5117_v27, %v2870_v11  ;;  %v6839_v11 = vld [vmem:[%s8485_s10 + $0x190] sm:$0xff]  }
 0x396   : > { %v7825_v26 = vmax.f32 %v2921_v15, 0.0  ;;  %v2922_v56 = vadd.f32 %v5118_v18, %v2907_v19 }
 0x397   : > { %v7827_v62 = vmax.f32 %v2919_v21, 0.0  ;;  %v2920_v24 = vadd.f32 %v5118_v18, %v2905_v25  ;;  %v6025_v36 = vpop.f32.mrb[36].mxu1  ;;  %v6840_v21 = vld [vmem:[%s8485_s10 + $0x118] sm:$0xff]  }
 0x398   : > { %2937 = vst [vmem:[#allocation2 + $0x31] sm:$0xff] %v7825_v26  ;;  %v7830_v16 = vmax.f32 %v2922_v56, 0.0  ;;  %v2891_v13 = vadd.f32 %v6025_v36, %v2826_v49  ;;  %v2882_v10 = vpop.f32.mrb[37].mxu1  ;;  %v6832_v49 = vld [vmem:[%s8485_s10 + $0x108] sm:$0xff]   ;;  %v6841_v25 = vld [vmem:[%s8485_s10 + $0x1d8] sm:$0xff]   ;;  %v6844_v36 = vld [vmem:[%s8485_s10 + $0x120] sm:$0xff]  }
 0x399   : > { %2935 = vst [vmem:[#allocation2 + $0x11] sm:$0xff] %v7827_v62  ;;  %v7833_v23 = vmax.f32 %v2920_v24, 0.0  ;;  %v2883_v47 = vadd.f32 %v2882_v10, %v2818_v48  ;;  %v6026_v52 = vpop.f32.mrb[38].mxu1  ;;  %v2963_v55 = vpack.c.bf16 %v7827_v62, %v2955_v30  ;;  %v6842_v30 = vld [vmem:[%s8485_s10 + $0x160] sm:$0xff]   ;;  %v6843_v24 = vld [vmem:[%s8485_s10 + $0x198] sm:$0xff]  }
 0x39a   : > { %2938 = vst [vmem:[#allocation2 + $0x41] sm:$0xff] %v7830_v16  ;;  %v2910_v22 = vmul.f32 %v5117_v27, %v2891_v13  ;;  %v2894_v28 = vadd.f32 %v6026_v52, %v2829_v61  ;;  %v2885_v63 = vpop.f32.mrb[39].mxu1  ;;  %v3000_v6 = vpack.c.bf16 %v7830_v16, %v7825_v26  ;;  %v6835_v61 = vld [vmem:[%s8485_s10 + $0x188] sm:$0xff]  }
 0x39b   : > { %2936 = vst [vmem:[#allocation2 + $0x21] sm:$0xff] %v7833_v23  ;;  %v2908_v60 = vmul.f32 %v5117_v27, %v2883_v47  ;;  %v2886_v2 = vadd.f32 %v2885_v63, %v2821_v50  ;;  %3659 = vmatprep.mubr.bf16.mxu0 %v2963_v55  ;;  %v7842_v14 = vpack.c.bf16 %v7825_v26, %v7833_v23  ;;  %v6845_v47 = vld [vmem:[%s8485_s10 + $0x1e0] sm:$0xff]   ;;  %v6846_v52 = vld [vmem:[%s8485_s10 + $0x168] sm:$0xff]  }
 0x39c   : > { %v2999_v33 = vpack.c.bf16 %v7833_v23, %v7827_v62  ;;  %v2925_v34 = vadd.f32 %v5118_v18, %v2910_v22  ;;  %v2911_v35 = vmul.f32 %v5117_v27, %v2894_v28  ;;  %v6847_v28 = vld [vmem:[%s8485_s10 + $0x1a0] sm:$0xff]  }
 0x39d   : > { %v2923_v37 = vadd.f32 %v5118_v18, %v2908_v60  ;;  %v2909_v40 = vmul.f32 %v5117_v27, %v2886_v2  ;;  %v6848_v2 = vld [vmem:[%s8485_s10 + $0x128] sm:$0xff]   ;;  %v6863_v23 = vld [vmem:[%s8485_s10 + $0x220] sm:$0xff]  }
 0x39e   : > { %v7846_v31 = vmax.f32 %v2925_v34, 0.0  ;;  %v2926_v42 = vadd.f32 %v5118_v18, %v2911_v35  ;;  %v6849_v34 = vld [vmem:[%s8485_s10 + $0x1e8] sm:$0xff]  }
 0x39f   : > { %v7848_v43 = vmax.f32 %v2923_v37, 0.0  ;;  %v2924_v46 = vadd.f32 %v5118_v18, %v2909_v40  ;;  %v2981_v38 = vld [vmem:[#allocation2 + $0x30] sm:$0xff]  ;;  %v6851_v40 = vld [vmem:[%s8485_s10 + $0x1a8] sm:$0xff]  }
 0x3a0   : > { %2941 = vst [vmem:[#allocation2 + $0x71] sm:$0xff] %v7846_v31  ;;  %v7851_v48 = vmax.f32 %v2926_v42, 0.0  ;;  %v2944_v29 = vld [vmem:[#allocation2 + $0x10] sm:$0xff] }
 0x3a1   : > { %2939 = vst [vmem:[#allocation2 + $0x51] sm:$0xff] %v7848_v43  ;;  %v7857_v50 = vmax.f32 %v2924_v46, 0.0  ;;  %v2951_v58 = vpack.c.bf16 %v2944_v29, %v7533_v7  ;;  %v7860_v51 = vld [vmem:[#allocation2 + $0x12] sm:$0xff]  ;;  %v7867_v17 = vpack.c.bf16 %v7848_v43, %v7830_v16  ;;  %v2982_v1 = vld [vmem:[#allocation2 + $0x40] sm:$0xff] }
 0x3a2   : > { %2942 = vst [vmem:[#allocation2 + $0x81] sm:$0xff] %v7851_v48  ;;  %v2980_v54 = vld [vmem:[#allocation2 + $0x20] sm:$0xff]  ;;  %v3002_v32 = vpack.c.bf16 %v7851_v48, %v7846_v31  ;;  %v2975_v41 = vpack.c.bf16 %v7860_v51, %v2967_v5  ;;  %v2988_v57 = vpack.c.bf16 %v2982_v1, %v2981_v38  ;;  %v6836_v18 = vld [vmem:[%s8485_s10 + $0x110] sm:$0xff]  }
 0x3a3   : > { %2940 = vst [vmem:[#allocation2 + $0x61] sm:$0xff] %v7857_v50  ;;  %3660 = vmatmul.mubr.bf16.vlgmr.msra.gmra.mrb[120].mxu0 %v2951_v58  ;;  %v2987_v7 = vpack.c.bf16 %v2980_v54, %v2944_v29  ;;  %v7878_v20 = vpack.c.bf16 %v7846_v31, %v7857_v50  ;;  %v3001_v27 = vpack.c.bf16 %v7857_v50, %v7848_v43  ;;  %v7901_v3 = vld [vmem:[#allocation2 + $0x22] sm:$0xff]  ;;  %v7910_v9 = vld [vmem:[#allocation2 + $0x32] sm:$0xff] }
 0x3a4   : > { %5738 = vmatpush3.bf16.msra.mxu0 %v6828_v45  ;;  %3667 = vmatprep.mubr.bf16.mxu0 %v7842_v14  ;;  %v7899_v0 = vpack.c.bf16 %v2981_v38, %v2980_v54  ;;  %v7918_v15 = vpack.c.bf16 %v7910_v9, %v7901_v3  ;;  %v2971_v22 = vld [vmem:[#allocation2 + $0x42] sm:$0xff]  ;;  %v6850_v37 = vld [vmem:[%s8485_s10 + $0x170] sm:$0xff]   ;;  %v6854_v58 = vld [vmem:[%s8485_s10 + $0x178] sm:$0xff]   ;;  %v3011_v5 = vpack.c.bf16 %v7901_v3, %v7860_v51 }
 0x3a5   : > { %3724 = vmatprep.mubr.bf16.mxu1 %v2987_v7  ;;  %5739 = vmatprep.subr.bf16.mxu0 %v6830_v12  ;;  %v6852_v42 = vld [vmem:[%s8485_s10 + $0x130] sm:$0xff]   ;;  %v6856_v7 = vld [vmem:[%s8485_s10 + $0x138] sm:$0xff]   ;;  %v6859_v51 = vld [vmem:[%s8485_s10 + $0x200] sm:$0xff]  }
 0x3a6   : > { %3725 = vmatmul.mubr.bf16.vlgmr.msra.gmra.mrb[40].mxu1 %v2975_v41  ;;  %v6853_v45 = vld [vmem:[%s8485_s10 + $0x1f0] sm:$0xff]   ;;  %v6858_v41 = vld [vmem:[%s8485_s10 + $0x1b8] sm:$0xff]   ;;  %v6860_v38 = vld [vmem:[%s8485_s10 + $0x208] sm:$0xff]  }
 0x3a7   : > { %3732 = vmatprep.mubr.bf16.mxu1 %v2988_v57  ;;  %5778 = vmatpush3.bf16.msra.mxu1 %v6831_v44  ;;  %v2985_v60 = vld [vmem:[#allocation2 + $0x70] sm:$0xff]  ;;  %v6857_v44 = vld [vmem:[%s8485_s10 + $0x1f8] sm:$0xff]   ;;  %v6868_v43 = vld [vmem:[#allocation2] sm:$0xff] }
 0x3a8   : > { %5740 = vmatpush3.bf16.msra.mxu0 %v6832_v49  ;;  %5779 = vmatprep.subr.bf16.mxu1 %v6833_v53  ;;  %v2983_v19 = vld [vmem:[#allocation2 + $0x50] sm:$0xff]  ;;  %v3012_v49 = vpack.c.bf16 %v2971_v22, %v7910_v9  ;;  %v6862_v53 = vld [vmem:[%s8485_s10 + $0x218] sm:$0xff]   ;;  %v4022_v31 = vld [vmem:[%s8488_s13] sm:$0xff] }
 0x3a9   : > { %5741 = vmatprep.subr.bf16.mxu0 %v6834_v59  ;;  %v7936_v13 = vpack.c.bf16 %v2983_v19, %v2982_v1  ;;  %v7938_v10 = vld [vmem:[#allocation2 + $0x52] sm:$0xff]  ;;  %v7946_v55 = vld [vmem:[#allocation2 + $0x80] sm:$0xff] }
 0x3aa   : > { %v2984_v39 = vld [vmem:[#allocation2 + $0x60] sm:$0xff]  ;;  %v7954_v63 = vpack.c.bf16 %v7938_v10, %v2971_v22  ;;  %v2990_v35 = vpack.c.bf16 %v7946_v55, %v2985_v60  ;;  %v2974_v12 = vld [vmem:[#allocation2 + $0x72] sm:$0xff]  ;;  %v3026_v50 = vpack.c.bf16 %v6868_v43, %v7946_v55  ;;  %v4035_v22 = vld [vmem:[%s8488_s13 + $0x68] sm:$0xff] }
 0x3ab   : > { %5780 = vmatpush3.bf16.msra.mxu1 %v6835_v61  ;;  %3668 = vmatmul.mubr.bf16.gmra.mrb[124].mxu0 %v7899_v0  ;;  %v2989_v56 = vpack.c.bf16 %v2984_v39, %v2983_v19  ;;  %v2954_v46 = vpack.c.bf16 %v2985_v60, %v2984_v39  ;;  %v2973_v29 = vld [vmem:[#allocation2 + $0x62] sm:$0xff]  ;;  %v6855_v54 = vld [vmem:[%s8485_s10 + $0x1b0] sm:$0xff]   ;;  %v6866_v57 = vld [vmem:[%s8485_s10 + $0x238] sm:$0xff]  }
 0x3ac   : > { %5742 = vmatpush3.bf16.msra.mxu0 %v6836_v18  ;;  %3675 = vmatprep.mubr.bf16.mxu0 %v7867_v17  ;;  %v2978_v1 = vpack.c.bf16 %v2974_v12, %v2973_v29  ;;  %v3013_v62 = vpack.c.bf16 %v2973_v29, %v7938_v10  ;;  %v3034_v16 = vld [vmem:[#allocation2 + $0x91] sm:$0xff]  ;;  %v4026_v3 = vld [vmem:[%s8488_s13 + $0x20] sm:$0xff]  ;;  %v5194_v39 = vld [vmem:[%s8488_s13 + $0x88] sm:$0xff] }
 0x3ad   : > { %5781 = vmatprep.subr.bf16.mxu1 %v6837_v4  ;;  %5743 = vmatprep.subr.bf16.mxu0 %v6838_v8  ;;  %v4025_v18 = vld [vmem:[%s8488_s13 + $0x18] sm:$0xff]  ;;  %v4027_v4 = vld [vmem:[%s8488_s13 + $0x28] sm:$0xff]  ;;  %v5193_v8 = vld [vmem:[%s8488_s13 + $0x80] sm:$0xff] }
 0x3ae   : > { %3733 = vmatmul.mubr.bf16.gmra.mrb[44].mxu1 %v7918_v15  ;;  %v6382_v9 = vpack.c.bf16 %v4027_v4, %v4026_v3  ;;  %v5196_v19 = vld [vmem:[%s8488_s13 + $0x98] sm:$0xff]  ;;  %v4032_v10 = vld [vmem:[%s8488_s13 + $0x50] sm:$0xff]  ;;  %v4034_v55 = vld [vmem:[%s8488_s13 + $0x60] sm:$0xff] }
 0x3af   : > { %3740 = vmatprep.mubr.bf16.mxu1 %v2989_v56  ;;  %5782 = vmatpush3.bf16.msra.mxu1 %v6839_v11  ;;  %v6342_v11 = vpack.c.bf16 %v5194_v39, %v5193_v8  ;;  %v4037_v60 = vld [vmem:[%s8488_s13 + $0x78] sm:$0xff] }
 0x3b0   : > { %5744 = vmatpush3.bf16.msra.mxu0 %v6840_v21  ;;  %5783 = vmatprep.subr.bf16.mxu1 %v6841_v25  ;;  %v4028_v21 = vld [vmem:[%s8488_s13 + $0x30] sm:$0xff]  ;;  %v4029_v25 = vld [vmem:[%s8488_s13 + $0x38] sm:$0xff] }
 0x3b1   : > { %5745 = vmatprep.subr.bf16.mxu0 %v6842_v30  ;;  %v6386_v30 = vpack.c.bf16 %v4029_v25, %v4028_v21 }
 0x3b3   : > { %5784 = vmatpush3.bf16.msra.mxu1 %v6843_v24  ;;  %3676 = vmatmul.mubr.bf16.gmra.mrb[128].mxu0 %v7936_v13  ;;  %v4030_v24 = vld [vmem:[%s8488_s13 + $0x40] sm:$0xff] }
 0x3b4   : > { %5746 = vmatpush3.bf16.msra.mxu0 %v6844_v36  ;;  %3683 = vmatprep.mubr.bf16.mxu0 %v7878_v20  ;;  %v4031_v36 = vld [vmem:[%s8488_s13 + $0x48] sm:$0xff] }
 0x3b5   : > { %5785 = vmatprep.subr.bf16.mxu1 %v6845_v47  ;;  %5747 = vmatprep.subr.bf16.mxu0 %v6846_v52  ;;  %v4033_v47 = vld [vmem:[%s8488_s13 + $0x58] sm:$0xff] }
 0x3b6   : > { %3741 = vmatmul.mubr.bf16.gmra.mrb[48].mxu1 %v7954_v63  ;;  %v6394_v52 = vpack.c.bf16 %v4033_v47, %v4032_v10 }
 0x3b7   : > { %3748 = vmatprep.mubr.bf16.mxu1 %v2990_v35  ;;  %5786 = vmatpush3.bf16.msra.mxu1 %v6847_v28  ;;  %v6398_v28 = vpack.c.bf16 %v4035_v22, %v4034_v55 }
 0x3b8   : > { %5748 = vmatpush3.bf16.msra.mxu0 %v6848_v2  ;;  %5787 = vmatprep.subr.bf16.mxu1 %v6849_v34 }
 0x3b9   : > { %5749 = vmatprep.subr.bf16.mxu0 %v6850_v37 }
 0x3bb   : > { %5788 = vmatpush3.bf16.msra.mxu1 %v6851_v40  ;;  %3684 = vmatmul.mubr.bf16.gmra.mrb[132].mxu0 %v2954_v46 }
 0x3bc   : > { %5750 = vmatpush3.bf16.msra.mxu0 %v6852_v42  ;;  %3789 = vmatprep.mubr.bf16.mxu0 %v3011_v5 }
 0x3bd   : > { %5789 = vmatprep.subr.bf16.mxu1 %v6853_v45  ;;  %5751 = vmatprep.subr.bf16.mxu0 %v6854_v58 }
 0x3be   : > { %3749 = vmatmul.mubr.bf16.gmra.mrb[52].mxu1 %v2978_v1 }
 0x3bf   : > { %5790 = vmatpush3.bf16.msra.mxu1 %v6855_v54  ;;  %3854 = vmatprep.mubr.bf16.mxu1 %v7842_v14  ;;  %v6861_v14 = vld [vmem:[%s8485_s10 + $0x210] sm:$0xff]  }
 0x3c0   : > { %5752 = vmatpush3.bf16.msra.mxu0 %v6856_v7  ;;  %5791 = vmatprep.subr.bf16.mxu1 %v6857_v44 }
 0x3c1   : > { %6027 = vmatprep.subr.bf16.mxu0 %v6859_v51 }
 0x3c3   : > { %5792 = vmatpush3.bf16.msra.mxu1 %v6858_v41  ;;  %3790 = vmatmul.mubr.bf16.vlgmr.msra.gmra.mrb[136].mxu0 %v2999_v33  ;;  %v3010_v33 = vld [vmem:[#allocation2 + $0x82] sm:$0xff] }
 0x3c4   : > { %6028 = vmatpush3.bf16.msra.mxu0 %v6859_v51  ;;  %3797 = vmatprep.mubr.bf16.mxu0 %v3012_v49  ;;  %v3014_v26 = vpack.c.bf16 %v3010_v33, %v2974_v12 }
 0x3c5   : > { %6029 = vmatprep.subr.bf16.mxu0 %v6860_v38 }
 0x3c6   : > { %3855 = vmatmul.mubr.bf16.vlgmr.msra.gmra.mrb[56].mxu1 %v7899_v0 }
 0x3c7   : > { %3862 = vmatprep.mubr.bf16.mxu1 %v7867_v17  ;;  %v6864_v17 = vld [vmem:[%s8485_s10 + $0x228] sm:$0xff]  }
 0x3c8   : > { %6030 = vmatpush3.bf16.msra.mxu0 %v6860_v38 }
 0x3c9   : > { %6031 = vmatprep.subr.bf16.mxu0 %v6861_v14 }
 0x3cb   : > { %3798 = vmatmul.mubr.bf16.gmra.mrb[140].mxu0 %v3000_v6  ;;  %v3038_v6 = vpack.c.bf16 %v3034_v16, %v7851_v48  ;;  %v4023_v48 = vld [vmem:[%s8488_s13 + $0x8] sm:$0xff] }
 0x3cc   : > { %6032 = vmatpush3.bf16.msra.mxu0 %v6861_v14  ;;  %3805 = vmatprep.mubr.bf16.mxu0 %v3013_v62  ;;  %v6374_v61 = vpack.c.bf16 %v4023_v48, %v4022_v31 }
 0x3cd   : > { %6033 = vmatprep.subr.bf16.mxu0 %v6862_v53 }
 0x3ce   : > { %3863 = vmatmul.mubr.bf16.gmra.mrb[60].mxu1 %v7936_v13  ;;  %6375 = vmatprep.subr.bf16.mxu1 %v6374_v61  ;;  %v6390_v13 = vpack.c.bf16 %v4031_v36, %v4030_v24 }
 0x3cf   : > { %3870 = vmatprep.mubr.bf16.mxu1 %v7878_v20  ;;  %v6865_v20 = vld [vmem:[%s8485_s10 + $0x230] sm:$0xff]   ;;  %6377 = vmatpush3.bf16.msra.mxu1 %v6374_v61 }
 0x3d0   : > { %6034 = vmatpush3.bf16.msra.mxu0 %v6862_v53 }
 0x3d1   : > { %6035 = vmatprep.subr.bf16.mxu0 %v6863_v23 }
 0x3d3   : > { %3806 = vmatmul.mubr.bf16.gmra.mrb[144].mxu0 %v3001_v27  ;;  %v3046_v27 = vld [vmem:[#allocation2 + $0x92] sm:$0xff] }
 0x3d4   : > { %6036 = vmatpush3.bf16.msra.mxu0 %v6863_v23  ;;  %3813 = vmatprep.mubr.bf16.mxu0 %v3014_v26  ;;  %v3050_v59 = vpack.c.bf16 %v3046_v27, %v3010_v33 }
 0x3d5   : > { %6037 = vmatprep.subr.bf16.mxu0 %v6864_v17 }
 0x3d6   : > { %3871 = vmatmul.mubr.bf16.gmra.mrb[64].mxu1 %v2954_v46 }
 0x3d7   : > { %3878 = vmatprep.mubr.bf16.mxu1 %v3038_v6 }
 0x3d8   : > { %6038 = vmatpush3.bf16.msra.mxu0 %v6864_v17 }
 0x3d9   : > { %6039 = vmatprep.subr.bf16.mxu0 %v6865_v20 }
 0x3db   : > { %3814 = vmatmul.mubr.bf16.gmra.mrb[148].mxu0 %v3002_v32  ;;  %v4024_v32 = vld [vmem:[%s8488_s13 + $0x10] sm:$0xff] }
 0x3dc   : > { %6040 = vmatpush3.bf16.msra.mxu0 %v6865_v20  ;;  %6043 = vmatprep.mubr.bf16.mxu0 %v7918_v15  ;;  %v6378_v0 = vpack.c.bf16 %v4025_v18, %v4024_v32  ;;  %v5195_v15 = vld [vmem:[%s8488_s13 + $0x90] sm:$0xff] }
 0x3dd   : > { %6041 = vmatprep.subr.bf16.mxu0 %v6866_v57  ;;  %v6346_v56 = vpack.c.bf16 %v5196_v19, %v5195_v15 }
 0x3de   : > { %3879 = vmatmul.mubr.bf16.gmra.mrb[68].mxu1 %v3026_v50  ;;  %6379 = vmatprep.subr.bf16.mxu1 %v6378_v0 }
 0x3df   : > { %6381 = vmatpush3.bf16.msra.mxu1 %v6378_v0 }
 0x3e0   : > { %6042 = vmatpush3.bf16.msra.mxu0 %v6866_v57  ;;  %6383 = vmatprep.subr.bf16.mxu1 %v6382_v9 }
 0x3e1   : > { %6343 = vmatprep.subr.bf16.mxu0 %v6342_v11 }
 0x3e3   : > { %6044 = vmatmul.mubr.bf16.vlgmr.msra.gmra.mrb[152].mxu0 %v7954_v63  ;;  %6385 = vmatpush3.bf16.msra.mxu1 %v6382_v9  ;;  %v4036_v63 = vld [vmem:[%s8488_s13 + $0x70] sm:$0xff] }
 0x3e4   : > { %6047 = vmatprep.mubr.bf16.mxu0 %v2978_v1  ;;  %6345 = vmatpush3.bf16.msra.mxu0 %v6342_v11  ;;  %v6402_v2 = vpack.c.bf16 %v4037_v60, %v4036_v63 }
 0x3e5   : > { %6347 = vmatprep.subr.bf16.mxu0 %v6346_v56  ;;  %6387 = vmatprep.subr.bf16.mxu1 %v6386_v30 }
 0x3e7   : > { %6389 = vmatpush3.bf16.msra.mxu1 %v6386_v30 }
 0x3e8   : > { %6349 = vmatpush3.bf16.msra.mxu0 %v6346_v56  ;;  %6391 = vmatprep.subr.bf16.mxu1 %v6390_v13 }
 0x3eb   : > { %6048 = vmatmul.mubr.bf16.gmra.mrb[156].mxu0 %v3050_v59  ;;  %6393 = vmatpush3.bf16.msra.mxu1 %v6390_v13 }
 0x3ec   : > { %6395 = vmatprep.subr.bf16.mxu1 %v6394_v52 }
 0x3ef   : > { %6397 = vmatpush3.bf16.msra.mxu1 %v6394_v52 }
 0x3f0   : > { %6399 = vmatprep.subr.bf16.mxu1 %v6398_v28 }
 0x3f3   : > { %6401 = vmatpush3.bf16.msra.mxu1 %v6398_v28 }
 0x3f4   : > { %6403 = vmatprep.subr.bf16.mxu1 %v6402_v2 }
 0x3f7   : > { %6405 = vmatpush3.bf16.msra.mxu1 %v6402_v2 }
 0x476   : > { %v5673_v34 = vpop.f32.mrb[120].mxu0 }
 0x477   : > { %v5674_v35 = vpop.f32.mrb[121].mxu0 }
 0x478   : > { %v5675_v37 = vadd.f32 %v5674_v35, %v5673_v34  ;;  %v5676_v40 = vpop.f32.mrb[122].mxu0 }
 0x479   : > { %v5713_v42 = vpop.f32.mrb[40].mxu1  ;;  %v5677_v46 = vpop.f32.mrb[123].mxu0 }
 0x47a   : > { %v5678_v29 = vadd.f32 %v5677_v46, %v5676_v40  ;;  %v5714_v45 = vpop.f32.mrb[41].mxu1 }
 0x47b   : > { %v5715_v58 = vadd.f32 %v5714_v45, %v5713_v42  ;;  %v5716_v5 = vpop.f32.mrb[42].mxu1 }
 0x47c   : > { %v5717_v12 = vpop.f32.mrb[43].mxu1 }
 0x47d   : > { %v3727_v54 = vadd.f32 %v5715_v58, %v5675_v37  ;;  %v5718_v1 = vadd.f32 %v5717_v12, %v5716_v5 }
 0x47e   : > { %v5679_v7 = vpop.f32.mrb[124].mxu0 }
 0x47f   : > { %v3730_v44 = vadd.f32 %v5718_v1, %v5678_v29  ;;  %v5680_v51 = vpop.f32.mrb[125].mxu0 }
 0x480   : > { %v5681_v41 = vadd.f32 %v5680_v51, %v5679_v7  ;;  %v5682_v38 = vpop.f32.mrb[126].mxu0 }
 0x481   : > { %v5719_v49 = vpop.f32.mrb[44].mxu1  ;;  %v5683_v14 = vpop.f32.mrb[127].mxu0 }
 0x482   : > { %v5684_v53 = vadd.f32 %v5683_v14, %v5682_v38  ;;  %v5720_v62 = vpop.f32.mrb[45].mxu1 }
 0x483   : > { %v5721_v23 = vadd.f32 %v5720_v62, %v5719_v49  ;;  %v5722_v33 = vpop.f32.mrb[46].mxu1 }
 0x484   : > { %v5723_v17 = vpop.f32.mrb[47].mxu1 }
 0x485   : > { %v3735_v26 = vadd.f32 %v5721_v23, %v5681_v41  ;;  %v5724_v16 = vadd.f32 %v5723_v17, %v5722_v33 }
 0x486   : > { %v5685_v6 = vpop.f32.mrb[128].mxu0 }
 0x487   : > { %v3738_v20 = vadd.f32 %v5724_v16, %v5684_v53  ;;  %v5686_v57 = vpop.f32.mrb[129].mxu0 }
 0x488   : > { %v5687_v43 = vadd.f32 %v5686_v57, %v5685_v6  ;;  %v5688_v50 = vpop.f32.mrb[130].mxu0 }
 0x489   : > { %v5725_v27 = vpop.f32.mrb[48].mxu1  ;;  %v5689_v59 = vpop.f32.mrb[131].mxu0 }
 0x48a   : > { %v5690_v31 = vadd.f32 %v5689_v59, %v5688_v50  ;;  %v5726_v48 = vpop.f32.mrb[49].mxu1 }
 0x48b   : > { %v5727_v32 = vadd.f32 %v5726_v48, %v5725_v27  ;;  %v5728_v61 = vpop.f32.mrb[50].mxu1 }
 0x48c   : > { %v5729_v18 = vpop.f32.mrb[51].mxu1 }
 0x48d   : > { %v3743_v0 = vadd.f32 %v5727_v32, %v5687_v43  ;;  %v5730_v3 = vadd.f32 %v5729_v18, %v5728_v61 }
 0x48e   : > { %v5691_v4 = vpop.f32.mrb[132].mxu0 }
 0x48f   : > { %v3746_v8 = vadd.f32 %v5730_v3, %v5690_v31  ;;  %v5692_v39 = vpop.f32.mrb[133].mxu0 }
 0x490   : > { %v5693_v9 = vadd.f32 %v5692_v39, %v5691_v4  ;;  %v5694_v11 = vpop.f32.mrb[134].mxu0 }
 0x491   : > { %v5731_v15 = vpop.f32.mrb[52].mxu1  ;;  %v5695_v19 = vpop.f32.mrb[135].mxu0 }
 0x492   : > { %v5696_v21 = vadd.f32 %v5695_v19, %v5694_v11  ;;  %v5732_v25 = vpop.f32.mrb[53].mxu1 }
 0x493   : > { %v5733_v56 = vadd.f32 %v5732_v25, %v5731_v15  ;;  %v5734_v30 = vpop.f32.mrb[54].mxu1 }
 0x494   : > { %v5735_v24 = vpop.f32.mrb[55].mxu1 }
 0x495   : > { %v3751_v36 = vadd.f32 %v5733_v56, %v5693_v9  ;;  %v5736_v13 = vadd.f32 %v5735_v24, %v5734_v30 }
 0x496   : > { %v5753_v10 = vpop.f32.mrb[136].mxu0 }
 0x497   : > { %v3754_v47 = vadd.f32 %v5736_v13, %v5696_v21  ;;  %v5754_v52 = vpop.f32.mrb[137].mxu0 }
 0x498   : > { %v5755_v55 = vadd.f32 %v5754_v52, %v5753_v10  ;;  %v5756_v22 = vpop.f32.mrb[138].mxu0 }
 0x499   : > { %v5793_v28 = vpop.f32.mrb[56].mxu1  ;;  %v5757_v63 = vpop.f32.mrb[139].mxu0 }
 0x49a   : > { %v3792_v60 = vadd.f32 %v5755_v55, %v3727_v54  ;;  %v5758_v2 = vadd.f32 %v5757_v63, %v5756_v22  ;;  %v5794_v34 = vpop.f32.mrb[57].mxu1  ;;  %v8103_v22 = vld [vmem:[%s8486_s11] ss:$0 sm:$0xff] }
 0x49b   : > { %v5795_v35 = vadd.f32 %v5794_v34, %v5793_v28  ;;  %v5796_v37 = vpop.f32.mrb[58].mxu1 }
 0x49c   : > { %v3795_v40 = vadd.f32 %v5758_v2, %v3730_v44  ;;  %v5797_v42 = vpop.f32.mrb[59].mxu1 }
 0x49d   : > { %v5798_v46 = vadd.f32 %v5797_v42, %v5796_v37  ;;  %v3857_v29 = vadd.f32 %v5795_v35, %v3792_v60 }
 0x49e   : > { %v5759_v45 = vpop.f32.mrb[140].mxu0 }
 0x49f   : > { %v5760_v58 = vpop.f32.mrb[141].mxu0  ;;  %v3860_v5 = vadd.f32 %v5798_v46, %v3795_v40 }
 0x4a0   : > { %v5761_v12 = vadd.f32 %v5760_v58, %v5759_v45  ;;  %v5762_v1 = vpop.f32.mrb[142].mxu0 }
 0x4a1   : > { %v5799_v7 = vpop.f32.mrb[60].mxu1  ;;  %v5763_v51 = vpop.f32.mrb[143].mxu0 }
 0x4a2   : > { %v3800_v41 = vadd.f32 %v5761_v12, %v3735_v26  ;;  %v5764_v38 = vadd.f32 %v5763_v51, %v5762_v1  ;;  %v5800_v49 = vpop.f32.mrb[61].mxu1 }
 0x4a3   : > { %v5801_v14 = vadd.f32 %v5800_v49, %v5799_v7  ;;  %v5802_v54 = vpop.f32.mrb[62].mxu1  ;;  %v5197_v49 = vld [vmem:[%s8488_s13 + $0xa0] sm:$0xff] }
 0x4a4   : > { %v3803_v53 = vadd.f32 %v5764_v38, %v3738_v20  ;;  %v5803_v62 = vpop.f32.mrb[63].mxu1 }
 0x4a5   : > { %v5804_v23 = vadd.f32 %v5803_v62, %v5802_v54  ;;  %v3865_v33 = vadd.f32 %v5801_v14, %v3800_v41  ;;  %v5198_v14 = vld [vmem:[%s8488_s13 + $0xa8] sm:$0xff]  ;;  %v5209_v54 = vld [vmem:[%s8488_s13 + $0x100] sm:$0xff] }
 0x4a6   : > { %v5765_v44 = vpop.f32.mrb[144].mxu0 }
 0x4a7   : > { %v5766_v17 = vpop.f32.mrb[145].mxu0  ;;  %v3868_v16 = vadd.f32 %v5804_v23, %v3803_v53 }
 0x4a8   : > { %v5767_v6 = vadd.f32 %v5766_v17, %v5765_v44  ;;  %v5768_v57 = vpop.f32.mrb[146].mxu0  ;;  %v5210_v44 = vld [vmem:[%s8488_s13 + $0x108] sm:$0xff] }
 0x4a9   : > { %v5805_v43 = vpop.f32.mrb[64].mxu1  ;;  %v5769_v50 = vpop.f32.mrb[147].mxu0  ;;  %v6406_v17 = vpack.c.bf16 %v5210_v44, %v5209_v54  ;;  %v5226_v54 = vld [vmem:[%s8488_s13 + $0x188] sm:$0xff] }
 0x4aa   : > { %v3808_v27 = vadd.f32 %v5767_v6, %v3743_v0  ;;  %v5770_v59 = vadd.f32 %v5769_v50, %v5768_v57  ;;  %v5806_v31 = vpop.f32.mrb[65].mxu1  ;;  %v5200_v50 = vld [vmem:[%s8488_s13 + $0xb8] sm:$0xff] }
 0x4ab   : > { %v5807_v48 = vadd.f32 %v5806_v31, %v5805_v43  ;;  %v5808_v26 = vpop.f32.mrb[66].mxu1  ;;  %6407 = vmatprep.subr.bf16.mxu1 %v6406_v17  ;;  %v5199_v43 = vld [vmem:[%s8488_s13 + $0xb0] sm:$0xff] }
 0x4ac   : > { %v3811_v32 = vadd.f32 %v5770_v59, %v3746_v8  ;;  %v5809_v61 = vpop.f32.mrb[67].mxu1 }
 0x4ad   : > { %v5810_v18 = vadd.f32 %v5809_v61, %v5808_v26  ;;  %v3873_v3 = vadd.f32 %v5807_v48, %v3808_v27  ;;  %v6354_v27 = vpack.c.bf16 %v5200_v50, %v5199_v43  ;;  %v5201_v26 = vld [vmem:[%s8488_s13 + $0xc0] sm:$0xff]  ;;  %v5231_v43 = vld [vmem:[%s8488_s13 + $0x1b0] sm:$0xff]  ;;  %v5232_v50 = vld [vmem:[%s8488_s13 + $0x1b8] sm:$0xff] }
 0x4ae   : > { %v5771_v20 = vpop.f32.mrb[148].mxu0 }
 0x4af   : > { %v5772_v4 = vpop.f32.mrb[149].mxu0  ;;  %v3876_v39 = vadd.f32 %v5810_v18, %v3811_v32  ;;  %v5202_v32 = vld [vmem:[%s8488_s13 + $0xc8] sm:$0xff] }
 0x4b0   : > { %v5773_v9 = vadd.f32 %v5772_v4, %v5771_v20  ;;  %v5774_v11 = vpop.f32.mrb[150].mxu0  ;;  %v6358_v61 = vpack.c.bf16 %v5202_v32, %v5201_v26  ;;  %v5203_v4 = vld [vmem:[%s8488_s13 + $0xd0] sm:$0xff]  ;;  %v5236_v32 = vld [vmem:[%s8488_s13 + $0x1d8] sm:$0xff] }
 0x4b1   : > { %v5811_v15 = vpop.f32.mrb[68].mxu1  ;;  %v5775_v19 = vpop.f32.mrb[151].mxu0  ;;  %v5235_v26 = vld [vmem:[%s8488_s13 + $0x1d0] sm:$0xff] }
 0x4b2   : > { %v3816_v21 = vadd.f32 %v5773_v9, %v3751_v36  ;;  %v5776_v25 = vadd.f32 %v5775_v19, %v5774_v11  ;;  %v5812_v56 = vpop.f32.mrb[69].mxu1 }
 0x4b3   : > { %v5813_v30 = vadd.f32 %v5812_v56, %v5811_v15  ;;  %v5814_v0 = vpop.f32.mrb[70].mxu1 }
 0x4b4   : > { %v3819_v24 = vadd.f32 %v5776_v25, %v3754_v47  ;;  %v5815_v13 = vpop.f32.mrb[71].mxu1  ;;  %v8108_v47 = vld [vmem:[%s8487_s12] ss:$0 sm:$0xff]  ;;  %v5206_v25 = vld [vmem:[%s8488_s13 + $0xe8] sm:$0xff] }
 0x4b5   : > { %v5816_v10 = vadd.f32 %v5815_v13, %v5814_v0  ;;  %v3881_v52 = vadd.f32 %v5813_v30, %v3816_v21  ;;  %v5205_v21 = vld [vmem:[%s8488_s13 + $0xe0] sm:$0xff]  ;;  %v5208_v13 = vld [vmem:[%s8488_s13 + $0xf8] sm:$0xff] }
 0x4b6   : > { %v6045_v8 = vpop.f32.mrb[152].mxu0  ;;  %v6366_v56 = vpack.c.bf16 %v5206_v25, %v5205_v21  ;;  %v5243_v25 = vld [vmem:[%s8488_s13 + $0x210] sm:$0xff] }
 0x4b7   : > { %v3930_v55 = vadd.f32 %v6045_v8, %v3865_v33  ;;  %v3921_v28 = vpop.f32.mrb[153].mxu0  ;;  %v3884_v63 = vadd.f32 %v5816_v10, %v3819_v24  ;;  %v6350_v33 = vpack.c.bf16 %v5198_v14, %v5197_v49  ;;  %v5207_v24 = vld [vmem:[%s8488_s13 + $0xf0] sm:$0xff]  ;;  %v5225_v14 = vld [vmem:[%s8488_s13 + $0x180] sm:$0xff] }
 0x4b8   : > { %v3922_v60 = vadd.f32 %v3921_v28, %v3857_v29  ;;  %v6046_v2 = vpop.f32.mrb[154].mxu0  ;;  %v6370_v10 = vpack.c.bf16 %v5208_v13, %v5207_v24  ;;  %v5245_v24 = vld [vmem:[%s8488_s13 + $0x220] sm:$0xff]  ;;  %v5246_v13 = vld [vmem:[%s8488_s13 + $0x228] sm:$0xff] }
 0x4b9   : > { %v3933_v36 = vadd.f32 %v6046_v2, %v3868_v16  ;;  %v3924_v34 = vpop.f32.mrb[155].mxu0  ;;  %v3961_v46 = vmul.f32 %v8103_v22, %v3930_v55  ;;  %6351 = vmatprep.subr.bf16.mxu0 %v6350_v33  ;;  %v5211_v55 = vld [vmem:[%s8488_s13 + $0x110] sm:$0xff]  ;;  %v5214_v2 = vld [vmem:[%s8488_s13 + $0x128] sm:$0xff] }
 0x4ba   : > { %v3925_v35 = vadd.f32 %v3924_v34, %v3860_v5  ;;  %v3959_v37 = vmul.f32 %v8103_v22, %v3922_v60  ;;  %6353 = vmatpush3.bf16.msra.mxu0 %v6350_v33  ;;  %v5213_v60 = vld [vmem:[%s8488_s13 + $0x120] sm:$0xff]  ;;  %v5215_v34 = vld [vmem:[%s8488_s13 + $0x130] sm:$0xff]  ;;  %v5228_v33 = vld [vmem:[%s8488_s13 + $0x198] sm:$0xff] }
 0x4bb   : > { %v3962_v41 = vmul.f32 %v8103_v22, %v3933_v36  ;;  %v3976_v23 = vadd.f32 %v8108_v47, %v3961_v46  ;;  %6355 = vmatprep.subr.bf16.mxu0 %v6354_v27  ;;  %v6414_v36 = vpack.c.bf16 %v5214_v2, %v5213_v60  ;;  %v5251_v60 = vld [vmem:[%s8488_s13 + $0x250] sm:$0xff]  ;;  %v5252_v2 = vld [vmem:[%s8488_s13 + $0x258] sm:$0xff] }
 0x4bc   : > { %v3960_v40 = vmul.f32 %v8103_v22, %v3925_v35  ;;  %v3974_v42 = vadd.f32 %v8108_v47, %v3959_v37 }
 0x4bd   : > { %v3984_v6 = vmax.f32 %v3976_v23, 0.0  ;;  %v3977_v57 = vadd.f32 %v8108_v47, %v3962_v41  ;;  %v5227_v23 = vld [vmem:[%s8488_s13 + $0x190] sm:$0xff] }
 0x4be   : > { %v6049_v45 = vpop.f32.mrb[156].mxu0  ;;  %v3982_v58 = vmax.f32 %v3974_v42, 0.0  ;;  %v3975_v29 = vadd.f32 %v8108_v47, %v3960_v40  ;;  %6357 = vmatpush3.bf16.msra.mxu0 %v6354_v27  ;;  %v5217_v40 = vld [vmem:[%s8488_s13 + $0x140] sm:$0xff]  ;;  %v5218_v42 = vld [vmem:[%s8488_s13 + $0x148] sm:$0xff]  ;;  %v6442_v44 = vpack.c.bf16 %v5228_v33, %v5227_v23  ;;  %v6450_v27 = vpack.c.bf16 %v5232_v50, %v5231_v43  ;;  %v5267_v33 = vld [vmem:[%s8488_s13 + $0x2d0] sm:$0xff] }
 0x4bf   : > { %v3946_v12 = vadd.f32 %v6049_v45, %v3881_v52  ;;  %v3937_v1 = vpop.f32.mrb[157].mxu0  ;;  %v3985_v31 = vmax.f32 %v3977_v57, 0.0  ;;  %6359 = vmatprep.subr.bf16.mxu0 %v6358_v61  ;;  %v6422_v45 = vpack.c.bf16 %v5218_v42, %v5217_v40  ;;  %v5256_v40 = vld [vmem:[%s8488_s13 + $0x278] sm:$0xff]  ;;  %v5271_v43 = vld [vmem:[%s8488_s13 + $0x2f0] sm:$0xff] }
 0x4c0   : > { %v3938_v7 = vadd.f32 %v3937_v1, %v3873_v3  ;;  %v6050_v51 = vpop.f32.mrb[158].mxu0  ;;  %3990 = vxpose.xlu0.b32.start [1/8] (short) %v3982_v58, 128  ;;  %v3983_v62 = vmax.f32 %v3975_v29, 0.0  ;;  %v5219_v58 = vld [vmem:[%s8488_s13 + $0x150] sm:$0xff]  ;;  %v5220_v29 = vld [vmem:[%s8488_s13 + $0x158] sm:$0xff] }
 0x4c1   : > { %v3949_v5 = vadd.f32 %v6050_v51, %v3884_v63  ;;  %v3940_v38 = vpop.f32.mrb[159].mxu0  ;;  %v3965_v18 = vmul.f32 %v8103_v22, %v3946_v12  ;;  %v6426_v1 = vpack.c.bf16 %v5220_v29, %v5219_v58  ;;  %v5222_v51 = vld [vmem:[%s8488_s13 + $0x168] sm:$0xff]  ;;  %v5272_v50 = vld [vmem:[%s8488_s13 + $0x2f8] sm:$0xff] }
 0x4c2   : > { %v3941_v53 = vadd.f32 %v3940_v38, %v3876_v39  ;;  %v3963_v16 = vmul.f32 %v8103_v22, %v3938_v7  ;;  %6361 = vmatpush3.bf16.msra.mxu0 %v6358_v61  ;;  %v5204_v39 = vld [vmem:[%s8488_s13 + $0xd8] sm:$0xff]  ;;  %v5221_v7 = vld [vmem:[%s8488_s13 + $0x160] sm:$0xff]  ;;  %v6458_v61 = vpack.c.bf16 %v5236_v32, %v5235_v26  ;;  %v5275_v32 = vld [vmem:[%s8488_s13 + $0x310] sm:$0xff] }
 0x4c3   : > { %v6362_v9 = vpack.c.bf16 %v5204_v39, %v5203_v4  ;;  %v3966_v11 = vmul.f32 %v8103_v22, %v3949_v5  ;;  %v3980_v19 = vadd.f32 %v8108_v47, %v3965_v18  ;;  %v6430_v41 = vpack.c.bf16 %v5222_v51, %v5221_v7  ;;  %v5223_v5 = vld [vmem:[%s8488_s13 + $0x170] sm:$0xff]  ;;  %v5224_v38 = vld [vmem:[%s8488_s13 + $0x178] sm:$0xff]  ;;  %v5237_v18 = vld [vmem:[%s8488_s13 + $0x1e0] sm:$0xff] }
 0x4c4   : > { %3991 = vxpose.xlu0.b32.cont [2/8] (short) %v3983_v62, 128  ;;  %v3964_v59 = vmul.f32 %v8103_v22, %v3941_v53  ;;  %v3978_v48 = vadd.f32 %v8108_v47, %v3963_v16  ;;  %v5212_v22 = vld [vmem:[%s8488_s13 + $0x118] sm:$0xff]  ;;  %v6434_v49 = vpack.c.bf16 %v5224_v38, %v5223_v5  ;;  %v6438_v53 = vpack.c.bf16 %v5226_v54, %v5225_v14  ;;  %v5229_v16 = vld [vmem:[%s8488_s13 + $0x1a0] sm:$0xff]  ;;  %v5239_v4 = vld [vmem:[%s8488_s13 + $0x1f0] sm:$0xff] }
 0x4c5   : > { %6363 = vmatprep.subr.bf16.mxu0 %v6362_v9  ;;  %v3988_v30 = vmax.f32 %v3980_v19, 0.0  ;;  %v3981_v0 = vadd.f32 %v8108_v47, %v3966_v11  ;;  %v6410_v28 = vpack.c.bf16 %v5212_v22, %v5211_v55  ;;  %v5240_v39 = vld [vmem:[%s8488_s13 + $0x1f8] sm:$0xff]  ;;  %v5241_v11 = vld [vmem:[%s8488_s13 + $0x200] sm:$0xff]  ;;  %v5262_v5 = vld [vmem:[%s8488_s13 + $0x2a8] sm:$0xff] }
 0x4c6   : > { %v3986_v3 = vmax.f32 %v3978_v48, 0.0  ;;  %v3979_v20 = vadd.f32 %v8108_v47, %v3964_v59  ;;  %6365 = vmatpush3.bf16.msra.mxu0 %v6362_v9  ;;  %v5216_v47 = vld [vmem:[%s8488_s13 + $0x138] sm:$0xff]  ;;  %v5233_v59 = vld [vmem:[%s8488_s13 + $0x1c0] sm:$0xff]  ;;  %v6466_v9 = vpack.c.bf16 %v5240_v39, %v5239_v4  ;;  %v5278_v4 = vld [vmem:[%s8488_s13 + $0x328] sm:$0xff] }
 0x4c7   : > { %6367 = vmatprep.subr.bf16.mxu0 %v6366_v56  ;;  %v3989_v52 = vmax.f32 %v3981_v0, 0.0  ;;  %v6418_v37 = vpack.c.bf16 %v5216_v47, %v5215_v34  ;;  %v5249_v22 = vld [vmem:[%s8488_s13 + $0x240] sm:$0xff]  ;;  %v5254_v47 = vld [vmem:[%s8488_s13 + $0x268] sm:$0xff]  ;;  %v5264_v14 = vld [vmem:[%s8488_s13 + $0x2b8] sm:$0xff] }
 0x4c8   : > { %3992 = vxpose.xlu0.b32.cont [3/8] (short) %v3984_v6, 128  ;;  %v3987_v15 = vmax.f32 %v3979_v20, 0.0  ;;  %v5230_v6 = vld [vmem:[%s8488_s13 + $0x1a8] sm:$0xff]  ;;  %v5253_v34 = vld [vmem:[%s8488_s13 + $0x260] sm:$0xff] }
 0x4c9   : > { %v6446_v57 = vpack.c.bf16 %v5230_v6, %v5229_v16  ;;  %v5269_v16 = vld [vmem:[%s8488_s13 + $0x2e0] sm:$0xff]  ;;  %v5270_v6 = vld [vmem:[%s8488_s13 + $0x2e8] sm:$0xff] }
 0x4ca   : > { %6369 = vmatpush3.bf16.msra.mxu0 %v6366_v56  ;;  %v5244_v56 = vld [vmem:[%s8488_s13 + $0x218] sm:$0xff] }
 0x4cb   : > { %6371 = vmatprep.subr.bf16.mxu0 %v6370_v10 }
 0x4cc   : > { %3993 = vxpose.xlu0.b32.cont [4/8] (short) %v3985_v31, 128  ;;  %v5234_v31 = vld [vmem:[%s8488_s13 + $0x1c8] sm:$0xff] }
 0x4cd   : > { %v6454_v48 = vpack.c.bf16 %v5234_v31, %v5233_v59  ;;  %v5273_v59 = vld [vmem:[%s8488_s13 + $0x300] sm:$0xff]  ;;  %v5274_v31 = vld [vmem:[%s8488_s13 + $0x308] sm:$0xff] }
 0x4ce   : > { %6373 = vmatpush3.bf16.msra.mxu0 %v6370_v10  ;;  %v6478_v10 = vpack.c.bf16 %v5246_v13, %v5245_v24  ;;  %v5285_v24 = vld [vmem:[%s8488_s13 + $0x360] sm:$0xff]  ;;  %v5286_v13 = vld [vmem:[%s8488_s13 + $0x368] sm:$0xff] }
 0x4d0   : > { %3994 = vxpose.xlu0.b32.cont [5/8] (short) %v3986_v3, 128  ;;  %v5238_v3 = vld [vmem:[%s8488_s13 + $0x1e8] sm:$0xff] }
 0x4d1   : > { %v6462_v20 = vpack.c.bf16 %v5238_v3, %v5237_v18 }
 0x4d4   : > { %3995 = vxpose.xlu0.b32.cont [6/8] (short) %v3987_v15, 128  ;;  %v5242_v15 = vld [vmem:[%s8488_s13 + $0x208] sm:$0xff] }
 0x4d5   : > { %v6470_v19 = vpack.c.bf16 %v5242_v15, %v5241_v11  ;;  %v5280_v11 = vld [vmem:[%s8488_s13 + $0x338] sm:$0xff] }
 0x4d8   : > { %3996 = vxpose.xlu0.b32.cont [7/8] (short) %v3988_v30, 128  ;;  %v6474_v30 = vpack.c.bf16 %v5244_v56, %v5243_v25  ;;  %v5283_v56 = vld [vmem:[%s8488_s13 + $0x350] sm:$0xff] }
 0x4dc   : > { %3997 = vxpose.xlu0.b32.end [8/8] (short) %v3989_v52, 128  ;;  %v5247_v52 = vld [vmem:[%s8488_s13 + $0x230] sm:$0xff] }
 0x540   : > { %v4006_v8 = vpop.trf.xlu0 }
 0x541   : > { %6118 = vmatprep.mubr.f32.mxu1 %v4006_v8  ;;  %v5248_v8 = vld [vmem:[%s8488_s13 + $0x238] sm:$0xff] }
 0x542   : > { %v6482_v55 = vpack.c.bf16 %v5248_v8, %v5247_v52  ;;  %v5287_v52 = vld [vmem:[%s8488_s13 + $0x370] sm:$0xff]  ;;  %v5288_v8 = vld [vmem:[%s8488_s13 + $0x378] sm:$0xff] }
 0x544   : > { %v4007_v63 = vpop.trf.xlu0 }
 0x545   : > { %6119 = vmatmul.mubr.f32.vlgmr.msra.gmra.mrb[72].mxu1 %v4007_v63 }
 0x546   : > { %6409 = vmatpush3.bf16.msra.mxu1 %v6406_v17 }
 0x547   : > { %6411 = vmatprep.subr.bf16.mxu1 %v6410_v28 }
 0x548   : > { %v4008_v35 = vpop.trf.xlu0 }
 0x549   : > { %6083 = vmatprep.mubr.f32.mxu0 %v4008_v35  ;;  %v6494_v35 = vpack.c.bf16 %v5254_v47, %v5253_v34 }
 0x54a   : > { %6413 = vmatpush3.bf16.msra.mxu1 %v6410_v28  ;;  %v5250_v28 = vld [vmem:[%s8488_s13 + $0x248] sm:$0xff] }
 0x54b   : > { %6415 = vmatprep.subr.bf16.mxu1 %v6414_v36  ;;  %v6486_v63 = vpack.c.bf16 %v5250_v28, %v5249_v22  ;;  %v5289_v22 = vld [vmem:[%s8488_s13 + $0x380] sm:$0xff]  ;;  %v5290_v28 = vld [vmem:[%s8488_s13 + $0x388] sm:$0xff] }
 0x54c   : > { %v4009_v46 = vpop.trf.xlu0 }
 0x54d   : > { %6084 = vmatmul.mubr.f32.vlgmr.msra.gmra.mrb[160].mxu0 %v4009_v46  ;;  %v5257_v46 = vld [vmem:[%s8488_s13 + $0x280] sm:$0xff] }
 0x54e   : > { %6417 = vmatpush3.bf16.msra.mxu1 %v6414_v36  ;;  %v6490_v36 = vpack.c.bf16 %v5252_v2, %v5251_v60  ;;  %v5291_v2 = vld [vmem:[%s8488_s13 + $0x390] sm:$0xff] }
 0x54f   : > { %6419 = vmatprep.subr.bf16.mxu1 %v6418_v37 }
 0x550   : > { %v4010_v12 = vpop.trf.xlu0 }
 0x551   : > { %6153 = vmatprep.mubr.f32.mxu1 %v4010_v12  ;;  %v5259_v12 = vld [vmem:[%s8488_s13 + $0x290] sm:$0xff] }
 0x552   : > { %6421 = vmatpush3.bf16.msra.mxu1 %v6418_v37  ;;  %v5255_v37 = vld [vmem:[%s8488_s13 + $0x270] sm:$0xff] }
 0x553   : > { %6423 = vmatprep.subr.bf16.mxu1 %v6422_v45  ;;  %v6498_v42 = vpack.c.bf16 %v5256_v40, %v5255_v37  ;;  %v5294_v37 = vld [vmem:[%s8488_s13 + $0x3a8] sm:$0xff] }
 0x554   : > { %v4011_v62 = vpop.trf.xlu0 }
 0x556   : > { %6425 = vmatpush3.bf16.msra.mxu1 %v6422_v45  ;;  %v5258_v45 = vld [vmem:[%s8488_s13 + $0x288] sm:$0xff] }
 0x557   : > { %6427 = vmatprep.subr.bf16.mxu1 %v6426_v1  ;;  %v6502_v58 = vpack.c.bf16 %v5258_v45, %v5257_v46  ;;  %v5296_v46 = vld [vmem:[%s8488_s13 + $0x3b8] sm:$0xff] }
 0x558   : > { %v4012_v17 = vpop.trf.xlu0 }
 0x55a   : > { %6429 = vmatpush3.bf16.msra.mxu1 %v6426_v1  ;;  %v5260_v1 = vld [vmem:[%s8488_s13 + $0x298] sm:$0xff] }
 0x55b   : > { %6431 = vmatprep.subr.bf16.mxu1 %v6430_v41  ;;  %v6506_v7 = vpack.c.bf16 %v5260_v1, %v5259_v12  ;;  %v5299_v1 = vld [vmem:[%s8488_s13 + $0x3d0] sm:$0xff] }
 0x55c   : > { %v4013_v21 = vpop.trf.xlu0 }
 0x55e   : > { %6433 = vmatpush3.bf16.msra.mxu1 %v6430_v41  ;;  %v5261_v41 = vld [vmem:[%s8488_s13 + $0x2a0] sm:$0xff] }
 0x55f   : > { %6435 = vmatprep.subr.bf16.mxu1 %v6434_v49  ;;  %v6510_v38 = vpack.c.bf16 %v5262_v5, %v5261_v41  ;;  %v5301_v41 = vld [vmem:[%s8488_s13 + $0x3e0] sm:$0xff]  ;;  %v5302_v5 = vld [vmem:[%s8488_s13 + $0x3e8] sm:$0xff] }
 0x560   : > { %v4014_v0 = vpop.trf.xlu0 }
 0x562   : > { %6437 = vmatpush3.bf16.msra.mxu1 %v6434_v49  ;;  %v5263_v49 = vld [vmem:[%s8488_s13 + $0x2b0] sm:$0xff] }
 0x563   : > { %6439 = vmatprep.subr.bf16.mxu1 %v6438_v53  ;;  %v6514_v54 = vpack.c.bf16 %v5264_v14, %v5263_v49  ;;  %v5303_v49 = vld [vmem:[%s8488_s13 + $0x3f0] sm:$0xff]  ;;  %v5304_v14 = vld [vmem:[%s8488_s13 + $0x3f8] sm:$0xff] }
 0x564   : > { %v4015_v29 = vpop.trf.xlu0 }
 0x565   : > { %6154 = vmatmul.mubr.f32.vlgmr.msra.gmra.mrb[72].mxu1 %v4011_v62  ;;  %v5266_v62 = vld [vmem:[%s8488_s13 + $0x2c8] sm:$0xff] }
 0x566   : > { %6441 = vmatpush3.bf16.msra.mxu1 %v6438_v53  ;;  %6188 = vmatprep.mubr.f32.mxu1 %v4012_v17  ;;  %v5265_v53 = vld [vmem:[%s8488_s13 + $0x2c0] sm:$0xff] }
 0x567   : > { %6443 = vmatprep.subr.bf16.mxu1 %v6442_v44  ;;  %v6518_v23 = vpack.c.bf16 %v5266_v62, %v5265_v53 }
 0x568   : > { %v4016_v51 = vpop.trf.xlu0 }
 0x56a   : > { %6445 = vmatpush3.bf16.msra.mxu1 %v6442_v44  ;;  %v5268_v44 = vld [vmem:[%s8488_s13 + $0x2d8] sm:$0xff] }
 0x56b   : > { %6447 = vmatprep.subr.bf16.mxu1 %v6446_v57  ;;  %v6522_v17 = vpack.c.bf16 %v5268_v44, %v5267_v33  ;;  %v4775_v33 = vld [vmem:[%s8490_s15] sm:$0xff]  ;;  %v4776_v44 = vld [vmem:[%s8490_s15 + $0x8] sm:$0xff] }
 0x56c   : > { %v4017_v26 = vpop.trf.xlu0 }
 0x56e   : > { %6449 = vmatpush3.bf16.msra.mxu1 %v6446_v57  ;;  %v6526_v57 = vpack.c.bf16 %v5270_v6, %v5269_v16  ;;  %v4777_v16 = vld [vmem:[%s8490_s15 + $0x10] sm:$0xff]  ;;  %v4778_v6 = vld [vmem:[%s8490_s15 + $0x18] sm:$0xff] }
 0x56f   : > { %6451 = vmatprep.subr.bf16.mxu1 %v6450_v27 }
 0x570   : > { %v4018_v3 = vpop.trf.xlu0 }
 0x572   : > { %6453 = vmatpush3.bf16.msra.mxu1 %v6450_v27  ;;  %v6530_v27 = vpack.c.bf16 %v5272_v50, %v5271_v43  ;;  %v4770_v50 = vld [vmem:[%s563_s1 + $0x8] sm:$0xff] }
 0x573   : > { %6455 = vmatprep.subr.bf16.mxu1 %v6454_v48 }
 0x574   : > { %v4019_v60 = vpop.trf.xlu0 }
 0x576   : > { %6457 = vmatpush3.bf16.msra.mxu1 %v6454_v48  ;;  %v6534_v48 = vpack.c.bf16 %v5274_v31, %v5273_v59  ;;  %v4769_v31 = vld [vmem:[%s563_s1] sm:$0xff] }
 0x577   : > { %6459 = vmatprep.subr.bf16.mxu1 %v6458_v61 }
 0x578   : > { %v4020_v47 = vpop.trf.xlu0 }
 0x57a   : > { %6461 = vmatpush3.bf16.msra.mxu1 %v6458_v61  ;;  %v5276_v61 = vld [vmem:[%s8488_s13 + $0x318] sm:$0xff] }
 0x57b   : > { %6463 = vmatprep.subr.bf16.mxu1 %v6462_v20  ;;  %v6538_v18 = vpack.c.bf16 %v5276_v61, %v5275_v32 }
 0x57c   : > { %v4021_v53 = vpop.trf.xlu0 }
 0x57e   : > { %6465 = vmatpush3.bf16.msra.mxu1 %v6462_v20  ;;  %v5277_v20 = vld [vmem:[%s8488_s13 + $0x320] sm:$0xff] }
 0x57f   : > { %6467 = vmatprep.subr.bf16.mxu1 %v6466_v9  ;;  %v6542_v39 = vpack.c.bf16 %v5278_v4, %v5277_v20 }
 0x582   : > { %6469 = vmatpush3.bf16.msra.mxu1 %v6466_v9  ;;  %v5279_v9 = vld [vmem:[%s8488_s13 + $0x330] sm:$0xff] }
 0x583   : > { %6471 = vmatprep.subr.bf16.mxu1 %v6470_v19  ;;  %v6546_v15 = vpack.c.bf16 %v5280_v11, %v5279_v9 }
 0x585   : > { %6189 = vmatmul.mubr.f32.vlgmr.msra.gmra.mrb[72].mxu1 %v4013_v21  ;;  %v5282_v21 = vld [vmem:[%s8488_s13 + $0x348] sm:$0xff] }
 0x586   : > { %6473 = vmatpush3.bf16.msra.mxu1 %v6470_v19  ;;  %6223 = vmatprep.mubr.f32.mxu1 %v4014_v0  ;;  %v5281_v19 = vld [vmem:[%s8488_s13 + $0x340] sm:$0xff] }
 0x587   : > { %6475 = vmatprep.subr.bf16.mxu1 %v6474_v30  ;;  %v6550_v25 = vpack.c.bf16 %v5282_v21, %v5281_v19 }
 0x58a   : > { %6477 = vmatpush3.bf16.msra.mxu1 %v6474_v30  ;;  %v5284_v30 = vld [vmem:[%s8488_s13 + $0x358] sm:$0xff] }
 0x58b   : > { %6479 = vmatprep.subr.bf16.mxu1 %v6478_v10  ;;  %v6554_v0 = vpack.c.bf16 %v5284_v30, %v5283_v56 }
 0x58e   : > { %6481 = vmatpush3.bf16.msra.mxu1 %v6478_v10  ;;  %v6558_v10 = vpack.c.bf16 %v5286_v13, %v5285_v24 }
 0x58f   : > { %6483 = vmatprep.subr.bf16.mxu1 %v6482_v55 }
 0x592   : > { %6485 = vmatpush3.bf16.msra.mxu1 %v6482_v55  ;;  %v6562_v55 = vpack.c.bf16 %v5288_v8, %v5287_v52 }
 0x593   : > { %6487 = vmatprep.subr.bf16.mxu1 %v6486_v63 }
 0x596   : > { %6489 = vmatpush3.bf16.msra.mxu1 %v6486_v63  ;;  %v6566_v63 = vpack.c.bf16 %v5290_v28, %v5289_v22 }
 0x597   : > { %6491 = vmatprep.subr.bf16.mxu1 %v6490_v36 }
 0x59a   : > { %6493 = vmatpush3.bf16.msra.mxu1 %v6490_v36  ;;  %v5292_v36 = vld [vmem:[%s8488_s13 + $0x398] sm:$0xff] }
 0x59b   : > { %6495 = vmatprep.subr.bf16.mxu1 %v6494_v35  ;;  %v6570_v34 = vpack.c.bf16 %v5292_v36, %v5291_v2 }
 0x59e   : > { %6497 = vmatpush3.bf16.msra.mxu1 %v6494_v35  ;;  %v5293_v35 = vld [vmem:[%s8488_s13 + $0x3a0] sm:$0xff] }
 0x59f   : > { %6499 = vmatprep.subr.bf16.mxu1 %v6498_v42  ;;  %v6574_v40 = vpack.c.bf16 %v5294_v37, %v5293_v35 }
 0x5a2   : > { %6501 = vmatpush3.bf16.msra.mxu1 %v6498_v42  ;;  %v5295_v42 = vld [vmem:[%s8488_s13 + $0x3b0] sm:$0xff] }
 0x5a3   : > { %6503 = vmatprep.subr.bf16.mxu1 %v6502_v58  ;;  %v6578_v45 = vpack.c.bf16 %v5296_v46, %v5295_v42 }
 0x5a5   : > { %6224 = vmatmul.mubr.f32.vlgmr.msra.gmra.mrb[72].mxu1 %v4015_v29  ;;  %v5298_v29 = vld [vmem:[%s8488_s13 + $0x3c8] sm:$0xff] }
 0x5a6   : > { %6505 = vmatpush3.bf16.msra.mxu1 %v6502_v58  ;;  %6258 = vmatprep.mubr.f32.mxu1 %v4016_v51  ;;  %v5297_v58 = vld [vmem:[%s8488_s13 + $0x3c0] sm:$0xff] }
 0x5a7   : > { %6507 = vmatprep.subr.bf16.mxu1 %v6506_v7  ;;  %v6582_v12 = vpack.c.bf16 %v5298_v29, %v5297_v58 }
 0x5aa   : > { %6509 = vmatpush3.bf16.msra.mxu1 %v6506_v7  ;;  %v5300_v7 = vld [vmem:[%s8488_s13 + $0x3d8] sm:$0xff] }
 0x5ab   : > { %6511 = vmatprep.subr.bf16.mxu1 %v6510_v38  ;;  %v6586_v51 = vpack.c.bf16 %v5300_v7, %v5299_v1 }
 0x5ae   : > { %6513 = vmatpush3.bf16.msra.mxu1 %v6510_v38  ;;  %v6590_v38 = vpack.c.bf16 %v5302_v5, %v5301_v41 }
 0x5af   : > { %6515 = vmatprep.subr.bf16.mxu1 %v6514_v54 }
 0x5b2   : > { %6517 = vmatpush3.bf16.msra.mxu1 %v6514_v54  ;;  %v6594_v54 = vpack.c.bf16 %v5304_v14, %v5303_v49 }
 0x5b3   : > { %6519 = vmatprep.subr.bf16.mxu1 %v6518_v23 }
 0x5b6   : > { %6521 = vmatpush3.bf16.msra.mxu1 %v6518_v23 }
 0x5b7   : > { %6523 = vmatprep.subr.bf16.mxu1 %v6522_v17 }
 0x5ba   : > { %6525 = vmatpush3.bf16.msra.mxu1 %v6522_v17  ;;  %v6598_v17 = vpack.c.bf16 %v4776_v44, %v4775_v33 }
 0x5bb   : > { %6527 = vmatprep.subr.bf16.mxu1 %v6526_v57 }
 0x5be   : > { %6529 = vmatpush3.bf16.msra.mxu1 %v6526_v57  ;;  %v6602_v57 = vpack.c.bf16 %v4778_v6, %v4777_v16 }
 0x5bf   : > { %6531 = vmatprep.subr.bf16.mxu1 %v6530_v27 }
 0x5c2   : > { %6533 = vmatpush3.bf16.msra.mxu1 %v6530_v27 }
 0x5c3   : > { %6535 = vmatprep.subr.bf16.mxu1 %v6534_v48 }
 0x5c5   : > { %6259 = vmatmul.mubr.f32.vlgmr.msra.gmra.mrb[72].mxu1 %v4017_v26 }
 0x5c6   : > { %6537 = vmatpush3.bf16.msra.mxu1 %v6534_v48  ;;  %6293 = vmatprep.mubr.f32.mxu1 %v4018_v3  ;;  %v5305_v3 = vld [vmem:[%s8491_s16] ss:$0 sm:$0xff] }
 0x5c7   : > { %6539 = vmatprep.subr.bf16.mxu1 %v6538_v18 }
 0x5ca   : > { %6541 = vmatpush3.bf16.msra.mxu1 %v6538_v18 }
 0x5cb   : > { %6543 = vmatprep.subr.bf16.mxu1 %v6542_v39 }
 0x5ce   : > { %6545 = vmatpush3.bf16.msra.mxu1 %v6542_v39 }
 0x5cf   : > { %6547 = vmatprep.subr.bf16.mxu1 %v6546_v15 }
 0x5d2   : > { %6549 = vmatpush3.bf16.msra.mxu1 %v6546_v15 }
 0x5d3   : > { %6551 = vmatprep.subr.bf16.mxu1 %v6550_v25 }
 0x5d6   : > { %6553 = vmatpush3.bf16.msra.mxu1 %v6550_v25 }
 0x5d7   : > { %6555 = vmatprep.subr.bf16.mxu1 %v6554_v0 }
 0x5da   : > { %6557 = vmatpush3.bf16.msra.mxu1 %v6554_v0 }
 0x5db   : > { %6559 = vmatprep.subr.bf16.mxu1 %v6558_v10 }
 0x5de   : > { %6561 = vmatpush3.bf16.msra.mxu1 %v6558_v10 }
 0x5df   : > { %6563 = vmatprep.subr.bf16.mxu1 %v6562_v55 }
 0x5e2   : > { %6565 = vmatpush3.bf16.msra.mxu1 %v6562_v55 }
 0x5e3   : > { %6567 = vmatprep.subr.bf16.mxu1 %v6566_v63 }
 0x5e5   : > { %6294 = vmatmul.mubr.f32.vlgmr.msra.gmra.mrb[72].mxu1 %v4019_v60 }
 0x5e6   : > { %6569 = vmatpush3.bf16.msra.mxu1 %v6566_v63  ;;  %6328 = vmatprep.mubr.f32.mxu1 %v4020_v47 }
 0x5e7   : > { %6571 = vmatprep.subr.bf16.mxu1 %v6570_v34 }
 0x5ea   : > { %6573 = vmatpush3.bf16.msra.mxu1 %v6570_v34 }
 0x5eb   : > { %6575 = vmatprep.subr.bf16.mxu1 %v6574_v40 }
 0x5ee   : > { %6577 = vmatpush3.bf16.msra.mxu1 %v6574_v40 }
 0x5ef   : > { %6579 = vmatprep.subr.bf16.mxu1 %v6578_v45 }
 0x5f2   : > { %6581 = vmatpush3.bf16.msra.mxu1 %v6578_v45 }
 0x5f3   : > { %6583 = vmatprep.subr.bf16.mxu1 %v6582_v12 }
 0x5f6   : > { %6585 = vmatpush3.bf16.msra.mxu1 %v6582_v12 }
 0x5f7   : > { %6587 = vmatprep.subr.bf16.mxu1 %v6586_v51 }
 0x5fa   : > { %6589 = vmatpush3.bf16.msra.mxu1 %v6586_v51 }
 0x5fb   : > { %6591 = vmatprep.subr.bf16.mxu1 %v6590_v38 }
 0x5fe   : > { %6593 = vmatpush3.bf16.msra.mxu1 %v6590_v38 }
 0x5ff   : > { %6595 = vmatprep.subr.bf16.mxu1 %v6594_v54 }
 0x602   : > { %6597 = vmatpush3.bf16.msra.mxu1 %v6594_v54 }
 0x603   : > { %6599 = vmatprep.subr.bf16.mxu1 %v6598_v17 }
 0x605   : > { %6329 = vmatmul.mubr.f32.vlgmr.msra.gmra.mrb[72].mxu1 %v4021_v53 }
 0x606   : > { %6601 = vmatpush3.bf16.msra.mxu1 %v6598_v17 }
 0x607   : > { %6603 = vmatprep.subr.bf16.mxu1 %v6602_v57 }
 0x60a   : > { %6605 = vmatpush3.bf16.msra.mxu1 %v6602_v57 }
 0x620   : > { %v6085_v62 = vpop.f32.mrb[160].mxu0 }
 0x621   : > { %v4121_v23 = vpop.f32.mrb[161].mxu0 }
 0x6d8   : > { %v6330_v43 = vpop.f32.mrb[72].mxu1 }
 0x6d9   : > { %v6606_v27 = vadd.f32 %v6330_v43, %v6085_v62  ;;  %v4758_v59 = vpop.f32.mrb[73].mxu1 }
 0x6da   : > { %v6607_v48 = vadd.f32 %v4758_v59, %v4121_v23 }
 0x6db   : > { %v4772_v26 = vadd.f32 %v6606_v27, %v4770_v50 }
 0x6dc   : > { %v4771_v32 = vadd.f32 %v6607_v48, %v4769_v31 }
 0x6dd   : > { %v4774_v18 = vmax.f32 %v4772_v26, 0.0 }
 0x6de   : > { %v4773_v61 = vmax.f32 %v4771_v32, 0.0 }
 0x6e0   : > { %6339 = vmatprep.mubr.msk.f32.mxu1 %vm4786_vm1, %v4773_v61 }
 0x6e1   : > { %6340 = vmatmul.mubr.msk.f32.vlgmr.msra.gmra.mrb[74].mxu1 %vm4786_vm1, %v4774_v18 }
 0x7b4   : > { %v6341_v20 = vpop.f32.mrb[74].mxu1 }
 0x7b5   : > { %v4865_v4 = vadd.f32 %v6341_v20, %v5305_v3  ;;  %v4859_v39 = vpop.f32.mrb[75].mxu1 }
 0x7b6   : > { %v4860_v9 = vadd.f32 %v5305_v3, %v4859_v39 }
 0x7b7   : > { %4869 = vst [vmem:[%s568_s26 + $0x8] sm:$0xff] %v4865_v4 }
 0x7b8   : > { %4868 = vst [vmem:[%s568_s26] sm:$0xff] %v4860_v9 }
 0x7b9 PF: > { %s27_s24 = sadd.s32 1, %s6875_s24  }
 0x7ba   : > { %p24_p4 = scmp.ge.s32.totalorder %s27_s24, 4  }
 0x7bc   :  { %26 = sbr.rel (!%p24_p4) target bundleno = 3 (0x3), region = 131 }

</bundles_post_ra>
